<compile_context>
chip_gen: v6e
topology: v6e:2x2x1
jax: 0.10.0
libtpu: 0.0.40
codegen_flags: <defaults>
</compile_context>

<pallas_src>
import math
from functools import partial

import jax
import jax.numpy as jnp
from jax.experimental import pallas as pl
from jax.experimental.pallas import tpu as pltpu


# ----------------------------------------------------------------------------
# Pallas kernel: the whole 3-layer stack in a single launch
# ----------------------------------------------------------------------------
def _transformer_kernel(x_ref, wqkv_ref, wo_ref,
                        n1w_ref, n1b_ref,
                        ffw1_ref, ffb1_ref, ffw2_ref, ffb2_ref,
                        n2w_ref, n2b_ref,
                        out_ref, attn_ref, *, n_heads):
    x = x_ref[...].astype(jnp.float32)                  # (B, N, E)
    B, N, E = x.shape
    M = B * N
    n_layers = wqkv_ref.shape[0]
    kd = E // n_heads
    vd = kd
    norm_factor = 1.0 / math.sqrt(kd)
    inv_m = 1.0 / M
    eps = 1e-5

    def batch_norm(z, w, b):
        # `Normalization` module: F.batch_norm(z.view(-1, E), training=True,
        # weight=w, bias=b) -- single-pass batch statistics.
        s1 = jnp.sum(z, axis=0, keepdims=True)
        s2 = jnp.sum(z * z, axis=0, keepdims=True)
        mu = s1 * inv_m
        var = s2 * inv_m - mu * mu
        return (z - mu) * jax.lax.rsqrt(var + eps) * w + b

    h = x.reshape(M, E)                                 # flattened activations
    for l in range(n_layers):                           # static unroll (3 layers)
        # ---- multi-head attention: fused QKV + fused out-projection --------
        qkv = jnp.dot(h, wqkv_ref[l],
                      preferred_element_type=jnp.float32)          # (M, 3*H*kd)

        head_outs = []
        for hh in range(n_heads):                       # static unroll (4 heads)
            qh = qkv[:, hh * kd:(hh + 1) * kd].reshape(B, N, kd)
            kh = qkv[:, (n_heads + hh) * kd:(n_heads + hh + 1) * kd].reshape(B, N, kd)
            vh = qkv[:, (2 * n_heads + hh) * kd:(2 * n_heads + hh + 1) * kd].reshape(B, N, vd)

            compat = norm_factor * jnp.einsum(
                'bqk,bnk->bqn', qh, kh, preferred_element_type=jnp.float32)
            compat = compat - jnp.max(compat, axis=-1, keepdims=True)
            ex = jnp.exp(compat)
            attn = ex / jnp.sum(ex, axis=-1, keepdims=True)        # (B, N, N)

            if l == n_layers - 1:                       # only the last layer's
                attn_ref[hh] = attn.astype(attn_ref.dtype)         # attn is consumed

            head_outs.append(
                jnp.einsum('bqn,bnv->bqv', attn, vh,
                           preferred_element_type=jnp.float32).reshape(M, vd))

        heads_cat = jnp.concatenate(head_outs, axis=-1)            # (M, H*vd)
        mha = jnp.dot(heads_cat, wo_ref[l],
                      preferred_element_type=jnp.float32)          # (M, E)

        # ---- residual/dropout + BN + FF + residual/dropout + BN ------------
        y = mha + mha                                   # x + dropout(x), eval mode
        y = batch_norm(y, n1w_ref[l], n1b_ref[l])

        h1 = jnp.dot(y, ffw1_ref[l], preferred_element_type=jnp.float32) + ffb1_ref[l]
        h1 = jnp.maximum(h1, 0.0)                       # ReLU
        ff = jnp.dot(h1, ffw2_ref[l], preferred_element_type=jnp.float32) + ffb2_ref[l]

        y = y + ff                                      # FF residual
        y = y + y                                       # x + dropout(x), eval mode
        y = batch_norm(y, n2w_ref[l], n2b_ref[l])
        h = y

    out_ref[...] = h.reshape(B, N, E).astype(out_ref.dtype)


def transformer_pallas(x, fused, n_heads):
    """Runs the full 3-layer stack in a single Pallas kernel launch."""
    B, N, E = x.shape
    vmem = pl.BlockSpec(memory_space=pltpu.MemorySpace.VMEM)
    out, attn = pl.pallas_call(
        partial(_transformer_kernel, n_heads=n_heads),
        out_shape=(jax.ShapeDtypeStruct((B, N, E), jnp.float32),
                   jax.ShapeDtypeStruct((n_heads, B, N, N), jnp.float32)),
        in_specs=[vmem] * 11,
        out_specs=(vmem, vmem),
    )(x,
      fused['wqkv'], fused['wo'],
      fused['norm1_w'], fused['norm1_b'],
      fused['ff_w1_t'], fused['ff_b1'], fused['ff_w2_t'], fused['ff_b2'],
      fused['norm2_w'], fused['norm2_b'])
    return out, attn


@partial(jax.jit, static_argnames=('n_heads',))
def transformer_forward(x, fused, n_heads):
    return transformer_pallas(x, fused, n_heads)


# ----------------------------------------------------------------------------
# Parameter construction (deterministic, mirrors the PyTorch shapes)
# ----------------------------------------------------------------------------
def init_layer_params(key, n_heads, embed_dim, feed_forward_hidden):
    kd = embed_dim // n_heads
    vd = kd
    ks = jax.random.split(key, 8)

    def u(k, shape, last):
        s = 1.0 / math.sqrt(last)
        return jax.random.uniform(k, shape, jnp.float32, -s, s)

    w1 = u(ks[4], (feed_forward_hidden, embed_dim), embed_dim)   # nn.Linear (out,in)
    b1 = u(ks[5], (feed_forward_hidden,), embed_dim)
    w2 = u(ks[6], (embed_dim, feed_forward_hidden), feed_forward_hidden)
    b2 = u(ks[7], (embed_dim,), feed_forward_hidden)

    return {
        'W_query': u(ks[0], (n_heads, embed_dim, kd), kd),
        'W_key':   u(ks[1], (n_heads, embed_dim, kd), kd),
        'W_val':   u(ks[2], (n_heads, embed_dim, vd), vd),
        'W_out':   u(ks[3], (n_heads, vd, embed_dim), embed_dim),
        # BatchNorm affine params (PyTorch default init: weight=1, bias=0)
        'norm1_w': jnp.ones((1, embed_dim), jnp.float32),
        'norm1_b': jnp.zeros((1, embed_dim), jnp.float32),
        'norm2_w': jnp.ones((1, embed_dim), jnp.float32),
        'norm2_b': jnp.zeros((1, embed_dim), jnp.float32),
        # FF weights pre-transposed so the kernel does plain x @ W
        'ff_w1_t': w1.T,                               # (E, H_ff)
        'ff_b1':   b1.reshape(1, feed_forward_hidden),
        'ff_w2_t': w2.T,                               # (H_ff, E)
        'ff_b2':   b2.reshape(1, embed_dim),
    }


def fuse_and_stack(params_list):
    """Pre-fuses per-head QKV / W_out and stacks all layers on a leading axis."""
    def fuse_qkv(p):
        H, E, kd = p['W_query'].shape
        q = jnp.transpose(p['W_query'], (1, 0, 2)).reshape(E, H * kd)
        k = jnp.transpose(p['W_key'],   (1, 0, 2)).reshape(E, H * kd)
        v = jnp.transpose(p['W_val'],   (1, 0, 2)).reshape(E, H * kd)
        return jnp.concatenate([q, k, v], axis=-1)     # (E, 3*H*kd) = [Q|K|V]

    def fuse_wo(p):
        H, vd, E = p['W_out'].shape
        return p['W_out'].reshape(H * vd, E)           # heads stacked on rows

    stack = lambda name: jnp.stack([p[name] for p in params_list])
    return {
        'wqkv':    jnp.stack([fuse_qkv(p) for p in params_list]),
        'wo':      jnp.stack([fuse_wo(p) for p in params_list]),
        'norm1_w': stack('norm1_w'), 'norm1_b': stack('norm1_b'),
        'norm2_w': stack('norm2_w'), 'norm2_b': stack('norm2_b'),
        'ff_w1_t': stack('ff_w1_t'), 'ff_b1': stack('ff_b1'),
        'ff_w2_t': stack('ff_w2_t'), 'ff_b2': stack('ff_b2'),
    }


# ----------------------------------------------------------------------------
# Pure-JAX reference (unfused, per-head, two-pass BN) for a sanity check
# ----------------------------------------------------------------------------
def layer_ref(x, p):
    B, N, E = x.shape
    xf = x.reshape(B * N, E)
    Wq, Wk, Wv, Wo = p['W_query'], p['W_key'], p['W_val'], p['W_out']
    kd = Wq.shape[2]
    Q = jnp.einsum('me,hek->hmk', xf, Wq).reshape(-1, B, N, kd)
    K = jnp.einsum('me,hek->hmk', xf, Wk).reshape(-1, B, N, kd)
    V = jnp.einsum('me,hek->hmk', xf, Wv).reshape(-1, B, N, kd)
    compat = (1.0 / math.sqrt(kd)) * jnp.einsum('hbqk,hbnk->hbqn', Q, K)
    attn = jax.nn.softmax(compat, axis=-1)
    heads = jnp.einsum('hbqn,hbnv->hbqv', attn, V)
    a = jnp.einsum('hbqv,hve->bqe', heads, Wo).reshape(B * N, E)

    def bn(z, w, b):
        mu = jnp.mean(z, axis=0, keepdims=True)
        var = jnp.mean((z - mu) ** 2, axis=0, keepdims=True)
        return (z - mu) / jnp.sqrt(var + 1e-5) * w + b

    y = a + a
    y = bn(y, p['norm1_w'], p['norm1_b'])
    ff = jnp.maximum(y @ p['ff_w1_t'] + p['ff_b1'], 0.0) @ p['ff_w2_t'] + p['ff_b2']
    y = y + ff
    y = y + y
    y = bn(y, p['norm2_w'], p['norm2_b'])
    return y.reshape(B, N, E), attn


def transformer_ref(x, params_list):
    h = x
    attn = None
    for p in params_list:
        h, attn = layer_ref(h, p)
    return h, attn


# ----------------------------------------------------------------------------
if __name__ == "__main__":
    n_heads = 4
    embed_dim = 32
    n_layers = 3
    feed_forward_hidden = 64
    B, N = 2, 8                       # batch, graph_size

    key = jax.random.PRNGKey(0)
    kx, *kls = jax.random.split(key, 1 + n_layers)
    x = jax.random.normal(kx, (B, N, embed_dim), jnp.float32)
    params_list = [init_layer_params(k, n_heads, embed_dim, feed_forward_hidden)
                   for k in kls]
    fused = fuse_and_stack(params_list)

    h, attn3 = transformer_forward(x, fused, n_heads)
    h = jax.block_until_ready(h)
    attn3 = jax.block_until_ready(attn3)

    # sanity check against the pure-JAX reference
    h_ref, attn3_ref = transformer_ref(x, params_list)
    assert h.shape == (B, N, embed_dim)
    assert attn3.shape == (n_heads, B, N, N)
    assert jnp.max(jnp.abs(h - h_ref)) < 1e-3
    assert jnp.max(jnp.abs(attn3 - attn3_ref)) < 5e-4

    print("KERNEL_OK")
</pallas_src>

<mosaic_0001>
module attributes {stable_mosaic.version = 11 : i64} {
  func.func @_transformer_kernel(%arg0: memref<2x8x32xf32, #tpu.memory_space<vmem>>, %arg1: memref<3x32x96xf32, #tpu.memory_space<vmem>>, %arg2: memref<3x32x32xf32, #tpu.memory_space<vmem>>, %arg3: memref<3x1x32xf32, #tpu.memory_space<vmem>>, %arg4: memref<3x1x32xf32, #tpu.memory_space<vmem>>, %arg5: memref<3x32x64xf32, #tpu.memory_space<vmem>>, %arg6: memref<3x1x64xf32, #tpu.memory_space<vmem>>, %arg7: memref<3x64x32xf32, #tpu.memory_space<vmem>>, %arg8: memref<3x1x32xf32, #tpu.memory_space<vmem>>, %arg9: memref<3x1x32xf32, #tpu.memory_space<vmem>>, %arg10: memref<3x1x32xf32, #tpu.memory_space<vmem>>, %arg11: memref<2x8x32xf32, #tpu.memory_space<vmem>>, %arg12: memref<4x2x8x8xf32, #tpu.memory_space<vmem>>) attributes {dimension_semantics = [], scalar_prefetch = 0 : i64, scratch_operands = 0 : i64, tpu.core_type = #tpu.core_type<tc>} {
    %c0 = arith.constant 0 : index
    %c0_0 = arith.constant 0 : index
    %c0_1 = arith.constant 0 : index
    %0 = vector.load %arg0[%c0, %c0_0, %c0_1] : memref<2x8x32xf32, #tpu.memory_space<vmem>>, vector<2x8x32xf32>
    %1 = vector.shape_cast %0 : vector<2x8x32xf32> to vector<16x32xf32>
    %c0_2 = arith.constant 0 : index
    %c0_3 = arith.constant 0 : index
    %c0_4 = arith.constant 0 : index
    %2 = vector.load %arg1[%c0_2, %c0_3, %c0_4] : memref<3x32x96xf32, #tpu.memory_space<vmem>>, vector<1x32x96xf32>
    %3 = vector.shape_cast %2 : vector<1x32x96xf32> to vector<32x96xf32>
    %cst = arith.constant dense<0.000000e+00> : vector<16x96xf32>
    %4 = tpu.matmul %1, %3, %cst {dimension_numbers = #tpu.dot_dimension_numbers<[1], [0], [0], [1], [0, 0, 1, 1], [], []>} : vector<16x32xf32>, vector<32x96xf32>, vector<16x96xf32> -> vector<16x96xf32>
    %5 = vector.extract_strided_slice %4 {offsets = [0, 0], sizes = [16, 8], strides = [1, 1]} : vector<16x96xf32> to vector<16x8xf32>
    %6 = vector.shape_cast %5 : vector<16x8xf32> to vector<2x8x8xf32>
    %7 = vector.extract_strided_slice %4 {offsets = [0, 32], sizes = [16, 8], strides = [1, 1]} : vector<16x96xf32> to vector<16x8xf32>
    %8 = vector.shape_cast %7 : vector<16x8xf32> to vector<2x8x8xf32>
    %9 = vector.extract_strided_slice %4 {offsets = [0, 64], sizes = [16, 8], strides = [1, 1]} : vector<16x96xf32> to vector<16x8xf32>
    %10 = vector.shape_cast %9 : vector<16x8xf32> to vector<2x8x8xf32>
    "tpu.trace_start"() <{level = 10 : i32, message = "bqk,bnk->bqn"}> : () -> ()
    %cst_5 = arith.constant dense<0.000000e+00> : vector<2x8x8xf32>
    %11 = tpu.matmul %6, %8, %cst_5 {dimension_numbers = #tpu.dot_dimension_numbers<[2], [2], [1], [1], [0, 0, 0, 1, 1, 1], [0], [0]>} : vector<2x8x8xf32>, vector<2x8x8xf32>, vector<2x8x8xf32> -> vector<2x8x8xf32>
    "tpu.trace_stop"() : () -> ()
    %cst_6 = arith.constant 0.353553385 : f32
    %12 = vector.broadcast %cst_6 : f32 to vector<2x8x8xf32>
    %13 = arith.mulf %12, %11 : vector<2x8x8xf32>
    %cst_7 = arith.constant dense<0xFF800000> : vector<2x8xf32>
    %14 = vector.multi_reduction <maximumf>, %13, %cst_7 [2] : vector<2x8x8xf32> to vector<2x8xf32>
    %15 = vector.shape_cast %14 : vector<2x8xf32> to vector<2x8x1xf32>
    %16 = vector.broadcast %15 : vector<2x8x1xf32> to vector<2x8x8xf32>
    %17 = arith.subf %13, %16 : vector<2x8x8xf32>
    %18 = math.exp %17 : vector<2x8x8xf32>
    %cst_8 = arith.constant dense<0.000000e+00> : vector<2x8xf32>
    %19 = vector.multi_reduction <add>, %18, %cst_8 [2] : vector<2x8x8xf32> to vector<2x8xf32>
    %20 = vector.shape_cast %19 : vector<2x8xf32> to vector<2x8x1xf32>
    %21 = vector.broadcast %20 : vector<2x8x1xf32> to vector<2x8x8xf32>
    %22 = arith.divf %18, %21 : vector<2x8x8xf32>
    "tpu.trace_start"() <{level = 10 : i32, message = "bqn,bnv->bqv"}> : () -> ()
    %cst_9 = arith.constant dense<0.000000e+00> : vector<2x8x8xf32>
    %23 = tpu.matmul %22, %10, %cst_9 {dimension_numbers = #tpu.dot_dimension_numbers<[2], [1], [1], [2], [0, 0, 0, 1, 1, 2], [0], [0]>} : vector<2x8x8xf32>, vector<2x8x8xf32>, vector<2x8x8xf32> -> vector<2x8x8xf32>
    "tpu.trace_stop"() : () -> ()
    %24 = vector.shape_cast %23 : vector<2x8x8xf32> to vector<16x8xf32>
    %25 = vector.extract_strided_slice %4 {offsets = [0, 8], sizes = [16, 8], strides = [1, 1]} : vector<16x96xf32> to vector<16x8xf32>
    %26 = vector.shape_cast %25 : vector<16x8xf32> to vector<2x8x8xf32>
    %27 = vector.extract_strided_slice %4 {offsets = [0, 40], sizes = [16, 8], strides = [1, 1]} : vector<16x96xf32> to vector<16x8xf32>
    %28 = vector.shape_cast %27 : vector<16x8xf32> to vector<2x8x8xf32>
    %29 = vector.extract_strided_slice %4 {offsets = [0, 72], sizes = [16, 8], strides = [1, 1]} : vector<16x96xf32> to vector<16x8xf32>
    %30 = vector.shape_cast %29 : vector<16x8xf32> to vector<2x8x8xf32>
    "tpu.trace_start"() <{level = 10 : i32, message = "bqk,bnk->bqn"}> : () -> ()
    %cst_10 = arith.constant dense<0.000000e+00> : vector<2x8x8xf32>
    %31 = tpu.matmul %26, %28, %cst_10 {dimension_numbers = #tpu.dot_dimension_numbers<[2], [2], [1], [1], [0, 0, 0, 1, 1, 1], [0], [0]>} : vector<2x8x8xf32>, vector<2x8x8xf32>, vector<2x8x8xf32> -> vector<2x8x8xf32>
    "tpu.trace_stop"() : () -> ()
    %cst_11 = arith.constant 0.353553385 : f32
    %32 = vector.broadcast %cst_11 : f32 to vector<2x8x8xf32>
    %33 = arith.mulf %32, %31 : vector<2x8x8xf32>
    %cst_12 = arith.constant dense<0xFF800000> : vector<2x8xf32>
    %34 = vector.multi_reduction <maximumf>, %33, %cst_12 [2] : vector<2x8x8xf32> to vector<2x8xf32>
    %35 = vector.shape_cast %34 : vector<2x8xf32> to vector<2x8x1xf32>
    %36 = vector.broadcast %35 : vector<2x8x1xf32> to vector<2x8x8xf32>
    %37 = arith.subf %33, %36 : vector<2x8x8xf32>
    %38 = math.exp %37 : vector<2x8x8xf32>
    %cst_13 = arith.constant dense<0.000000e+00> : vector<2x8xf32>
    %39 = vector.multi_reduction <add>, %38, %cst_13 [2] : vector<2x8x8xf32> to vector<2x8xf32>
    %40 = vector.shape_cast %39 : vector<2x8xf32> to vector<2x8x1xf32>
    %41 = vector.broadcast %40 : vector<2x8x1xf32> to vector<2x8x8xf32>
    %42 = arith.divf %38, %41 : vector<2x8x8xf32>
    "tpu.trace_start"() <{level = 10 : i32, message = "bqn,bnv->bqv"}> : () -> ()
    %cst_14 = arith.constant dense<0.000000e+00> : vector<2x8x8xf32>
    %43 = tpu.matmul %42, %30, %cst_14 {dimension_numbers = #tpu.dot_dimension_numbers<[2], [1], [1], [2], [0, 0, 0, 1, 1, 2], [0], [0]>} : vector<2x8x8xf32>, vector<2x8x8xf32>, vector<2x8x8xf32> -> vector<2x8x8xf32>
    "tpu.trace_stop"() : () -> ()
    %44 = vector.shape_cast %43 : vector<2x8x8xf32> to vector<16x8xf32>
    %45 = vector.extract_strided_slice %4 {offsets = [0, 16], sizes = [16, 8], strides = [1, 1]} : vector<16x96xf32> to vector<16x8xf32>
    %46 = vector.shape_cast %45 : vector<16x8xf32> to vector<2x8x8xf32>
    %47 = vector.extract_strided_slice %4 {offsets = [0, 48], sizes = [16, 8], strides = [1, 1]} : vector<16x96xf32> to vector<16x8xf32>
    %48 = vector.shape_cast %47 : vector<16x8xf32> to vector<2x8x8xf32>
    %49 = vector.extract_strided_slice %4 {offsets = [0, 80], sizes = [16, 8], strides = [1, 1]} : vector<16x96xf32> to vector<16x8xf32>
    %50 = vector.shape_cast %49 : vector<16x8xf32> to vector<2x8x8xf32>
    "tpu.trace_start"() <{level = 10 : i32, message = "bqk,bnk->bqn"}> : () -> ()
    %cst_15 = arith.constant dense<0.000000e+00> : vector<2x8x8xf32>
    %51 = tpu.matmul %46, %48, %cst_15 {dimension_numbers = #tpu.dot_dimension_numbers<[2], [2], [1], [1], [0, 0, 0, 1, 1, 1], [0], [0]>} : vector<2x8x8xf32>, vector<2x8x8xf32>, vector<2x8x8xf32> -> vector<2x8x8xf32>
    "tpu.trace_stop"() : () -> ()
    %cst_16 = arith.constant 0.353553385 : f32
    %52 = vector.broadcast %cst_16 : f32 to vector<2x8x8xf32>
    %53 = arith.mulf %52, %51 : vector<2x8x8xf32>
    %cst_17 = arith.constant dense<0xFF800000> : vector<2x8xf32>
    %54 = vector.multi_reduction <maximumf>, %53, %cst_17 [2] : vector<2x8x8xf32> to vector<2x8xf32>
    %55 = vector.shape_cast %54 : vector<2x8xf32> to vector<2x8x1xf32>
    %56 = vector.broadcast %55 : vector<2x8x1xf32> to vector<2x8x8xf32>
    %57 = arith.subf %53, %56 : vector<2x8x8xf32>
    %58 = math.exp %57 : vector<2x8x8xf32>
    %cst_18 = arith.constant dense<0.000000e+00> : vector<2x8xf32>
    %59 = vector.multi_reduction <add>, %58, %cst_18 [2] : vector<2x8x8xf32> to vector<2x8xf32>
    %60 = vector.shape_cast %59 : vector<2x8xf32> to vector<2x8x1xf32>
    %61 = vector.broadcast %60 : vector<2x8x1xf32> to vector<2x8x8xf32>
    %62 = arith.divf %58, %61 : vector<2x8x8xf32>
    "tpu.trace_start"() <{level = 10 : i32, message = "bqn,bnv->bqv"}> : () -> ()
    %cst_19 = arith.constant dense<0.000000e+00> : vector<2x8x8xf32>
    %63 = tpu.matmul %62, %50, %cst_19 {dimension_numbers = #tpu.dot_dimension_numbers<[2], [1], [1], [2], [0, 0, 0, 1, 1, 2], [0], [0]>} : vector<2x8x8xf32>, vector<2x8x8xf32>, vector<2x8x8xf32> -> vector<2x8x8xf32>
    "tpu.trace_stop"() : () -> ()
    %64 = vector.shape_cast %63 : vector<2x8x8xf32> to vector<16x8xf32>
    %65 = vector.extract_strided_slice %4 {offsets = [0, 24], sizes = [16, 8], strides = [1, 1]} : vector<16x96xf32> to vector<16x8xf32>
    %66 = vector.shape_cast %65 : vector<16x8xf32> to vector<2x8x8xf32>
    %67 = vector.extract_strided_slice %4 {offsets = [0, 56], sizes = [16, 8], strides = [1, 1]} : vector<16x96xf32> to vector<16x8xf32>
    %68 = vector.shape_cast %67 : vector<16x8xf32> to vector<2x8x8xf32>
    %69 = vector.extract_strided_slice %4 {offsets = [0, 88], sizes = [16, 8], strides = [1, 1]} : vector<16x96xf32> to vector<16x8xf32>
    %70 = vector.shape_cast %69 : vector<16x8xf32> to vector<2x8x8xf32>
    "tpu.trace_start"() <{level = 10 : i32, message = "bqk,bnk->bqn"}> : () -> ()
    %cst_20 = arith.constant dense<0.000000e+00> : vector<2x8x8xf32>
    %71 = tpu.matmul %66, %68, %cst_20 {dimension_numbers = #tpu.dot_dimension_numbers<[2], [2], [1], [1], [0, 0, 0, 1, 1, 1], [0], [0]>} : vector<2x8x8xf32>, vector<2x8x8xf32>, vector<2x8x8xf32> -> vector<2x8x8xf32>
    "tpu.trace_stop"() : () -> ()
    %cst_21 = arith.constant 0.353553385 : f32
    %72 = vector.broadcast %cst_21 : f32 to vector<2x8x8xf32>
    %73 = arith.mulf %72, %71 : vector<2x8x8xf32>
    %cst_22 = arith.constant dense<0xFF800000> : vector<2x8xf32>
    %74 = vector.multi_reduction <maximumf>, %73, %cst_22 [2] : vector<2x8x8xf32> to vector<2x8xf32>
    %75 = vector.shape_cast %74 : vector<2x8xf32> to vector<2x8x1xf32>
    %76 = vector.broadcast %75 : vector<2x8x1xf32> to vector<2x8x8xf32>
    %77 = arith.subf %73, %76 : vector<2x8x8xf32>
    %78 = math.exp %77 : vector<2x8x8xf32>
    %cst_23 = arith.constant dense<0.000000e+00> : vector<2x8xf32>
    %79 = vector.multi_reduction <add>, %78, %cst_23 [2] : vector<2x8x8xf32> to vector<2x8xf32>
    %80 = vector.shape_cast %79 : vector<2x8xf32> to vector<2x8x1xf32>
    %81 = vector.broadcast %80 : vector<2x8x1xf32> to vector<2x8x8xf32>
    %82 = arith.divf %78, %81 : vector<2x8x8xf32>
    "tpu.trace_start"() <{level = 10 : i32, message = "bqn,bnv->bqv"}> : () -> ()
    %cst_24 = arith.constant dense<0.000000e+00> : vector<2x8x8xf32>
    %83 = tpu.matmul %82, %70, %cst_24 {dimension_numbers = #tpu.dot_dimension_numbers<[2], [1], [1], [2], [0, 0, 0, 1, 1, 2], [0], [0]>} : vector<2x8x8xf32>, vector<2x8x8xf32>, vector<2x8x8xf32> -> vector<2x8x8xf32>
    "tpu.trace_stop"() : () -> ()
    %84 = vector.shape_cast %83 : vector<2x8x8xf32> to vector<16x8xf32>
    %85 = tpu.concatenate %24, %44, %64, %84 in 1 : vector<16x8xf32>, vector<16x8xf32>, vector<16x8xf32>, vector<16x8xf32> -> vector<16x32xf32>
    %c0_25 = arith.constant 0 : index
    %c0_26 = arith.constant 0 : index
    %c0_27 = arith.constant 0 : index
    %86 = vector.load %arg2[%c0_25, %c0_26, %c0_27] : memref<3x32x32xf32, #tpu.memory_space<vmem>>, vector<1x32x32xf32>
    %87 = vector.shape_cast %86 : vector<1x32x32xf32> to vector<32x32xf32>
    %cst_28 = arith.constant dense<0.000000e+00> : vector<16x32xf32>
    %88 = tpu.matmul %85, %87, %cst_28 {dimension_numbers = #tpu.dot_dimension_numbers<[1], [0], [0], [1], [0, 0, 1, 1], [], []>} : vector<16x32xf32>, vector<32x32xf32>, vector<16x32xf32> -> vector<16x32xf32>
    %89 = arith.addf %88, %88 : vector<16x32xf32>
    %c0_29 = arith.constant 0 : index
    %c0_30 = arith.constant 0 : index
    %c0_31 = arith.constant 0 : index
    %90 = vector.load %arg3[%c0_29, %c0_30, %c0_31] : memref<3x1x32xf32, #tpu.memory_space<vmem>>, vector<1x1x32xf32>
    %91 = vector.shape_cast %90 : vector<1x1x32xf32> to vector<1x32xf32>
    %c0_32 = arith.constant 0 : index
    %c0_33 = arith.constant 0 : index
    %c0_34 = arith.constant 0 : index
    %92 = vector.load %arg4[%c0_32, %c0_33, %c0_34] : memref<3x1x32xf32, #tpu.memory_space<vmem>>, vector<1x1x32xf32>
    %93 = vector.shape_cast %92 : vector<1x1x32xf32> to vector<1x32xf32>
    %cst_35 = arith.constant dense<0.000000e+00> : vector<32xf32>
    %94 = vector.multi_reduction <add>, %89, %cst_35 [0] : vector<16x32xf32> to vector<32xf32>
    %95 = vector.shape_cast %94 : vector<32xf32> to vector<1x32xf32>
    %96 = arith.mulf %89, %89 : vector<16x32xf32>
    %cst_36 = arith.constant dense<0.000000e+00> : vector<32xf32>
    %97 = vector.multi_reduction <add>, %96, %cst_36 [0] : vector<16x32xf32> to vector<32xf32>
    %98 = vector.shape_cast %97 : vector<32xf32> to vector<1x32xf32>
    %cst_37 = arith.constant 6.250000e-02 : f32
    %99 = vector.broadcast %cst_37 : f32 to vector<1x32xf32>
    %100 = arith.mulf %95, %99 : vector<1x32xf32>
    %cst_38 = arith.constant 6.250000e-02 : f32
    %101 = vector.broadcast %cst_38 : f32 to vector<1x32xf32>
    %102 = arith.mulf %98, %101 : vector<1x32xf32>
    %103 = arith.mulf %100, %100 : vector<1x32xf32>
    %104 = arith.subf %102, %103 : vector<1x32xf32>
    %105 = vector.broadcast %100 : vector<1x32xf32> to vector<16x32xf32>
    %106 = arith.subf %89, %105 : vector<16x32xf32>
    %cst_39 = arith.constant 9.99999974E-6 : f32
    %107 = vector.broadcast %cst_39 : f32 to vector<1x32xf32>
    %108 = arith.addf %104, %107 : vector<1x32xf32>
    %109 = math.rsqrt %108 : vector<1x32xf32>
    %110 = vector.broadcast %109 : vector<1x32xf32> to vector<16x32xf32>
    %111 = arith.mulf %106, %110 : vector<16x32xf32>
    %112 = vector.broadcast %91 : vector<1x32xf32> to vector<16x32xf32>
    %113 = arith.mulf %111, %112 : vector<16x32xf32>
    %114 = vector.broadcast %93 : vector<1x32xf32> to vector<16x32xf32>
    %115 = arith.addf %113, %114 : vector<16x32xf32>
    %c0_40 = arith.constant 0 : index
    %c0_41 = arith.constant 0 : index
    %c0_42 = arith.constant 0 : index
    %116 = vector.load %arg5[%c0_40, %c0_41, %c0_42] : memref<3x32x64xf32, #tpu.memory_space<vmem>>, vector<1x32x64xf32>
    %117 = vector.shape_cast %116 : vector<1x32x64xf32> to vector<32x64xf32>
    %cst_43 = arith.constant dense<0.000000e+00> : vector<16x64xf32>
    %118 = tpu.matmul %115, %117, %cst_43 {dimension_numbers = #tpu.dot_dimension_numbers<[1], [0], [0], [1], [0, 0, 1, 1], [], []>} : vector<16x32xf32>, vector<32x64xf32>, vector<16x64xf32> -> vector<16x64xf32>
    %c0_44 = arith.constant 0 : index
    %c0_45 = arith.constant 0 : index
    %c0_46 = arith.constant 0 : index
    %119 = vector.load %arg6[%c0_44, %c0_45, %c0_46] : memref<3x1x64xf32, #tpu.memory_space<vmem>>, vector<1x1x64xf32>
    %120 = vector.shape_cast %119 : vector<1x1x64xf32> to vector<1x64xf32>
    %121 = vector.broadcast %120 : vector<1x64xf32> to vector<16x64xf32>
    %122 = arith.addf %118, %121 : vector<16x64xf32>
    %cst_47 = arith.constant 0.000000e+00 : f32
    %123 = vector.broadcast %cst_47 : f32 to vector<16x64xf32>
    %124 = arith.maximumf %122, %123 : vector<16x64xf32>
    %c0_48 = arith.constant 0 : index
    %c0_49 = arith.constant 0 : index
    %c0_50 = arith.constant 0 : index
    %125 = vector.load %arg7[%c0_48, %c0_49, %c0_50] : memref<3x64x32xf32, #tpu.memory_space<vmem>>, vector<1x64x32xf32>
    %126 = vector.shape_cast %125 : vector<1x64x32xf32> to vector<64x32xf32>
    %cst_51 = arith.constant dense<0.000000e+00> : vector<16x32xf32>
    %127 = tpu.matmul %124, %126, %cst_51 {dimension_numbers = #tpu.dot_dimension_numbers<[1], [0], [0], [1], [0, 0, 1, 1], [], []>} : vector<16x64xf32>, vector<64x32xf32>, vector<16x32xf32> -> vector<16x32xf32>
    %c0_52 = arith.constant 0 : index
    %c0_53 = arith.constant 0 : index
    %c0_54 = arith.constant 0 : index
    %128 = vector.load %arg8[%c0_52, %c0_53, %c0_54] : memref<3x1x32xf32, #tpu.memory_space<vmem>>, vector<1x1x32xf32>
    %129 = vector.shape_cast %128 : vector<1x1x32xf32> to vector<1x32xf32>
    %130 = vector.broadcast %129 : vector<1x32xf32> to vector<16x32xf32>
    %131 = arith.addf %127, %130 : vector<16x32xf32>
    %132 = arith.addf %115, %131 : vector<16x32xf32>
    %133 = arith.addf %132, %132 : vector<16x32xf32>
    %c0_55 = arith.constant 0 : index
    %c0_56 = arith.constant 0 : index
    %c0_57 = arith.constant 0 : index
    %134 = vector.load %arg9[%c0_55, %c0_56, %c0_57] : memref<3x1x32xf32, #tpu.memory_space<vmem>>, vector<1x1x32xf32>
    %135 = vector.shape_cast %134 : vector<1x1x32xf32> to vector<1x32xf32>
    %c0_58 = arith.constant 0 : index
    %c0_59 = arith.constant 0 : index
    %c0_60 = arith.constant 0 : index
    %136 = vector.load %arg10[%c0_58, %c0_59, %c0_60] : memref<3x1x32xf32, #tpu.memory_space<vmem>>, vector<1x1x32xf32>
    %137 = vector.shape_cast %136 : vector<1x1x32xf32> to vector<1x32xf32>
    %cst_61 = arith.constant dense<0.000000e+00> : vector<32xf32>
    %138 = vector.multi_reduction <add>, %133, %cst_61 [0] : vector<16x32xf32> to vector<32xf32>
    %139 = vector.shape_cast %138 : vector<32xf32> to vector<1x32xf32>
    %140 = arith.mulf %133, %133 : vector<16x32xf32>
    %cst_62 = arith.constant dense<0.000000e+00> : vector<32xf32>
    %141 = vector.multi_reduction <add>, %140, %cst_62 [0] : vector<16x32xf32> to vector<32xf32>
    %142 = vector.shape_cast %141 : vector<32xf32> to vector<1x32xf32>
    %cst_63 = arith.constant 6.250000e-02 : f32
    %143 = vector.broadcast %cst_63 : f32 to vector<1x32xf32>
    %144 = arith.mulf %139, %143 : vector<1x32xf32>
    %cst_64 = arith.constant 6.250000e-02 : f32
    %145 = vector.broadcast %cst_64 : f32 to vector<1x32xf32>
    %146 = arith.mulf %142, %145 : vector<1x32xf32>
    %147 = arith.mulf %144, %144 : vector<1x32xf32>
    %148 = arith.subf %146, %147 : vector<1x32xf32>
    %149 = vector.broadcast %144 : vector<1x32xf32> to vector<16x32xf32>
    %150 = arith.subf %133, %149 : vector<16x32xf32>
    %cst_65 = arith.constant 9.99999974E-6 : f32
    %151 = vector.broadcast %cst_65 : f32 to vector<1x32xf32>
    %152 = arith.addf %148, %151 : vector<1x32xf32>
    %153 = math.rsqrt %152 : vector<1x32xf32>
    %154 = vector.broadcast %153 : vector<1x32xf32> to vector<16x32xf32>
    %155 = arith.mulf %150, %154 : vector<16x32xf32>
    %156 = vector.broadcast %135 : vector<1x32xf32> to vector<16x32xf32>
    %157 = arith.mulf %155, %156 : vector<16x32xf32>
    %158 = vector.broadcast %137 : vector<1x32xf32> to vector<16x32xf32>
    %159 = arith.addf %157, %158 : vector<16x32xf32>
    %c1 = arith.constant 1 : index
    %c0_66 = arith.constant 0 : index
    %c0_67 = arith.constant 0 : index
    %160 = vector.load %arg1[%c1, %c0_66, %c0_67] : memref<3x32x96xf32, #tpu.memory_space<vmem>>, vector<1x32x96xf32>
    %161 = vector.shape_cast %160 : vector<1x32x96xf32> to vector<32x96xf32>
    %cst_68 = arith.constant dense<0.000000e+00> : vector<16x96xf32>
    %162 = tpu.matmul %159, %161, %cst_68 {dimension_numbers = #tpu.dot_dimension_numbers<[1], [0], [0], [1], [0, 0, 1, 1], [], []>} : vector<16x32xf32>, vector<32x96xf32>, vector<16x96xf32> -> vector<16x96xf32>
    %163 = vector.extract_strided_slice %162 {offsets = [0, 0], sizes = [16, 8], strides = [1, 1]} : vector<16x96xf32> to vector<16x8xf32>
    %164 = vector.shape_cast %163 : vector<16x8xf32> to vector<2x8x8xf32>
    %165 = vector.extract_strided_slice %162 {offsets = [0, 32], sizes = [16, 8], strides = [1, 1]} : vector<16x96xf32> to vector<16x8xf32>
    %166 = vector.shape_cast %165 : vector<16x8xf32> to vector<2x8x8xf32>
    %167 = vector.extract_strided_slice %162 {offsets = [0, 64], sizes = [16, 8], strides = [1, 1]} : vector<16x96xf32> to vector<16x8xf32>
    %168 = vector.shape_cast %167 : vector<16x8xf32> to vector<2x8x8xf32>
    "tpu.trace_start"() <{level = 10 : i32, message = "bqk,bnk->bqn"}> : () -> ()
    %cst_69 = arith.constant dense<0.000000e+00> : vector<2x8x8xf32>
    %169 = tpu.matmul %164, %166, %cst_69 {dimension_numbers = #tpu.dot_dimension_numbers<[2], [2], [1], [1], [0, 0, 0, 1, 1, 1], [0], [0]>} : vector<2x8x8xf32>, vector<2x8x8xf32>, vector<2x8x8xf32> -> vector<2x8x8xf32>
    "tpu.trace_stop"() : () -> ()
    %cst_70 = arith.constant 0.353553385 : f32
    %170 = vector.broadcast %cst_70 : f32 to vector<2x8x8xf32>
    %171 = arith.mulf %170, %169 : vector<2x8x8xf32>
    %cst_71 = arith.constant dense<0xFF800000> : vector<2x8xf32>
    %172 = vector.multi_reduction <maximumf>, %171, %cst_71 [2] : vector<2x8x8xf32> to vector<2x8xf32>
    %173 = vector.shape_cast %172 : vector<2x8xf32> to vector<2x8x1xf32>
    %174 = vector.broadcast %173 : vector<2x8x1xf32> to vector<2x8x8xf32>
    %175 = arith.subf %171, %174 : vector<2x8x8xf32>
    %176 = math.exp %175 : vector<2x8x8xf32>
    %cst_72 = arith.constant dense<0.000000e+00> : vector<2x8xf32>
    %177 = vector.multi_reduction <add>, %176, %cst_72 [2] : vector<2x8x8xf32> to vector<2x8xf32>
    %178 = vector.shape_cast %177 : vector<2x8xf32> to vector<2x8x1xf32>
    %179 = vector.broadcast %178 : vector<2x8x1xf32> to vector<2x8x8xf32>
    %180 = arith.divf %176, %179 : vector<2x8x8xf32>
    "tpu.trace_start"() <{level = 10 : i32, message = "bqn,bnv->bqv"}> : () -> ()
    %cst_73 = arith.constant dense<0.000000e+00> : vector<2x8x8xf32>
    %181 = tpu.matmul %180, %168, %cst_73 {dimension_numbers = #tpu.dot_dimension_numbers<[2], [1], [1], [2], [0, 0, 0, 1, 1, 2], [0], [0]>} : vector<2x8x8xf32>, vector<2x8x8xf32>, vector<2x8x8xf32> -> vector<2x8x8xf32>
    "tpu.trace_stop"() : () -> ()
    %182 = vector.shape_cast %181 : vector<2x8x8xf32> to vector<16x8xf32>
    %183 = vector.extract_strided_slice %162 {offsets = [0, 8], sizes = [16, 8], strides = [1, 1]} : vector<16x96xf32> to vector<16x8xf32>
    %184 = vector.shape_cast %183 : vector<16x8xf32> to vector<2x8x8xf32>
    %185 = vector.extract_strided_slice %162 {offsets = [0, 40], sizes = [16, 8], strides = [1, 1]} : vector<16x96xf32> to vector<16x8xf32>
    %186 = vector.shape_cast %185 : vector<16x8xf32> to vector<2x8x8xf32>
    %187 = vector.extract_strided_slice %162 {offsets = [0, 72], sizes = [16, 8], strides = [1, 1]} : vector<16x96xf32> to vector<16x8xf32>
    %188 = vector.shape_cast %187 : vector<16x8xf32> to vector<2x8x8xf32>
    "tpu.trace_start"() <{level = 10 : i32, message = "bqk,bnk->bqn"}> : () -> ()
    %cst_74 = arith.constant dense<0.000000e+00> : vector<2x8x8xf32>
    %189 = tpu.matmul %184, %186, %cst_74 {dimension_numbers = #tpu.dot_dimension_numbers<[2], [2], [1], [1], [0, 0, 0, 1, 1, 1], [0], [0]>} : vector<2x8x8xf32>, vector<2x8x8xf32>, vector<2x8x8xf32> -> vector<2x8x8xf32>
    "tpu.trace_stop"() : () -> ()
    %cst_75 = arith.constant 0.353553385 : f32
    %190 = vector.broadcast %cst_75 : f32 to vector<2x8x8xf32>
    %191 = arith.mulf %190, %189 : vector<2x8x8xf32>
    %cst_76 = arith.constant dense<0xFF800000> : vector<2x8xf32>
    %192 = vector.multi_reduction <maximumf>, %191, %cst_76 [2] : vector<2x8x8xf32> to vector<2x8xf32>
    %193 = vector.shape_cast %192 : vector<2x8xf32> to vector<2x8x1xf32>
    %194 = vector.broadcast %193 : vector<2x8x1xf32> to vector<2x8x8xf32>
    %195 = arith.subf %191, %194 : vector<2x8x8xf32>
    %196 = math.exp %195 : vector<2x8x8xf32>
    %cst_77 = arith.constant dense<0.000000e+00> : vector<2x8xf32>
    %197 = vector.multi_reduction <add>, %196, %cst_77 [2] : vector<2x8x8xf32> to vector<2x8xf32>
    %198 = vector.shape_cast %197 : vector<2x8xf32> to vector<2x8x1xf32>
    %199 = vector.broadcast %198 : vector<2x8x1xf32> to vector<2x8x8xf32>
    %200 = arith.divf %196, %199 : vector<2x8x8xf32>
    "tpu.trace_start"() <{level = 10 : i32, message = "bqn,bnv->bqv"}> : () -> ()
    %cst_78 = arith.constant dense<0.000000e+00> : vector<2x8x8xf32>
    %201 = tpu.matmul %200, %188, %cst_78 {dimension_numbers = #tpu.dot_dimension_numbers<[2], [1], [1], [2], [0, 0, 0, 1, 1, 2], [0], [0]>} : vector<2x8x8xf32>, vector<2x8x8xf32>, vector<2x8x8xf32> -> vector<2x8x8xf32>
    "tpu.trace_stop"() : () -> ()
    %202 = vector.shape_cast %201 : vector<2x8x8xf32> to vector<16x8xf32>
    %203 = vector.extract_strided_slice %162 {offsets = [0, 16], sizes = [16, 8], strides = [1, 1]} : vector<16x96xf32> to vector<16x8xf32>
    %204 = vector.shape_cast %203 : vector<16x8xf32> to vector<2x8x8xf32>
    %205 = vector.extract_strided_slice %162 {offsets = [0, 48], sizes = [16, 8], strides = [1, 1]} : vector<16x96xf32> to vector<16x8xf32>
    %206 = vector.shape_cast %205 : vector<16x8xf32> to vector<2x8x8xf32>
    %207 = vector.extract_strided_slice %162 {offsets = [0, 80], sizes = [16, 8], strides = [1, 1]} : vector<16x96xf32> to vector<16x8xf32>
    %208 = vector.shape_cast %207 : vector<16x8xf32> to vector<2x8x8xf32>
    "tpu.trace_start"() <{level = 10 : i32, message = "bqk,bnk->bqn"}> : () -> ()
    %cst_79 = arith.constant dense<0.000000e+00> : vector<2x8x8xf32>
    %209 = tpu.matmul %204, %206, %cst_79 {dimension_numbers = #tpu.dot_dimension_numbers<[2], [2], [1], [1], [0, 0, 0, 1, 1, 1], [0], [0]>} : vector<2x8x8xf32>, vector<2x8x8xf32>, vector<2x8x8xf32> -> vector<2x8x8xf32>
    "tpu.trace_stop"() : () -> ()
    %cst_80 = arith.constant 0.353553385 : f32
    %210 = vector.broadcast %cst_80 : f32 to vector<2x8x8xf32>
    %211 = arith.mulf %210, %209 : vector<2x8x8xf32>
    %cst_81 = arith.constant dense<0xFF800000> : vector<2x8xf32>
    %212 = vector.multi_reduction <maximumf>, %211, %cst_81 [2] : vector<2x8x8xf32> to vector<2x8xf32>
    %213 = vector.shape_cast %212 : vector<2x8xf32> to vector<2x8x1xf32>
    %214 = vector.broadcast %213 : vector<2x8x1xf32> to vector<2x8x8xf32>
    %215 = arith.subf %211, %214 : vector<2x8x8xf32>
    %216 = math.exp %215 : vector<2x8x8xf32>
    %cst_82 = arith.constant dense<0.000000e+00> : vector<2x8xf32>
    %217 = vector.multi_reduction <add>, %216, %cst_82 [2] : vector<2x8x8xf32> to vector<2x8xf32>
    %218 = vector.shape_cast %217 : vector<2x8xf32> to vector<2x8x1xf32>
    %219 = vector.broadcast %218 : vector<2x8x1xf32> to vector<2x8x8xf32>
    %220 = arith.divf %216, %219 : vector<2x8x8xf32>
    "tpu.trace_start"() <{level = 10 : i32, message = "bqn,bnv->bqv"}> : () -> ()
    %cst_83 = arith.constant dense<0.000000e+00> : vector<2x8x8xf32>
    %221 = tpu.matmul %220, %208, %cst_83 {dimension_numbers = #tpu.dot_dimension_numbers<[2], [1], [1], [2], [0, 0, 0, 1, 1, 2], [0], [0]>} : vector<2x8x8xf32>, vector<2x8x8xf32>, vector<2x8x8xf32> -> vector<2x8x8xf32>
    "tpu.trace_stop"() : () -> ()
    %222 = vector.shape_cast %221 : vector<2x8x8xf32> to vector<16x8xf32>
    %223 = vector.extract_strided_slice %162 {offsets = [0, 24], sizes = [16, 8], strides = [1, 1]} : vector<16x96xf32> to vector<16x8xf32>
    %224 = vector.shape_cast %223 : vector<16x8xf32> to vector<2x8x8xf32>
    %225 = vector.extract_strided_slice %162 {offsets = [0, 56], sizes = [16, 8], strides = [1, 1]} : vector<16x96xf32> to vector<16x8xf32>
    %226 = vector.shape_cast %225 : vector<16x8xf32> to vector<2x8x8xf32>
    %227 = vector.extract_strided_slice %162 {offsets = [0, 88], sizes = [16, 8], strides = [1, 1]} : vector<16x96xf32> to vector<16x8xf32>
    %228 = vector.shape_cast %227 : vector<16x8xf32> to vector<2x8x8xf32>
    "tpu.trace_start"() <{level = 10 : i32, message = "bqk,bnk->bqn"}> : () -> ()
    %cst_84 = arith.constant dense<0.000000e+00> : vector<2x8x8xf32>
    %229 = tpu.matmul %224, %226, %cst_84 {dimension_numbers = #tpu.dot_dimension_numbers<[2], [2], [1], [1], [0, 0, 0, 1, 1, 1], [0], [0]>} : vector<2x8x8xf32>, vector<2x8x8xf32>, vector<2x8x8xf32> -> vector<2x8x8xf32>
    "tpu.trace_stop"() : () -> ()
    %cst_85 = arith.constant 0.353553385 : f32
    %230 = vector.broadcast %cst_85 : f32 to vector<2x8x8xf32>
    %231 = arith.mulf %230, %229 : vector<2x8x8xf32>
    %cst_86 = arith.constant dense<0xFF800000> : vector<2x8xf32>
    %232 = vector.multi_reduction <maximumf>, %231, %cst_86 [2] : vector<2x8x8xf32> to vector<2x8xf32>
    %233 = vector.shape_cast %232 : vector<2x8xf32> to vector<2x8x1xf32>
    %234 = vector.broadcast %233 : vector<2x8x1xf32> to vector<2x8x8xf32>
    %235 = arith.subf %231, %234 : vector<2x8x8xf32>
    %236 = math.exp %235 : vector<2x8x8xf32>
    %cst_87 = arith.constant dense<0.000000e+00> : vector<2x8xf32>
    %237 = vector.multi_reduction <add>, %236, %cst_87 [2] : vector<2x8x8xf32> to vector<2x8xf32>
    %238 = vector.shape_cast %237 : vector<2x8xf32> to vector<2x8x1xf32>
    %239 = vector.broadcast %238 : vector<2x8x1xf32> to vector<2x8x8xf32>
    %240 = arith.divf %236, %239 : vector<2x8x8xf32>
    "tpu.trace_start"() <{level = 10 : i32, message = "bqn,bnv->bqv"}> : () -> ()
    %cst_88 = arith.constant dense<0.000000e+00> : vector<2x8x8xf32>
    %241 = tpu.matmul %240, %228, %cst_88 {dimension_numbers = #tpu.dot_dimension_numbers<[2], [1], [1], [2], [0, 0, 0, 1, 1, 2], [0], [0]>} : vector<2x8x8xf32>, vector<2x8x8xf32>, vector<2x8x8xf32> -> vector<2x8x8xf32>
    "tpu.trace_stop"() : () -> ()
    %242 = vector.shape_cast %241 : vector<2x8x8xf32> to vector<16x8xf32>
    %243 = tpu.concatenate %182, %202, %222, %242 in 1 : vector<16x8xf32>, vector<16x8xf32>, vector<16x8xf32>, vector<16x8xf32> -> vector<16x32xf32>
    %c1_89 = arith.constant 1 : index
    %c0_90 = arith.constant 0 : index
    %c0_91 = arith.constant 0 : index
    %244 = vector.load %arg2[%c1_89, %c0_90, %c0_91] : memref<3x32x32xf32, #tpu.memory_space<vmem>>, vector<1x32x32xf32>
    %245 = vector.shape_cast %244 : vector<1x32x32xf32> to vector<32x32xf32>
    %cst_92 = arith.constant dense<0.000000e+00> : vector<16x32xf32>
    %246 = tpu.matmul %243, %245, %cst_92 {dimension_numbers = #tpu.dot_dimension_numbers<[1], [0], [0], [1], [0, 0, 1, 1], [], []>} : vector<16x32xf32>, vector<32x32xf32>, vector<16x32xf32> -> vector<16x32xf32>
    %247 = arith.addf %246, %246 : vector<16x32xf32>
    %c1_93 = arith.constant 1 : index
    %c0_94 = arith.constant 0 : index
    %c0_95 = arith.constant 0 : index
    %248 = vector.load %arg3[%c1_93, %c0_94, %c0_95] : memref<3x1x32xf32, #tpu.memory_space<vmem>>, vector<1x1x32xf32>
    %249 = vector.shape_cast %248 : vector<1x1x32xf32> to vector<1x32xf32>
    %c1_96 = arith.constant 1 : index
    %c0_97 = arith.constant 0 : index
    %c0_98 = arith.constant 0 : index
    %250 = vector.load %arg4[%c1_96, %c0_97, %c0_98] : memref<3x1x32xf32, #tpu.memory_space<vmem>>, vector<1x1x32xf32>
    %251 = vector.shape_cast %250 : vector<1x1x32xf32> to vector<1x32xf32>
    %cst_99 = arith.constant dense<0.000000e+00> : vector<32xf32>
    %252 = vector.multi_reduction <add>, %247, %cst_99 [0] : vector<16x32xf32> to vector<32xf32>
    %253 = vector.shape_cast %252 : vector<32xf32> to vector<1x32xf32>
    %254 = arith.mulf %247, %247 : vector<16x32xf32>
    %cst_100 = arith.constant dense<0.000000e+00> : vector<32xf32>
    %255 = vector.multi_reduction <add>, %254, %cst_100 [0] : vector<16x32xf32> to vector<32xf32>
    %256 = vector.shape_cast %255 : vector<32xf32> to vector<1x32xf32>
    %cst_101 = arith.constant 6.250000e-02 : f32
    %257 = vector.broadcast %cst_101 : f32 to vector<1x32xf32>
    %258 = arith.mulf %253, %257 : vector<1x32xf32>
    %cst_102 = arith.constant 6.250000e-02 : f32
    %259 = vector.broadcast %cst_102 : f32 to vector<1x32xf32>
    %260 = arith.mulf %256, %259 : vector<1x32xf32>
    %261 = arith.mulf %258, %258 : vector<1x32xf32>
    %262 = arith.subf %260, %261 : vector<1x32xf32>
    %263 = vector.broadcast %258 : vector<1x32xf32> to vector<16x32xf32>
    %264 = arith.subf %247, %263 : vector<16x32xf32>
    %cst_103 = arith.constant 9.99999974E-6 : f32
    %265 = vector.broadcast %cst_103 : f32 to vector<1x32xf32>
    %266 = arith.addf %262, %265 : vector<1x32xf32>
    %267 = math.rsqrt %266 : vector<1x32xf32>
    %268 = vector.broadcast %267 : vector<1x32xf32> to vector<16x32xf32>
    %269 = arith.mulf %264, %268 : vector<16x32xf32>
    %270 = vector.broadcast %249 : vector<1x32xf32> to vector<16x32xf32>
    %271 = arith.mulf %269, %270 : vector<16x32xf32>
    %272 = vector.broadcast %251 : vector<1x32xf32> to vector<16x32xf32>
    %273 = arith.addf %271, %272 : vector<16x32xf32>
    %c1_104 = arith.constant 1 : index
    %c0_105 = arith.constant 0 : index
    %c0_106 = arith.constant 0 : index
    %274 = vector.load %arg5[%c1_104, %c0_105, %c0_106] : memref<3x32x64xf32, #tpu.memory_space<vmem>>, vector<1x32x64xf32>
    %275 = vector.shape_cast %274 : vector<1x32x64xf32> to vector<32x64xf32>
    %cst_107 = arith.constant dense<0.000000e+00> : vector<16x64xf32>
    %276 = tpu.matmul %273, %275, %cst_107 {dimension_numbers = #tpu.dot_dimension_numbers<[1], [0], [0], [1], [0, 0, 1, 1], [], []>} : vector<16x32xf32>, vector<32x64xf32>, vector<16x64xf32> -> vector<16x64xf32>
    %c1_108 = arith.constant 1 : index
    %c0_109 = arith.constant 0 : index
    %c0_110 = arith.constant 0 : index
    %277 = vector.load %arg6[%c1_108, %c0_109, %c0_110] : memref<3x1x64xf32, #tpu.memory_space<vmem>>, vector<1x1x64xf32>
    %278 = vector.shape_cast %277 : vector<1x1x64xf32> to vector<1x64xf32>
    %279 = vector.broadcast %278 : vector<1x64xf32> to vector<16x64xf32>
    %280 = arith.addf %276, %279 : vector<16x64xf32>
    %cst_111 = arith.constant 0.000000e+00 : f32
    %281 = vector.broadcast %cst_111 : f32 to vector<16x64xf32>
    %282 = arith.maximumf %280, %281 : vector<16x64xf32>
    %c1_112 = arith.constant 1 : index
    %c0_113 = arith.constant 0 : index
    %c0_114 = arith.constant 0 : index
    %283 = vector.load %arg7[%c1_112, %c0_113, %c0_114] : memref<3x64x32xf32, #tpu.memory_space<vmem>>, vector<1x64x32xf32>
    %284 = vector.shape_cast %283 : vector<1x64x32xf32> to vector<64x32xf32>
    %cst_115 = arith.constant dense<0.000000e+00> : vector<16x32xf32>
    %285 = tpu.matmul %282, %284, %cst_115 {dimension_numbers = #tpu.dot_dimension_numbers<[1], [0], [0], [1], [0, 0, 1, 1], [], []>} : vector<16x64xf32>, vector<64x32xf32>, vector<16x32xf32> -> vector<16x32xf32>
    %c1_116 = arith.constant 1 : index
    %c0_117 = arith.constant 0 : index
    %c0_118 = arith.constant 0 : index
    %286 = vector.load %arg8[%c1_116, %c0_117, %c0_118] : memref<3x1x32xf32, #tpu.memory_space<vmem>>, vector<1x1x32xf32>
    %287 = vector.shape_cast %286 : vector<1x1x32xf32> to vector<1x32xf32>
    %288 = vector.broadcast %287 : vector<1x32xf32> to vector<16x32xf32>
    %289 = arith.addf %285, %288 : vector<16x32xf32>
    %290 = arith.addf %273, %289 : vector<16x32xf32>
    %291 = arith.addf %290, %290 : vector<16x32xf32>
    %c1_119 = arith.constant 1 : index
    %c0_120 = arith.constant 0 : index
    %c0_121 = arith.constant 0 : index
    %292 = vector.load %arg9[%c1_119, %c0_120, %c0_121] : memref<3x1x32xf32, #tpu.memory_space<vmem>>, vector<1x1x32xf32>
    %293 = vector.shape_cast %292 : vector<1x1x32xf32> to vector<1x32xf32>
    %c1_122 = arith.constant 1 : index
    %c0_123 = arith.constant 0 : index
    %c0_124 = arith.constant 0 : index
    %294 = vector.load %arg10[%c1_122, %c0_123, %c0_124] : memref<3x1x32xf32, #tpu.memory_space<vmem>>, vector<1x1x32xf32>
    %295 = vector.shape_cast %294 : vector<1x1x32xf32> to vector<1x32xf32>
    %cst_125 = arith.constant dense<0.000000e+00> : vector<32xf32>
    %296 = vector.multi_reduction <add>, %291, %cst_125 [0] : vector<16x32xf32> to vector<32xf32>
    %297 = vector.shape_cast %296 : vector<32xf32> to vector<1x32xf32>
    %298 = arith.mulf %291, %291 : vector<16x32xf32>
    %cst_126 = arith.constant dense<0.000000e+00> : vector<32xf32>
    %299 = vector.multi_reduction <add>, %298, %cst_126 [0] : vector<16x32xf32> to vector<32xf32>
    %300 = vector.shape_cast %299 : vector<32xf32> to vector<1x32xf32>
    %cst_127 = arith.constant 6.250000e-02 : f32
    %301 = vector.broadcast %cst_127 : f32 to vector<1x32xf32>
    %302 = arith.mulf %297, %301 : vector<1x32xf32>
    %cst_128 = arith.constant 6.250000e-02 : f32
    %303 = vector.broadcast %cst_128 : f32 to vector<1x32xf32>
    %304 = arith.mulf %300, %303 : vector<1x32xf32>
    %305 = arith.mulf %302, %302 : vector<1x32xf32>
    %306 = arith.subf %304, %305 : vector<1x32xf32>
    %307 = vector.broadcast %302 : vector<1x32xf32> to vector<16x32xf32>
    %308 = arith.subf %291, %307 : vector<16x32xf32>
    %cst_129 = arith.constant 9.99999974E-6 : f32
    %309 = vector.broadcast %cst_129 : f32 to vector<1x32xf32>
    %310 = arith.addf %306, %309 : vector<1x32xf32>
    %311 = math.rsqrt %310 : vector<1x32xf32>
    %312 = vector.broadcast %311 : vector<1x32xf32> to vector<16x32xf32>
    %313 = arith.mulf %308, %312 : vector<16x32xf32>
    %314 = vector.broadcast %293 : vector<1x32xf32> to vector<16x32xf32>
    %315 = arith.mulf %313, %314 : vector<16x32xf32>
    %316 = vector.broadcast %295 : vector<1x32xf32> to vector<16x32xf32>
    %317 = arith.addf %315, %316 : vector<16x32xf32>
    %c2 = arith.constant 2 : index
    %c0_130 = arith.constant 0 : index
    %c0_131 = arith.constant 0 : index
    %318 = vector.load %arg1[%c2, %c0_130, %c0_131] : memref<3x32x96xf32, #tpu.memory_space<vmem>>, vector<1x32x96xf32>
    %319 = vector.shape_cast %318 : vector<1x32x96xf32> to vector<32x96xf32>
    %cst_132 = arith.constant dense<0.000000e+00> : vector<16x96xf32>
    %320 = tpu.matmul %317, %319, %cst_132 {dimension_numbers = #tpu.dot_dimension_numbers<[1], [0], [0], [1], [0, 0, 1, 1], [], []>} : vector<16x32xf32>, vector<32x96xf32>, vector<16x96xf32> -> vector<16x96xf32>
    %321 = vector.extract_strided_slice %320 {offsets = [0, 0], sizes = [16, 8], strides = [1, 1]} : vector<16x96xf32> to vector<16x8xf32>
    %322 = vector.shape_cast %321 : vector<16x8xf32> to vector<2x8x8xf32>
    %323 = vector.extract_strided_slice %320 {offsets = [0, 32], sizes = [16, 8], strides = [1, 1]} : vector<16x96xf32> to vector<16x8xf32>
    %324 = vector.shape_cast %323 : vector<16x8xf32> to vector<2x8x8xf32>
    %325 = vector.extract_strided_slice %320 {offsets = [0, 64], sizes = [16, 8], strides = [1, 1]} : vector<16x96xf32> to vector<16x8xf32>
    %326 = vector.shape_cast %325 : vector<16x8xf32> to vector<2x8x8xf32>
    "tpu.trace_start"() <{level = 10 : i32, message = "bqk,bnk->bqn"}> : () -> ()
    %cst_133 = arith.constant dense<0.000000e+00> : vector<2x8x8xf32>
    %327 = tpu.matmul %322, %324, %cst_133 {dimension_numbers = #tpu.dot_dimension_numbers<[2], [2], [1], [1], [0, 0, 0, 1, 1, 1], [0], [0]>} : vector<2x8x8xf32>, vector<2x8x8xf32>, vector<2x8x8xf32> -> vector<2x8x8xf32>
    "tpu.trace_stop"() : () -> ()
    %cst_134 = arith.constant 0.353553385 : f32
    %328 = vector.broadcast %cst_134 : f32 to vector<2x8x8xf32>
    %329 = arith.mulf %328, %327 : vector<2x8x8xf32>
    %cst_135 = arith.constant dense<0xFF800000> : vector<2x8xf32>
    %330 = vector.multi_reduction <maximumf>, %329, %cst_135 [2] : vector<2x8x8xf32> to vector<2x8xf32>
    %331 = vector.shape_cast %330 : vector<2x8xf32> to vector<2x8x1xf32>
    %332 = vector.broadcast %331 : vector<2x8x1xf32> to vector<2x8x8xf32>
    %333 = arith.subf %329, %332 : vector<2x8x8xf32>
    %334 = math.exp %333 : vector<2x8x8xf32>
    %cst_136 = arith.constant dense<0.000000e+00> : vector<2x8xf32>
    %335 = vector.multi_reduction <add>, %334, %cst_136 [2] : vector<2x8x8xf32> to vector<2x8xf32>
    %336 = vector.shape_cast %335 : vector<2x8xf32> to vector<2x8x1xf32>
    %337 = vector.broadcast %336 : vector<2x8x1xf32> to vector<2x8x8xf32>
    %338 = arith.divf %334, %337 : vector<2x8x8xf32>
    %c0_137 = arith.constant 0 : index
    %c0_138 = arith.constant 0 : index
    %c0_139 = arith.constant 0 : index
    %c0_140 = arith.constant 0 : index
    %339 = vector.load %arg12[%c0_137, %c0_138, %c0_139, %c0_140] : memref<4x2x8x8xf32, #tpu.memory_space<vmem>>, vector<1x2x8x8xf32>
    %340 = vector.shape_cast %339 : vector<1x2x8x8xf32> to vector<2x8x8xf32>
    %341 = vector.shape_cast %338 : vector<2x8x8xf32> to vector<1x2x8x8xf32>
    tpu.vector_store %arg12[%c0_137, %c0_138, %c0_139, %c0_140], %341 {strides = array<i32>} : memref<4x2x8x8xf32, #tpu.memory_space<vmem>>, vector<1x2x8x8xf32>,
    "tpu.trace_start"() <{level = 10 : i32, message = "bqn,bnv->bqv"}> : () -> ()
    %cst_141 = arith.constant dense<0.000000e+00> : vector<2x8x8xf32>
    %342 = tpu.matmul %338, %326, %cst_141 {dimension_numbers = #tpu.dot_dimension_numbers<[2], [1], [1], [2], [0, 0, 0, 1, 1, 2], [0], [0]>} : vector<2x8x8xf32>, vector<2x8x8xf32>, vector<2x8x8xf32> -> vector<2x8x8xf32>
    "tpu.trace_stop"() : () -> ()
    %343 = vector.shape_cast %342 : vector<2x8x8xf32> to vector<16x8xf32>
    %344 = vector.extract_strided_slice %320 {offsets = [0, 8], sizes = [16, 8], strides = [1, 1]} : vector<16x96xf32> to vector<16x8xf32>
    %345 = vector.shape_cast %344 : vector<16x8xf32> to vector<2x8x8xf32>
    %346 = vector.extract_strided_slice %320 {offsets = [0, 40], sizes = [16, 8], strides = [1, 1]} : vector<16x96xf32> to vector<16x8xf32>
    %347 = vector.shape_cast %346 : vector<16x8xf32> to vector<2x8x8xf32>
    %348 = vector.extract_strided_slice %320 {offsets = [0, 72], sizes = [16, 8], strides = [1, 1]} : vector<16x96xf32> to vector<16x8xf32>
    %349 = vector.shape_cast %348 : vector<16x8xf32> to vector<2x8x8xf32>
    "tpu.trace_start"() <{level = 10 : i32, message = "bqk,bnk->bqn"}> : () -> ()
    %cst_142 = arith.constant dense<0.000000e+00> : vector<2x8x8xf32>
    %350 = tpu.matmul %345, %347, %cst_142 {dimension_numbers = #tpu.dot_dimension_numbers<[2], [2], [1], [1], [0, 0, 0, 1, 1, 1], [0], [0]>} : vector<2x8x8xf32>, vector<2x8x8xf32>, vector<2x8x8xf32> -> vector<2x8x8xf32>
    "tpu.trace_stop"() : () -> ()
    %cst_143 = arith.constant 0.353553385 : f32
    %351 = vector.broadcast %cst_143 : f32 to vector<2x8x8xf32>
    %352 = arith.mulf %351, %350 : vector<2x8x8xf32>
    %cst_144 = arith.constant dense<0xFF800000> : vector<2x8xf32>
    %353 = vector.multi_reduction <maximumf>, %352, %cst_144 [2] : vector<2x8x8xf32> to vector<2x8xf32>
    %354 = vector.shape_cast %353 : vector<2x8xf32> to vector<2x8x1xf32>
    %355 = vector.broadcast %354 : vector<2x8x1xf32> to vector<2x8x8xf32>
    %356 = arith.subf %352, %355 : vector<2x8x8xf32>
    %357 = math.exp %356 : vector<2x8x8xf32>
    %cst_145 = arith.constant dense<0.000000e+00> : vector<2x8xf32>
    %358 = vector.multi_reduction <add>, %357, %cst_145 [2] : vector<2x8x8xf32> to vector<2x8xf32>
    %359 = vector.shape_cast %358 : vector<2x8xf32> to vector<2x8x1xf32>
    %360 = vector.broadcast %359 : vector<2x8x1xf32> to vector<2x8x8xf32>
    %361 = arith.divf %357, %360 : vector<2x8x8xf32>
    %c1_146 = arith.constant 1 : index
    %c0_147 = arith.constant 0 : index
    %c0_148 = arith.constant 0 : index
    %c0_149 = arith.constant 0 : index
    %362 = vector.load %arg12[%c1_146, %c0_147, %c0_148, %c0_149] : memref<4x2x8x8xf32, #tpu.memory_space<vmem>>, vector<1x2x8x8xf32>
    %363 = vector.shape_cast %362 : vector<1x2x8x8xf32> to vector<2x8x8xf32>
    %364 = vector.shape_cast %361 : vector<2x8x8xf32> to vector<1x2x8x8xf32>
    tpu.vector_store %arg12[%c1_146, %c0_147, %c0_148, %c0_149], %364 {strides = array<i32>} : memref<4x2x8x8xf32, #tpu.memory_space<vmem>>, vector<1x2x8x8xf32>,
    "tpu.trace_start"() <{level = 10 : i32, message = "bqn,bnv->bqv"}> : () -> ()
    %cst_150 = arith.constant dense<0.000000e+00> : vector<2x8x8xf32>
    %365 = tpu.matmul %361, %349, %cst_150 {dimension_numbers = #tpu.dot_dimension_numbers<[2], [1], [1], [2], [0, 0, 0, 1, 1, 2], [0], [0]>} : vector<2x8x8xf32>, vector<2x8x8xf32>, vector<2x8x8xf32> -> vector<2x8x8xf32>
    "tpu.trace_stop"() : () -> ()
    %366 = vector.shape_cast %365 : vector<2x8x8xf32> to vector<16x8xf32>
    %367 = vector.extract_strided_slice %320 {offsets = [0, 16], sizes = [16, 8], strides = [1, 1]} : vector<16x96xf32> to vector<16x8xf32>
    %368 = vector.shape_cast %367 : vector<16x8xf32> to vector<2x8x8xf32>
    %369 = vector.extract_strided_slice %320 {offsets = [0, 48], sizes = [16, 8], strides = [1, 1]} : vector<16x96xf32> to vector<16x8xf32>
    %370 = vector.shape_cast %369 : vector<16x8xf32> to vector<2x8x8xf32>
    %371 = vector.extract_strided_slice %320 {offsets = [0, 80], sizes = [16, 8], strides = [1, 1]} : vector<16x96xf32> to vector<16x8xf32>
    %372 = vector.shape_cast %371 : vector<16x8xf32> to vector<2x8x8xf32>
    "tpu.trace_start"() <{level = 10 : i32, message = "bqk,bnk->bqn"}> : () -> ()
    %cst_151 = arith.constant dense<0.000000e+00> : vector<2x8x8xf32>
    %373 = tpu.matmul %368, %370, %cst_151 {dimension_numbers = #tpu.dot_dimension_numbers<[2], [2], [1], [1], [0, 0, 0, 1, 1, 1], [0], [0]>} : vector<2x8x8xf32>, vector<2x8x8xf32>, vector<2x8x8xf32> -> vector<2x8x8xf32>
    "tpu.trace_stop"() : () -> ()
    %cst_152 = arith.constant 0.353553385 : f32
    %374 = vector.broadcast %cst_152 : f32 to vector<2x8x8xf32>
    %375 = arith.mulf %374, %373 : vector<2x8x8xf32>
    %cst_153 = arith.constant dense<0xFF800000> : vector<2x8xf32>
    %376 = vector.multi_reduction <maximumf>, %375, %cst_153 [2] : vector<2x8x8xf32> to vector<2x8xf32>
    %377 = vector.shape_cast %376 : vector<2x8xf32> to vector<2x8x1xf32>
    %378 = vector.broadcast %377 : vector<2x8x1xf32> to vector<2x8x8xf32>
    %379 = arith.subf %375, %378 : vector<2x8x8xf32>
    %380 = math.exp %379 : vector<2x8x8xf32>
    %cst_154 = arith.constant dense<0.000000e+00> : vector<2x8xf32>
    %381 = vector.multi_reduction <add>, %380, %cst_154 [2] : vector<2x8x8xf32> to vector<2x8xf32>
    %382 = vector.shape_cast %381 : vector<2x8xf32> to vector<2x8x1xf32>
    %383 = vector.broadcast %382 : vector<2x8x1xf32> to vector<2x8x8xf32>
    %384 = arith.divf %380, %383 : vector<2x8x8xf32>
    %c2_155 = arith.constant 2 : index
    %c0_156 = arith.constant 0 : index
    %c0_157 = arith.constant 0 : index
    %c0_158 = arith.constant 0 : index
    %385 = vector.load %arg12[%c2_155, %c0_156, %c0_157, %c0_158] : memref<4x2x8x8xf32, #tpu.memory_space<vmem>>, vector<1x2x8x8xf32>
    %386 = vector.shape_cast %385 : vector<1x2x8x8xf32> to vector<2x8x8xf32>
    %387 = vector.shape_cast %384 : vector<2x8x8xf32> to vector<1x2x8x8xf32>
    tpu.vector_store %arg12[%c2_155, %c0_156, %c0_157, %c0_158], %387 {strides = array<i32>} : memref<4x2x8x8xf32, #tpu.memory_space<vmem>>, vector<1x2x8x8xf32>,
    "tpu.trace_start"() <{level = 10 : i32, message = "bqn,bnv->bqv"}> : () -> ()
    %cst_159 = arith.constant dense<0.000000e+00> : vector<2x8x8xf32>
    %388 = tpu.matmul %384, %372, %cst_159 {dimension_numbers = #tpu.dot_dimension_numbers<[2], [1], [1], [2], [0, 0, 0, 1, 1, 2], [0], [0]>} : vector<2x8x8xf32>, vector<2x8x8xf32>, vector<2x8x8xf32> -> vector<2x8x8xf32>
    "tpu.trace_stop"() : () -> ()
    %389 = vector.shape_cast %388 : vector<2x8x8xf32> to vector<16x8xf32>
    %390 = vector.extract_strided_slice %320 {offsets = [0, 24], sizes = [16, 8], strides = [1, 1]} : vector<16x96xf32> to vector<16x8xf32>
    %391 = vector.shape_cast %390 : vector<16x8xf32> to vector<2x8x8xf32>
    %392 = vector.extract_strided_slice %320 {offsets = [0, 56], sizes = [16, 8], strides = [1, 1]} : vector<16x96xf32> to vector<16x8xf32>
    %393 = vector.shape_cast %392 : vector<16x8xf32> to vector<2x8x8xf32>
    %394 = vector.extract_strided_slice %320 {offsets = [0, 88], sizes = [16, 8], strides = [1, 1]} : vector<16x96xf32> to vector<16x8xf32>
    %395 = vector.shape_cast %394 : vector<16x8xf32> to vector<2x8x8xf32>
    "tpu.trace_start"() <{level = 10 : i32, message = "bqk,bnk->bqn"}> : () -> ()
    %cst_160 = arith.constant dense<0.000000e+00> : vector<2x8x8xf32>
    %396 = tpu.matmul %391, %393, %cst_160 {dimension_numbers = #tpu.dot_dimension_numbers<[2], [2], [1], [1], [0, 0, 0, 1, 1, 1], [0], [0]>} : vector<2x8x8xf32>, vector<2x8x8xf32>, vector<2x8x8xf32> -> vector<2x8x8xf32>
    "tpu.trace_stop"() : () -> ()
    %cst_161 = arith.constant 0.353553385 : f32
    %397 = vector.broadcast %cst_161 : f32 to vector<2x8x8xf32>
    %398 = arith.mulf %397, %396 : vector<2x8x8xf32>
    %cst_162 = arith.constant dense<0xFF800000> : vector<2x8xf32>
    %399 = vector.multi_reduction <maximumf>, %398, %cst_162 [2] : vector<2x8x8xf32> to vector<2x8xf32>
    %400 = vector.shape_cast %399 : vector<2x8xf32> to vector<2x8x1xf32>
    %401 = vector.broadcast %400 : vector<2x8x1xf32> to vector<2x8x8xf32>
    %402 = arith.subf %398, %401 : vector<2x8x8xf32>
    %403 = math.exp %402 : vector<2x8x8xf32>
    %cst_163 = arith.constant dense<0.000000e+00> : vector<2x8xf32>
    %404 = vector.multi_reduction <add>, %403, %cst_163 [2] : vector<2x8x8xf32> to vector<2x8xf32>
    %405 = vector.shape_cast %404 : vector<2x8xf32> to vector<2x8x1xf32>
    %406 = vector.broadcast %405 : vector<2x8x1xf32> to vector<2x8x8xf32>
    %407 = arith.divf %403, %406 : vector<2x8x8xf32>
    %c3 = arith.constant 3 : index
    %c0_164 = arith.constant 0 : index
    %c0_165 = arith.constant 0 : index
    %c0_166 = arith.constant 0 : index
    %408 = vector.load %arg12[%c3, %c0_164, %c0_165, %c0_166] : memref<4x2x8x8xf32, #tpu.memory_space<vmem>>, vector<1x2x8x8xf32>
    %409 = vector.shape_cast %408 : vector<1x2x8x8xf32> to vector<2x8x8xf32>
    %410 = vector.shape_cast %407 : vector<2x8x8xf32> to vector<1x2x8x8xf32>
    tpu.vector_store %arg12[%c3, %c0_164, %c0_165, %c0_166], %410 {strides = array<i32>} : memref<4x2x8x8xf32, #tpu.memory_space<vmem>>, vector<1x2x8x8xf32>,
    "tpu.trace_start"() <{level = 10 : i32, message = "bqn,bnv->bqv"}> : () -> ()
    %cst_167 = arith.constant dense<0.000000e+00> : vector<2x8x8xf32>
    %411 = tpu.matmul %407, %395, %cst_167 {dimension_numbers = #tpu.dot_dimension_numbers<[2], [1], [1], [2], [0, 0, 0, 1, 1, 2], [0], [0]>} : vector<2x8x8xf32>, vector<2x8x8xf32>, vector<2x8x8xf32> -> vector<2x8x8xf32>
    "tpu.trace_stop"() : () -> ()
    %412 = vector.shape_cast %411 : vector<2x8x8xf32> to vector<16x8xf32>
    %413 = tpu.concatenate %343, %366, %389, %412 in 1 : vector<16x8xf32>, vector<16x8xf32>, vector<16x8xf32>, vector<16x8xf32> -> vector<16x32xf32>
    %c2_168 = arith.constant 2 : index
    %c0_169 = arith.constant 0 : index
    %c0_170 = arith.constant 0 : index
    %414 = vector.load %arg2[%c2_168, %c0_169, %c0_170] : memref<3x32x32xf32, #tpu.memory_space<vmem>>, vector<1x32x32xf32>
    %415 = vector.shape_cast %414 : vector<1x32x32xf32> to vector<32x32xf32>
    %cst_171 = arith.constant dense<0.000000e+00> : vector<16x32xf32>
    %416 = tpu.matmul %413, %415, %cst_171 {dimension_numbers = #tpu.dot_dimension_numbers<[1], [0], [0], [1], [0, 0, 1, 1], [], []>} : vector<16x32xf32>, vector<32x32xf32>, vector<16x32xf32> -> vector<16x32xf32>
    %417 = arith.addf %416, %416 : vector<16x32xf32>
    %c2_172 = arith.constant 2 : index
    %c0_173 = arith.constant 0 : index
    %c0_174 = arith.constant 0 : index
    %418 = vector.load %arg3[%c2_172, %c0_173, %c0_174] : memref<3x1x32xf32, #tpu.memory_space<vmem>>, vector<1x1x32xf32>
    %419 = vector.shape_cast %418 : vector<1x1x32xf32> to vector<1x32xf32>
    %c2_175 = arith.constant 2 : index
    %c0_176 = arith.constant 0 : index
    %c0_177 = arith.constant 0 : index
    %420 = vector.load %arg4[%c2_175, %c0_176, %c0_177] : memref<3x1x32xf32, #tpu.memory_space<vmem>>, vector<1x1x32xf32>
    %421 = vector.shape_cast %420 : vector<1x1x32xf32> to vector<1x32xf32>
    %cst_178 = arith.constant dense<0.000000e+00> : vector<32xf32>
    %422 = vector.multi_reduction <add>, %417, %cst_178 [0] : vector<16x32xf32> to vector<32xf32>
    %423 = vector.shape_cast %422 : vector<32xf32> to vector<1x32xf32>
    %424 = arith.mulf %417, %417 : vector<16x32xf32>
    %cst_179 = arith.constant dense<0.000000e+00> : vector<32xf32>
    %425 = vector.multi_reduction <add>, %424, %cst_179 [0] : vector<16x32xf32> to vector<32xf32>
    %426 = vector.shape_cast %425 : vector<32xf32> to vector<1x32xf32>
    %cst_180 = arith.constant 6.250000e-02 : f32
    %427 = vector.broadcast %cst_180 : f32 to vector<1x32xf32>
    %428 = arith.mulf %423, %427 : vector<1x32xf32>
    %cst_181 = arith.constant 6.250000e-02 : f32
    %429 = vector.broadcast %cst_181 : f32 to vector<1x32xf32>
    %430 = arith.mulf %426, %429 : vector<1x32xf32>
    %431 = arith.mulf %428, %428 : vector<1x32xf32>
    %432 = arith.subf %430, %431 : vector<1x32xf32>
    %433 = vector.broadcast %428 : vector<1x32xf32> to vector<16x32xf32>
    %434 = arith.subf %417, %433 : vector<16x32xf32>
    %cst_182 = arith.constant 9.99999974E-6 : f32
    %435 = vector.broadcast %cst_182 : f32 to vector<1x32xf32>
    %436 = arith.addf %432, %435 : vector<1x32xf32>
    %437 = math.rsqrt %436 : vector<1x32xf32>
    %438 = vector.broadcast %437 : vector<1x32xf32> to vector<16x32xf32>
    %439 = arith.mulf %434, %438 : vector<16x32xf32>
    %440 = vector.broadcast %419 : vector<1x32xf32> to vector<16x32xf32>
    %441 = arith.mulf %439, %440 : vector<16x32xf32>
    %442 = vector.broadcast %421 : vector<1x32xf32> to vector<16x32xf32>
    %443 = arith.addf %441, %442 : vector<16x32xf32>
    %c2_183 = arith.constant 2 : index
    %c0_184 = arith.constant 0 : index
    %c0_185 = arith.constant 0 : index
    %444 = vector.load %arg5[%c2_183, %c0_184, %c0_185] : memref<3x32x64xf32, #tpu.memory_space<vmem>>, vector<1x32x64xf32>
    %445 = vector.shape_cast %444 : vector<1x32x64xf32> to vector<32x64xf32>
    %cst_186 = arith.constant dense<0.000000e+00> : vector<16x64xf32>
    %446 = tpu.matmul %443, %445, %cst_186 {dimension_numbers = #tpu.dot_dimension_numbers<[1], [0], [0], [1], [0, 0, 1, 1], [], []>} : vector<16x32xf32>, vector<32x64xf32>, vector<16x64xf32> -> vector<16x64xf32>
    %c2_187 = arith.constant 2 : index
    %c0_188 = arith.constant 0 : index
    %c0_189 = arith.constant 0 : index
    %447 = vector.load %arg6[%c2_187, %c0_188, %c0_189] : memref<3x1x64xf32, #tpu.memory_space<vmem>>, vector<1x1x64xf32>
    %448 = vector.shape_cast %447 : vector<1x1x64xf32> to vector<1x64xf32>
    %449 = vector.broadcast %448 : vector<1x64xf32> to vector<16x64xf32>
    %450 = arith.addf %446, %449 : vector<16x64xf32>
    %cst_190 = arith.constant 0.000000e+00 : f32
    %451 = vector.broadcast %cst_190 : f32 to vector<16x64xf32>
    %452 = arith.maximumf %450, %451 : vector<16x64xf32>
    %c2_191 = arith.constant 2 : index
    %c0_192 = arith.constant 0 : index
    %c0_193 = arith.constant 0 : index
    %453 = vector.load %arg7[%c2_191, %c0_192, %c0_193] : memref<3x64x32xf32, #tpu.memory_space<vmem>>, vector<1x64x32xf32>
    %454 = vector.shape_cast %453 : vector<1x64x32xf32> to vector<64x32xf32>
    %cst_194 = arith.constant dense<0.000000e+00> : vector<16x32xf32>
    %455 = tpu.matmul %452, %454, %cst_194 {dimension_numbers = #tpu.dot_dimension_numbers<[1], [0], [0], [1], [0, 0, 1, 1], [], []>} : vector<16x64xf32>, vector<64x32xf32>, vector<16x32xf32> -> vector<16x32xf32>
    %c2_195 = arith.constant 2 : index
    %c0_196 = arith.constant 0 : index
    %c0_197 = arith.constant 0 : index
    %456 = vector.load %arg8[%c2_195, %c0_196, %c0_197] : memref<3x1x32xf32, #tpu.memory_space<vmem>>, vector<1x1x32xf32>
    %457 = vector.shape_cast %456 : vector<1x1x32xf32> to vector<1x32xf32>
    %458 = vector.broadcast %457 : vector<1x32xf32> to vector<16x32xf32>
    %459 = arith.addf %455, %458 : vector<16x32xf32>
    %460 = arith.addf %443, %459 : vector<16x32xf32>
    %461 = arith.addf %460, %460 : vector<16x32xf32>
    %c2_198 = arith.constant 2 : index
    %c0_199 = arith.constant 0 : index
    %c0_200 = arith.constant 0 : index
    %462 = vector.load %arg9[%c2_198, %c0_199, %c0_200] : memref<3x1x32xf32, #tpu.memory_space<vmem>>, vector<1x1x32xf32>
    %463 = vector.shape_cast %462 : vector<1x1x32xf32> to vector<1x32xf32>
    %c2_201 = arith.constant 2 : index
    %c0_202 = arith.constant 0 : index
    %c0_203 = arith.constant 0 : index
    %464 = vector.load %arg10[%c2_201, %c0_202, %c0_203] : memref<3x1x32xf32, #tpu.memory_space<vmem>>, vector<1x1x32xf32>
    %465 = vector.shape_cast %464 : vector<1x1x32xf32> to vector<1x32xf32>
    %cst_204 = arith.constant dense<0.000000e+00> : vector<32xf32>
    %466 = vector.multi_reduction <add>, %461, %cst_204 [0] : vector<16x32xf32> to vector<32xf32>
    %467 = vector.shape_cast %466 : vector<32xf32> to vector<1x32xf32>
    %468 = arith.mulf %461, %461 : vector<16x32xf32>
    %cst_205 = arith.constant dense<0.000000e+00> : vector<32xf32>
    %469 = vector.multi_reduction <add>, %468, %cst_205 [0] : vector<16x32xf32> to vector<32xf32>
    %470 = vector.shape_cast %469 : vector<32xf32> to vector<1x32xf32>
    %cst_206 = arith.constant 6.250000e-02 : f32
    %471 = vector.broadcast %cst_206 : f32 to vector<1x32xf32>
    %472 = arith.mulf %467, %471 : vector<1x32xf32>
    %cst_207 = arith.constant 6.250000e-02 : f32
    %473 = vector.broadcast %cst_207 : f32 to vector<1x32xf32>
    %474 = arith.mulf %470, %473 : vector<1x32xf32>
    %475 = arith.mulf %472, %472 : vector<1x32xf32>
    %476 = arith.subf %474, %475 : vector<1x32xf32>
    %477 = vector.broadcast %472 : vector<1x32xf32> to vector<16x32xf32>
    %478 = arith.subf %461, %477 : vector<16x32xf32>
    %cst_208 = arith.constant 9.99999974E-6 : f32
    %479 = vector.broadcast %cst_208 : f32 to vector<1x32xf32>
    %480 = arith.addf %476, %479 : vector<1x32xf32>
    %481 = math.rsqrt %480 : vector<1x32xf32>
    %482 = vector.broadcast %481 : vector<1x32xf32> to vector<16x32xf32>
    %483 = arith.mulf %478, %482 : vector<16x32xf32>
    %484 = vector.broadcast %463 : vector<1x32xf32> to vector<16x32xf32>
    %485 = arith.mulf %483, %484 : vector<16x32xf32>
    %486 = vector.broadcast %465 : vector<1x32xf32> to vector<16x32xf32>
    %487 = arith.addf %485, %486 : vector<16x32xf32>
    %488 = vector.shape_cast %487 : vector<16x32xf32> to vector<2x8x32xf32>
    %c0_209 = arith.constant 0 : index
    %c0_210 = arith.constant 0 : index
    %c0_211 = arith.constant 0 : index
    %489 = vector.load %arg11[%c0_209, %c0_210, %c0_211] : memref<2x8x32xf32, #tpu.memory_space<vmem>>, vector<2x8x32xf32>
    tpu.vector_store %arg11[%c0_209, %c0_210, %c0_211], %488 {strides = array<i32>} : memref<2x8x32xf32, #tpu.memory_space<vmem>>, vector<2x8x32xf32>,
    return
  }
}

</mosaic_0001>

<bundles_post_ra>
// kernel: transformer_forward.1
= control target key start
LH: loop header
LB: loop body
LE: loop exit
PB: predicated region body
PF: predicated region fallthrough
CT: control target
= control target key end

     0   :  { %18 = vsyncpa [#allocation3], 0  ;;  %s7500_s0 = inlined_call_operand.hbm [shape: f32[2,8,32], index: 0, kind: input, shape index: {}]   ;;  %s7501_s1 = inlined_call_operand.vmem [shape: f32[3,32,96], index: 1, kind: input, shape index: {}]   ;;  %s7502_s2 = inlined_call_operand.vmem [shape: f32[3,32,32], index: 2, kind: input, shape index: {}]   ;;  %s7503_s3 = inlined_call_operand.vmem [shape: f32[3,1,32], index: 3, kind: input, shape index: {}]   ;;  %s7504_s4 = inlined_call_operand.vmem [shape: f32[3,1,32], index: 4, kind: input, shape index: {}]   ;;  %s7505_s5 = inlined_call_operand.vmem [shape: f32[3,32,64], index: 5, kind: input, shape index: {}]   ;;  %s7506_s6 = inlined_call_operand.hbm [shape: f32[3,1,64], index: 6, kind: input, shape index: {}]   ;;  %s7507_s7 = inlined_call_operand.vmem [shape: f32[3,64,32], index: 7, kind: input, shape index: {}]   ;;  %s7508_s8 = inlined_call_operand.hbm [shape: f32[3,1,32], index: 8, kind: input, shape index: {}]   ;;  %s7509_s9 = inlined_call_operand.vmem [shape: f32[3,1,32], index: 9, kind: input, shape index: {}]   ;;  %s7510_s10 = inlined_call_operand.hbm [shape: f32[3,1,32], index: 10, kind: input, shape index: {}]   ;;  %s7511_s11 = inlined_call_operand.hbm [shape: f32[2,8,32], index: 11, kind: output, shape index: {0}]   ;;  %s7512_s12 = inlined_call_operand.hbm [shape: f32[4,2,8,8], index: 12, kind: output, shape index: {1}]  }
   0x1   :  { %19 = vsyncpa [#allocation6], 0 }
   0x2   :  { %20 = vsyncpa [#allocation9], 0 }
   0x3   :  { %21 = vsyncpa [#allocation4], 0 }
   0x4   :  { %22 = vsyncpa [#allocation12], 0  ;;  %s6624_s21 = smov [#allocation5]  }
   0x5   :  { %s50_s22 = sshll.u32 %s6624_s21, 4  ;;  %s51_s22 = int_to_ptr.vmem [resolvable:$true] %s50_s22 }
   0x6   :  { %s6502_s23 = scalar_lea.vmem %s51_s22, 48  ;;  %s6506_s24 = scalar_lea.vmem %s51_s22, 64 }
   0x7   :  { %p6503_p0 = scmp.ne.s32.totalorder %s51_s22, %s6502_s23  ;;  %p6507_p1 = scmp.lt.s32.totalorder %s51_s22, %s51_s22 }
   0x8   :  { %p6508_p2 = scmp.lt.s32.totalorder %s6506_s24, %s6502_s23 }
   0xa   :  { %p6509_p3 = por %p6508_p2, %p6507_p1 }
   0xc   :  { %p6510_p4 = pnand %p6509_p3, %p6503_p0 }
   0xe   :  { %6513 = shalt.err (!%p6510_p4)
}
   0xf   :  { %s6625_s25 = smov 16   ;;  %s6626_s26 = smov 1  }
  0x10   :  { %56 = dma.hbm_to_vmem [thread:$0]  %s7506_s6, 48, %s51_s22, [#allocation6], %s6625_s25, %s6625_s25, %s6626_s26  }
  0x11   :  { %s6627_s29 = smov [#allocation2]  }
  0x12   :  { %s28_s30 = sshll.u32 %s6627_s29, 4  ;;  %s29_s30 = int_to_ptr.vmem [resolvable:$true] %s28_s30 }
  0x13   :  { %s6522_s13 = scalar_lea.vmem %s29_s30, 256  ;;  %p6527_p6 = scmp.lt.s32.totalorder %s29_s30, %s29_s30 }
  0x14   :  { %p6523_p5 = scmp.ne.s32.totalorder %s29_s30, %s6522_s13  ;;  %p6528_p7 = scmp.lt.s32.totalorder %s6522_s13, %s6522_s13 }
  0x16   :  { %p6529_p8 = por %p6528_p7, %p6527_p6 }
  0x18   :  { %p6530_p9 = pnand %p6529_p8, %p6523_p5 }
  0x1a   :  { %6533 = shalt.err (!%p6530_p9)
}
  0x1b   :  { %s7513_s14 = smov 128   ;;  %s6629_s15 = smov 8  }
  0x1c   :  { %34 = dma.hbm_to_vmem [thread:$0]  %s7500_s0, 256, %s29_s30, [#allocation3], %s7513_s14, %s7513_s14, %s6629_s15  }
  0x1d   :  { %s6630_s6 = smov [#allocation7]   ;;  %s6631_s19 = smov [#allocation8]  }
  0x1e   :  { %s64_s18 = sshll.u32 %s6630_s6, 4  ;;  %s78_s20 = sshll.u32 %s6631_s19, 4  ;;  %s65_s18 = int_to_ptr.vmem [resolvable:$true] %s64_s18  ;;  %s79_s20 = int_to_ptr.vmem [resolvable:$true] %s78_s20 }
  0x1f   :  { %s6542_s21 = scalar_lea.vmem %s65_s18, 48  ;;  %s6546_s22 = scalar_lea.vmem %s65_s18, 64 }
  0x20   :  { %p6543_p10 = scmp.ne.s32.totalorder %s65_s18, %s6542_s21  ;;  %p6547_p11 = scmp.lt.s32.totalorder %s65_s18, %s65_s18 }
  0x21   :  { %p6548_p12 = scmp.lt.s32.totalorder %s6546_s22, %s6542_s21 }
  0x23   :  { %p6549_p13 = por %p6548_p12, %p6547_p11 }
  0x25   :  { %p6550_p0 = pnand %p6549_p13, %p6543_p10 }
  0x27   :  { %6553 = shalt.err (!%p6550_p0)
}
  0x28   :  { %70 = dma.hbm_to_vmem [thread:$0]  %s7508_s8, 48, %s65_s18, [#allocation6], %s6625_s25, %s6625_s25, %s6626_s26  }
  0x29   :  { %s6562_s0 = scalar_lea.vmem %s79_s20, 48  ;;  %s6566_s27 = scalar_lea.vmem %s79_s20, 64 }
  0x2a   :  { %p6563_p1 = scmp.ne.s32.totalorder %s79_s20, %s6562_s0  ;;  %p6567_p2 = scmp.lt.s32.totalorder %s79_s20, %s79_s20 }
  0x2b   :  { %p6568_p3 = scmp.lt.s32.totalorder %s6566_s27, %s6562_s0 }
  0x2d   :  { %p6569_p4 = por %p6568_p3, %p6567_p2 }
  0x2f   :  { %p6570_p5 = pnand %p6569_p4, %p6563_p1 }
  0x31   :  { %6573 = shalt.err (!%p6570_p5)
}
  0x32   :  { %84 = dma.hbm_to_vmem [thread:$0]  %s7510_s10, 48, %s79_s20, [#allocation9], %s6625_s25, %s6625_s25, %s6626_s26  }
  0x33   :  { %6614 = dma.done.wait [#allocation3], 256  }
  0x34   :  { %6615 = vsyncadd [#allocation3], 4294967040 }
  0x35   :  { %6616 = dma.done.wait [#allocation6], 96  }
  0x36   :  { %6617 = vsyncadd [#allocation6], 4294967200 }
  0x37   :  { %6618 = dma.done.wait [#allocation9], 48  }
  0x38   :  { %6619 = vsyncadd [#allocation9], 4294967248  ;;  %vm103_vm0 = vcmask 261120   ;;  %v102_v0 = vld [vmem:[%s7501_s1 + $0x18] sm:$0xff]  ;;  %v101_v1 = vld [vmem:[%s7501_s1 + $0x10] sm:$0xff]  ;;  %v6632_v6 = vmov 0.0  }
  0x39   :  { %5966 = vmatprep.subr.mxu1 %v102_v0  ;;  %v97_v2 = vld [vmem:[#allocation2] sm:$0xff]  ;;  %v100_v3 = vld [vmem:[%s7501_s1 + $0x8] sm:$0xff]  ;;  %5987 = vmatprep.subr.mxu0 %v6632_v6  ;;  %vm6633_vm1 = vmmov 0   ;;  %s6634_s18 = smov 96   ;;  %vm188_vm2 = vcmask 64512   ;;  %s6635_s19 = smov 64  }
  0x3a   :  { %5967 = vmatpush3.msra.mxu1 %v102_v0  ;;  %5974 = vmatprep.mubr.msk.f32.mxu1 %vm103_vm0, %v97_v2  ;;  %v99_v4 = vld [vmem:[%s7501_s1] sm:$0xff]  ;;  %v98_v5 = vld [vmem:[#allocation2 + $0x8] sm:$0xff]  ;;  %s6636_s20 = smov 88   ;;  %s6637_s21 = smov 120   ;;  %vm1541_vm3 = vcmask 195584   ;;  %vm1538_vm4 = vcmask 130048  }
  0x3b   :  { %5968 = vmatprep.subr.mxu1 %v101_v1  ;;  %5989 = vmatprep.mubr.msk.f32.mxu0 %vm6633_vm1, %v6632_v6  ;;  %s6638_s22 = smov 56   ;;  %s6639_s23 = smov 80   ;;  %vm1788_vm5 = vcmask 523264  }
  0x3c   :  { %5969 = vmatpush3.msra.mxu1 %v101_v1  ;;  %s6640_s24 = smov 112   ;;  %s6641_s0 = smov 48  }
  0x3d   :  { %5970 = vmatprep.subr.mxu1 %v100_v3  ;;  %s6642_s27 = smov 72   ;;  %s6643_s28 = smov 104  }
  0x3e   :  { %5971 = vmatpush3.msra.mxu1 %v100_v3  ;;  %s6644_s29 = smov 40   ;;  %s6645_s8 = smov 24  }
  0x3f   :  { %5972 = vmatprep.subr.mxu1 %v99_v4 }
  0x40   :  { %5973 = vmatpush3.msra.mxu1 %v99_v4 }
  0x41   :  { %5975 = vmatmul.mubr.msk.f32.vlgmr.msra.gmra.mxu1 %vm103_vm0, %v98_v5  ;;  %5977 = vmatprep.subr.mxu1 %v6632_v6 }
  0x42   :  { %5979 = vmatprep.mubr.msk.f32.mxu1 %vm6633_vm1, %v6632_v6 }
 0x101   :  { %v6757_v7 = vpop.f32.mrf.mxu1 }
 0x103   :  { %v6759_v8 = vpop.f32.mrf.mxu1 }
 0x104   :  { %186 = vrot.lane.b32.xlu0 %v6759_v8, %s6634_s18 }
 0x108   :  { %264 = vrot.lane.b32.xlu0 %v6757_v7, %s6634_s18 }
 0x176   :  { %v187_v9 = vpop.permute.xlu0 %186 }
 0x177   :  { %5978 = vmatpush3.xpose.msk.msra.mxu1 %vm188_vm2, %v187_v9 }
 0x178   :  { %5982 = vmatprep.subr.mxu1 %v6632_v6 }
 0x17a   :  { %5980 = vmatmul.mubr.msk.f32.vlgmr.msra.gmra.mxu1 %vm188_vm2, %v6759_v8  ;;  %v265_v10 = vpop.permute.xlu0 %264 }
 0x17b   :  { %5983 = vmatpush3.xpose.msk.msra.mxu1 %vm188_vm2, %v265_v10  ;;  %5984 = vmatprep.mubr.msk.f32.mxu1 %vm6633_vm1, %v6632_v6 }
 0x17c   :  { %5992 = vmatprep.subr.mxu1 %v6632_v6 }
 0x17e   :  { %5985 = vmatmul.mubr.msk.f32.vlgmr.msra.gmra.mxu1 %vm188_vm2, %v6757_v7 }
 0x17f   :  { %5994 = vmatprep.mubr.msk.f32.mxu1 %vm6633_vm1, %v6632_v6 }
 0x23a   :  { %v259_v11 = vpop.f32.mrf.mxu1 }
 0x23b   :  { %v340_v12 = vmul.f32 0.35355338, %v259_v11 }
 0x23c   :  { %v5981_v13 = vpop.f32.mrf.mxu1 }
 0x23d   :  { %v342_v14 = vsel %vm188_vm2, %v340_v12, -inf }
 0x23e   :  { %343 = vmax.xlane.f32.xlu1 %v342_v14  ;;  %v336_v15 = vpop.f32.mrf.mxu1 }
 0x23f   :  { %v341_v16 = vmul.f32 0.35355338, %v336_v15 }
 0x240   :  { %v5986_v17 = vpop.f32.mrf.mxu1 }
 0x241   :  { %v345_v18 = vsel %vm188_vm2, %v341_v16, -inf }
 0x242   :  { %346 = vmax.xlane.f32.xlu1 %v345_v18 }
 0x253   :  { %364 = vrot.lane.b32.xlu1 %v6759_v8, %s6635_s19 }
 0x257   :  { %440 = vrot.lane.b32.xlu1 %v6757_v7, %s6635_s19 }
 0x25b   :  { %518 = vrot.lane.b32.xlu1 %v6759_v8, %s6636_s20 }
 0x25f   :  { %596 = vrot.lane.b32.xlu1 %v6757_v7, %s6636_s20 }
 0x2c7   :  { %v344_v19 = vpop.xlane.xlu1 %343 }
 0x2c8   :  { %v348_v20 = vsub.f32 %v340_v12, %v344_v19 }
 0x2ca   :  { %v350_v21 = vmul.f32 1.442695, %v348_v20 }
 0x2cb   :  { %v347_v22 = vpop.xlane.xlu1 %346 }
 0x2cc   :  { %6386 = vpow2.f32 %v350_v21  ;;  %v349_v23 = vsub.f32 %v341_v16, %v347_v22 }
 0x2ce   :  { %v352_v24 = vmul.f32 1.442695, %v349_v23 }
 0x2cf   :  { %v365_v25 = vpop.permute.xlu1 %364 }
 0x2d0   :  { %6388 = vpow2.f32 %v352_v24  ;;  %5988 = vmatpush3.msra.mxu0 %v365_v25 }
 0x2d1   :  { %5997 = vmatprep.subr.mxu0 %v6632_v6 }
 0x2d3   :  { %v441_v26 = vpop.permute.xlu1 %440 }
 0x2d4   :  { %5993 = vmatpush3.msra.mxu1 %v441_v26 }
 0x2d5   :  { %6002 = vmatprep.subr.mxu1 %v6632_v6 }
 0x2d7   :  { %v519_v31 = vpop.permute.xlu1 %518 }
 0x2d9   :  { %v6387_v27 = vpop.eup %6386 }
 0x2da   :  { %v354_v28 = vsel %vm188_vm2, %v6387_v27, 0.0 }
 0x2db   :  { %355 = vadd.xlane.f32.xlu0 %v354_v28  ;;  %v597_v32 = vpop.permute.xlu1 %596 }
 0x2dd   :  { %v6389_v29 = vpop.eup %6388 }
 0x2de   :  { %v357_v30 = vsel %vm188_vm2, %v6389_v29, 0.0 }
 0x2df   :  { %358 = vadd.xlane.f32.xlu1 %v357_v30 }
 0x2f0   :  { %594 = vrot.lane.b32.xlu1 %v6757_v7, %s6637_s21 }
 0x2f1   :  { %516 = vrot.lane.b32.xlu0 %v6759_v8, %s6637_s21 }
 0x364   :  { %v356_v33 = vpop.xlane.xlu0 %355 }
 0x365   :  { %6390 = vrcp.f32 %v356_v33 }
 0x368   :  { %v359_v34 = vpop.xlane.xlu1 %358  ;;  %v517_v39 = vpop.permute.xlu0 %516 }
 0x369   :  { %6392 = vrcp.f32 %v359_v34 }
 0x36c   :  { %v595_v40 = vpop.permute.xlu1 %594 }
 0x372   :  { %v6391_v35 = vpop.eup %6390 }
 0x373   :  { %v361_v36 = vmul.f32 %v6391_v35, %v6387_v27 }
 0x375   :  { %5990 = vmatmul.mubr.msk.f32.vlgmr.msra.gmra.mxu0 %vm188_vm2, %v361_v36 }
 0x376   :  { %v6393_v37 = vpop.eup %6392  ;;  %5998 = vmatpush3.xpose.msk.msra.mxu0 %vm188_vm2, %v519_v31  ;;  %5999 = vmatprep.mubr.msk.f32.mxu0 %vm6633_vm1, %v6632_v6 }
 0x377   :  { %v363_v38 = vmul.f32 %v6393_v37, %v6389_v29  ;;  %6007 = vmatprep.subr.mxu0 %v6632_v6 }
 0x379   :  { %5995 = vmatmul.mubr.msk.f32.vlgmr.msra.gmra.mxu1 %vm188_vm2, %v363_v38  ;;  %6000 = vmatmul.mubr.msk.f32.vlgmr.msra.gmra.mxu0 %vm188_vm2, %v517_v39 }
 0x37a   :  { %6003 = vmatpush3.xpose.msk.msra.mxu1 %vm188_vm2, %v597_v32  ;;  %6004 = vmatprep.mubr.msk.f32.mxu1 %vm6633_vm1, %v6632_v6 }
 0x37b   :  { %6012 = vmatprep.subr.mxu1 %v6632_v6  ;;  %6009 = vmatprep.mubr.msk.f32.mxu0 %vm6633_vm1, %v6632_v6 }
 0x37d   :  { %6005 = vmatmul.mubr.msk.f32.vlgmr.msra.gmra.mxu1 %vm188_vm2, %v595_v40 }
 0x37e   :  { %6014 = vmatprep.mubr.msk.f32.mxu1 %vm6633_vm1, %v6632_v6 }
 0x435   :  { %v6811_v41 = vpop.f32.mrf.mxu0 }
 0x437   :  { %v5991_v42 = vpop.f32.mrf.mxu0 }
 0x439   :  { %v6813_v43 = vpop.f32.mrf.mxu1  ;;  %v590_v44 = vpop.f32.mrf.mxu0 }
 0x43a   :  { %v672_v45 = vmul.f32 0.35355338, %v590_v44 }
 0x43b   :  { %v5996_v46 = vpop.f32.mrf.mxu1  ;;  %v6001_v47 = vpop.f32.mrf.mxu0 }
 0x43c   :  { %v674_v48 = vsel %vm188_vm2, %v672_v45, -inf }
 0x43d   :  { %v668_v49 = vpop.f32.mrf.mxu1  ;;  %675 = vmax.xlane.f32.xlu1 %v674_v48 }
 0x43e   :  { %v673_v50 = vmul.f32 0.35355338, %v668_v49 }
 0x43f   :  { %v6006_v51 = vpop.f32.mrf.mxu1 }
 0x440   :  { %v677_v52 = vsel %vm188_vm2, %v673_v50, -inf }
 0x441   :  { %678 = vmax.xlane.f32.xlu0 %v677_v52 }
 0x44e   :  { %696 = vrot.lane.b32.xlu1 %v6759_v8, %s6638_s22 }
 0x452   :  { %850 = vrot.lane.b32.xlu1 %v6759_v8, %s6639_s23 }
 0x456   :  { %928 = vrot.lane.b32.xlu1 %v6757_v7, %s6639_s23 }
 0x457   :  { %772 = vrot.lane.b32.xlu0 %v6757_v7, %s6638_s22 }
 0x45b   :  { %848 = vrot.lane.b32.xlu0 %v6759_v8, %s6640_s24 }
 0x4c6   :  { %v676_v53 = vpop.xlane.xlu1 %675 }
 0x4c7   :  { %v680_v54 = vsub.f32 %v672_v45, %v676_v53 }
 0x4c9   :  { %v682_v55 = vmul.f32 1.442695, %v680_v54 }
 0x4ca   :  { %v697_v56 = vpop.permute.xlu1 %696  ;;  %v679_v57 = vpop.xlane.xlu0 %678 }
 0x4cb   :  { %6394 = vpow2.f32 %v682_v55  ;;  %v681_v58 = vsub.f32 %v673_v50, %v679_v57  ;;  %6008 = vmatpush3.msra.mxu0 %v697_v56 }
 0x4cc   :  { %6017 = vmatprep.subr.mxu0 %v6632_v6 }
 0x4cd   :  { %v684_v59 = vmul.f32 1.442695, %v681_v58 }
 0x4ce   :  { %v773_v60 = vpop.permute.xlu0 %772  ;;  %v851_v1 = vpop.permute.xlu1 %850 }
 0x4cf   :  { %6396 = vpow2.f32 %v684_v59  ;;  %6013 = vmatpush3.msra.mxu1 %v773_v60 }
 0x4d0   :  { %6022 = vmatprep.subr.mxu1 %v6632_v6 }
 0x4d2   :  { %v929_v2 = vpop.permute.xlu1 %928  ;;  %v849_v12 = vpop.permute.xlu0 %848 }
 0x4d8   :  { %v6395_v61 = vpop.eup %6394 }
 0x4d9   :  { %v686_v62 = vsel %vm188_vm2, %v6395_v61, 0.0 }
 0x4da   :  { %687 = vadd.xlane.f32.xlu1 %v686_v62 }
 0x4dc   :  { %v6397_v63 = vpop.eup %6396 }
 0x4dd   :  { %v689_v0 = vsel %vm188_vm2, %v6397_v63, 0.0 }
 0x4de   :  { %690 = vadd.xlane.f32.xlu1 %v689_v0 }
 0x4ef   :  { %926 = vrot.lane.b32.xlu1 %v6757_v7, %s6640_s24 }
 0x563   :  { %v688_v3 = vpop.xlane.xlu1 %687 }
 0x564   :  { %6398 = vrcp.f32 %v688_v3 }
 0x567   :  { %v691_v4 = vpop.xlane.xlu1 %690 }
 0x568   :  { %6400 = vrcp.f32 %v691_v4 }
 0x56b   :  { %v927_v13 = vpop.permute.xlu1 %926 }
 0x571   :  { %v6399_v5 = vpop.eup %6398 }
 0x572   :  { %v693_v9 = vmul.f32 %v6399_v5, %v6395_v61 }
 0x574   :  { %6010 = vmatmul.mubr.msk.f32.vlgmr.msra.gmra.mxu0 %vm188_vm2, %v693_v9 }
 0x575   :  { %v6401_v10 = vpop.eup %6400  ;;  %6018 = vmatpush3.xpose.msk.msra.mxu0 %vm188_vm2, %v851_v1  ;;  %6019 = vmatprep.mubr.msk.f32.mxu0 %vm6633_vm1, %v6632_v6 }
 0x576   :  { %v695_v11 = vmul.f32 %v6401_v10, %v6397_v63  ;;  %6027 = vmatprep.subr.mxu0 %v6632_v6 }
 0x578   :  { %6015 = vmatmul.mubr.msk.f32.vlgmr.msra.gmra.mxu1 %vm188_vm2, %v695_v11  ;;  %6020 = vmatmul.mubr.msk.f32.vlgmr.msra.gmra.mxu0 %vm188_vm2, %v849_v12 }
 0x579   :  { %6023 = vmatpush3.xpose.msk.msra.mxu1 %vm188_vm2, %v929_v2  ;;  %6024 = vmatprep.mubr.msk.f32.mxu1 %vm6633_vm1, %v6632_v6 }
 0x57a   :  { %6032 = vmatprep.subr.mxu1 %v6632_v6  ;;  %6029 = vmatprep.mubr.msk.f32.mxu0 %vm6633_vm1, %v6632_v6 }
 0x57c   :  { %6025 = vmatmul.mubr.msk.f32.vlgmr.msra.gmra.mxu1 %vm188_vm2, %v927_v13 }
 0x57d   :  { %6034 = vmatprep.mubr.msk.f32.mxu1 %vm6633_vm1, %v6632_v6 }
 0x634   :  { %v6849_v14 = vpop.f32.mrf.mxu0 }
 0x636   :  { %v6011_v15 = vpop.f32.mrf.mxu0 }
 0x638   :  { %v6851_v16 = vpop.f32.mrf.mxu1  ;;  %v922_v17 = vpop.f32.mrf.mxu0 }
 0x639   :  { %v1004_v18 = vmul.f32 0.35355338, %v922_v17 }
 0x63a   :  { %v6016_v19 = vpop.f32.mrf.mxu1  ;;  %v6021_v20 = vpop.f32.mrf.mxu0 }
 0x63b   :  { %v1006_v21 = vsel %vm188_vm2, %v1004_v18, -inf  ;;  %v1545_v19 = vld [vmem:[%s7502_s2 + $0x8] sm:$0xff]  ;;  %v1544_v20 = vld [vmem:[%s7502_s2] sm:$0xff] }
 0x63c   :  { %v1000_v22 = vpop.f32.mrf.mxu1  ;;  %1007 = vmax.xlane.f32.xlu0 %v1006_v21 }
 0x63d   :  { %v1005_v23 = vmul.f32 0.35355338, %v1000_v22 }
 0x63e   :  { %v6026_v24 = vpop.f32.mrf.mxu1 }
 0x63f   :  { %v1009_v25 = vsel %vm188_vm2, %v1005_v23, -inf }
 0x640   :  { %1010 = vmax.xlane.f32.xlu1 %v1009_v25 }
 0x651   :  { %1028 = vrot.lane.b32.xlu1 %v6759_v8, %s6641_s0 }
 0x652   :  { %1104 = vrot.lane.b32.xlu0 %v6757_v7, %s6641_s0 }
 0x655   :  { %1182 = vrot.lane.b32.xlu1 %v6759_v8, %s6642_s27 }
 0x659   :  { %1260 = vrot.lane.b32.xlu1 %v6757_v7, %s6642_s27 }
 0x65d   :  { %1258 = vrot.lane.b32.xlu1 %v6757_v7, %s6643_s28 }
 0x6c5   :  { %v1008_v26 = vpop.xlane.xlu0 %1007 }
 0x6c6   :  { %v1012_v27 = vsub.f32 %v1004_v18, %v1008_v26  ;;  %v1546_v18 = vld [vmem:[%s7502_s2 + $0x10] sm:$0xff] }
 0x6c8   :  { %v1014_v28 = vmul.f32 1.442695, %v1012_v27 }
 0x6c9   :  { %v1011_v29 = vpop.xlane.xlu1 %1010  ;;  %v1105_v30 = vpop.permute.xlu0 %1104 }
 0x6ca   :  { %6402 = vpow2.f32 %v1014_v28  ;;  %v1013_v31 = vsub.f32 %v1005_v23, %v1011_v29  ;;  %6033 = vmatpush3.msra.mxu1 %v1105_v30 }
 0x6cb   :  { %6042 = vmatprep.subr.mxu1 %v6632_v6 }
 0x6cc   :  { %v1016_v32 = vmul.f32 1.442695, %v1013_v31 }
 0x6cd   :  { %v1029_v33 = vpop.permute.xlu1 %1028 }
 0x6ce   :  { %6404 = vpow2.f32 %v1016_v32  ;;  %6028 = vmatpush3.msra.mxu0 %v1029_v33 }
 0x6cf   :  { %6037 = vmatprep.subr.mxu0 %v6632_v6 }
 0x6d1   :  { %v1183_v40 = vpop.permute.xlu1 %1182 }
 0x6d5   :  { %v1261_v46 = vpop.permute.xlu1 %1260 }
 0x6d7   :  { %v6403_v34 = vpop.eup %6402 }
 0x6d8   :  { %v1018_v35 = vsel %vm188_vm2, %v6403_v34, 0.0 }
 0x6d9   :  { %1019 = vadd.xlane.f32.xlu0 %v1018_v35  ;;  %v1259_v49 = vpop.permute.xlu1 %1258 }
 0x6db   :  { %v6405_v36 = vpop.eup %6404 }
 0x6dc   :  { %v1021_v37 = vsel %vm188_vm2, %v6405_v36, 0.0 }
 0x6dd   :  { %1022 = vadd.xlane.f32.xlu0 %v1021_v37  ;;  %v1681_v37 = vld [vmem:[%s7505_s5 + $0x10] sm:$0xff] }
 0x6f3   :  { %1180 = vrot.lane.b32.xlu0 %v6759_v8, %s6643_s28 }
 0x762   :  { %v1020_v38 = vpop.xlane.xlu0 %1019 }
 0x763   :  { %6406 = vrcp.f32 %v1020_v38  ;;  %v1679_v38 = vld [vmem:[%s7505_s5] sm:$0xff] }
 0x766   :  { %v1023_v39 = vpop.xlane.xlu0 %1022 }
 0x767   :  { %6408 = vrcp.f32 %v1023_v39  ;;  %v1780_v39 = vld [vmem:[%s7507_s7 + $0x38] sm:$0xff] }
 0x76a   :  { %v1181_v48 = vpop.permute.xlu0 %1180 }
 0x770   :  { %v6407_v42 = vpop.eup %6406 }
 0x771   :  { %v1025_v44 = vmul.f32 %v6407_v42, %v6403_v34  ;;  %v1778_v42 = vld [vmem:[%s7507_s7 + $0x28] sm:$0xff] }
 0x773   :  { %6030 = vmatmul.mubr.msk.f32.vlgmr.msra.gmra.mxu0 %vm188_vm2, %v1025_v44  ;;  %v1777_v44 = vld [vmem:[%s7507_s7 + $0x20] sm:$0xff] }
 0x774   :  { %v6409_v45 = vpop.eup %6408  ;;  %6038 = vmatpush3.xpose.msk.msra.mxu0 %vm188_vm2, %v1183_v40  ;;  %6039 = vmatprep.mubr.msk.f32.mxu0 %vm6633_vm1, %v6632_v6  ;;  %v1779_v40 = vld [vmem:[%s7507_s7 + $0x30] sm:$0xff] }
 0x775   :  { %v1027_v47 = vmul.f32 %v6409_v45, %v6405_v36  ;;  %6047 = vmatprep.subr.mxu0 %v6632_v6 }
 0x777   :  { %6035 = vmatmul.mubr.msk.f32.vlgmr.msra.gmra.mxu1 %vm188_vm2, %v1027_v47  ;;  %6040 = vmatmul.mubr.msk.f32.vlgmr.msra.gmra.mxu0 %vm188_vm2, %v1181_v48 }
 0x778   :  { %6043 = vmatpush3.xpose.msk.msra.mxu1 %vm188_vm2, %v1261_v46  ;;  %6044 = vmatprep.mubr.msk.f32.mxu1 %vm6633_vm1, %v6632_v6 }
 0x779   :  { %6052 = vmatprep.subr.mxu1 %v6632_v6  ;;  %6049 = vmatprep.mubr.msk.f32.mxu0 %vm6633_vm1, %v6632_v6 }
 0x77b   :  { %6045 = vmatmul.mubr.msk.f32.vlgmr.msra.gmra.mxu1 %vm188_vm2, %v1259_v49 }
 0x77c   :  { %6054 = vmatprep.mubr.msk.f32.mxu1 %vm6633_vm1, %v6632_v6 }
 0x833   :  { %v1100_v50 = vpop.f32.mrf.mxu0 }
 0x835   :  { %v6031_v51 = vpop.f32.mrf.mxu0 }
 0x837   :  { %v1176_v52 = vpop.f32.mrf.mxu1  ;;  %v1254_v53 = vpop.f32.mrf.mxu0 }
 0x838   :  { %v1336_v54 = vmul.f32 0.35355338, %v1254_v53 }
 0x839   :  { %v6036_v55 = vpop.f32.mrf.mxu1  ;;  %v6041_v56 = vpop.f32.mrf.mxu0 }
 0x83a   :  { %v1338_v57 = vsel %vm188_vm2, %v1336_v54, -inf }
 0x83b   :  { %v1332_v58 = vpop.f32.mrf.mxu1  ;;  %1339 = vmax.xlane.f32.xlu0 %v1338_v57 }
 0x83c   :  { %v1337_v59 = vmul.f32 0.35355338, %v1332_v58 }
 0x83d   :  { %v6046_v60 = vpop.f32.mrf.mxu1 }
 0x83e   :  { %v1341_v61 = vsel %vm188_vm2, %v1337_v59, -inf }
 0x83f   :  { %1342 = vmax.xlane.f32.xlu1 %v1341_v61 }
 0x850   :  { %1360 = vrot.lane.b32.xlu1 %v6759_v8, %s6644_s29 }
 0x854   :  { %1514 = vrot.lane.b32.xlu1 %v6849_v14, %s6629_s15 }
 0x858   :  { %1516 = vrot.lane.b32.xlu1 %v6851_v16, %s6629_s15 }
 0x85c   :  { %1524 = vrot.lane.b32.xlu1 %v1176_v52, %s6625_s25 }
 0x8c4   :  { %v1340_v62 = vpop.xlane.xlu0 %1339 }
 0x8c5   :  { %v1344_v63 = vsub.f32 %v1336_v54, %v1340_v62 }
 0x8c7   :  { %v1346_v0 = vmul.f32 1.442695, %v1344_v63 }
 0x8c8   :  { %v1343_v1 = vpop.xlane.xlu1 %1342 }
 0x8c9   :  { %6410 = vpow2.f32 %v1346_v0  ;;  %v1345_v2 = vsub.f32 %v1337_v59, %v1343_v1 }
 0x8cb   :  { %v1348_v3 = vmul.f32 1.442695, %v1345_v2 }
 0x8cc   :  { %v1361_v4 = vpop.permute.xlu1 %1360 }
 0x8cd   :  { %6412 = vpow2.f32 %v1348_v3  ;;  %6048 = vmatpush3.msra.mxu0 %v1361_v4 }
 0x8d0   :  { %v1515_v25 = vpop.permute.xlu1 %1514 }
 0x8d1   :  { %v1536_v28 = vsel %vm188_vm2, %v6811_v41, %v1515_v25  ;;  %v1682_v41 = vld [vmem:[%s7505_s5 + $0x18] sm:$0xff]  ;;  %v1773_v25 = vld [vmem:[%s7507_s7] sm:$0xff] }
 0x8d4   :  { %v1517_v26 = vpop.permute.xlu1 %1516 }
 0x8d5   :  { %v1537_v33 = vsel %vm188_vm2, %v6813_v43, %v1517_v26  ;;  %v1680_v43 = vld [vmem:[%s7505_s5 + $0x8] sm:$0xff]  ;;  %v5656_v26 = vld [vmem:[#allocation5] ss:$0 sm:$0xff] }
 0x8d6   :  { %v6411_v5 = vpop.eup %6410 }
 0x8d7   :  { %v1350_v8 = vsel %vm188_vm2, %v6411_v5, 0.0 }
 0x8d8   :  { %1351 = vadd.xlane.f32.xlu0 %v1350_v8  ;;  %v1525_v29 = vpop.permute.xlu1 %1524 }
 0x8d9   :  { %v1540_v34 = vsel %vm1538_vm4, %v1537_v33, %v1525_v29  ;;  %v5667_v33 = vld [vmem:[%s7501_s1 + $0x38] sm:$0xff] }
 0x8da   :  { %v6413_v9 = vpop.eup %6412 }
 0x8db   :  { %v1353_v10 = vsel %vm188_vm2, %v6413_v9, 0.0 }
 0x8dc   :  { %1354 = vadd.xlane.f32.xlu0 %v1353_v10 }
 0x8f2   :  { %1436 = vrot.lane.b32.xlu0 %v6757_v7, %s6644_s29  ;;  %v1547_v7 = vld [vmem:[%s7502_s2 + $0x18] sm:$0xff] }
 0x8f3   :  { %6057 = vmatprep.subr.mxu0 %v1547_v7 }
 0x8f6   :  { %1522 = vrot.lane.b32.xlu0 %v1100_v50, %s6625_s25 }
 0x961   :  { %v1352_v11 = vpop.xlane.xlu0 %1351 }
 0x962   :  { %6414 = vrcp.f32 %v1352_v11 }
 0x965   :  { %v1355_v12 = vpop.xlane.xlu0 %1354 }
 0x966   :  { %6416 = vrcp.f32 %v1355_v12 }
 0x969   :  { %v1437_v13 = vpop.permute.xlu0 %1436 }
 0x96a   :  { %6053 = vmatpush3.msra.mxu1 %v1437_v13 }
 0x96b   :  { %6068 = vmatprep.subr.mxu1 %v1682_v41 }
 0x96d   :  { %v1523_v27 = vpop.permute.xlu0 %1522 }
 0x96e   :  { %v1539_v30 = vsel %vm1538_vm4, %v1536_v28, %v1523_v27 }
 0x96f   :  { %v6415_v14 = vpop.eup %6414 }
 0x970   :  { %v1357_v15 = vmul.f32 %v6415_v14, %v6411_v5 }
 0x972   :  { %6050 = vmatmul.mubr.msk.f32.vlgmr.msra.gmra.mxu0 %vm188_vm2, %v1357_v15  ;;  %v5654_v15 = vld [vmem:[%s7503_s3] ss:$0 sm:$0xff] }
 0x973   :  { %v6417_v16 = vpop.eup %6416  ;;  %6058 = vmatpush3.msra.mxu0 %v1547_v7  ;;  %v5655_v7 = vld [vmem:[%s7504_s4] ss:$0 sm:$0xff] }
 0x974   :  { %v1359_v17 = vmul.f32 %v6417_v16, %v6413_v9  ;;  %6059 = vmatprep.subr.mxu0 %v1546_v18 }
 0x975   :  { %6060 = vmatpush3.msra.mxu0 %v1546_v18 }
 0x976   :  { %6055 = vmatmul.mubr.msk.f32.vlgmr.msra.gmra.mxu1 %vm188_vm2, %v1359_v17  ;;  %6061 = vmatprep.subr.mxu0 %v1545_v19 }
 0x977   :  { %6062 = vmatpush3.msra.mxu0 %v1545_v19  ;;  %6069 = vmatpush3.msra.mxu1 %v1682_v41  ;;  %v5659_v41 = vld [vmem:[#allocation7] ss:$0 sm:$0xff] }
 0x978   :  { %6063 = vmatprep.subr.mxu0 %v1544_v20  ;;  %6070 = vmatprep.subr.mxu1 %v1681_v37 }
 0x979   :  { %6064 = vmatpush3.msra.mxu0 %v1544_v20  ;;  %6071 = vmatpush3.msra.mxu1 %v1681_v37 }
 0x97a   :  { %6072 = vmatprep.subr.mxu1 %v1680_v43  ;;  %6079 = vmatprep.subr.mxu0 %v1780_v39 }
 0x97b   :  { %6073 = vmatpush3.msra.mxu1 %v1680_v43 }
 0x97c   :  { %6074 = vmatprep.subr.mxu1 %v1679_v38 }
 0x97d   :  { %6075 = vmatpush3.msra.mxu1 %v1679_v38 }
 0x97e   :  { %6098 = vmatprep.subr.mxu1 %v5667_v33 }
 0xa32   :  { %v1432_v21 = vpop.f32.mrf.mxu0 }
 0xa33   :  { %1530 = vrot.lane.b32.xlu0 %v1432_v21, %s6645_s8 }
 0xa34   :  { %v6051_v22 = vpop.f32.mrf.mxu0 }
 0xa35   :  { %v1776_v22 = vld [vmem:[%s7507_s7 + $0x18] sm:$0xff] }
 0xa36   :  { %v1508_v23 = vpop.f32.mrf.mxu1 }
 0xa37   :  { %1532 = vrot.lane.b32.xlu1 %v1508_v23, %s6645_s8  ;;  %v1775_v23 = vld [vmem:[%s7507_s7 + $0x10] sm:$0xff] }
 0xa38   :  { %v6056_v24 = vpop.f32.mrf.mxu1 }
 0xa39   :  { %v1774_v24 = vld [vmem:[%s7507_s7 + $0x8] sm:$0xff] }
 0xaa5   :  { %v1531_v31 = vpop.permute.xlu0 %1530 }
 0xaa6   :  { %v1542_v32 = vsel %vm1541_vm3, %v1539_v30, %v1531_v31 }
 0xaa7   :  { %6065 = vmatprep.mubr.msk.f32.mxu0 %vm103_vm0, %v1542_v32 }
 0xaa9   :  { %v1533_v35 = vpop.permute.xlu1 %1532 }
 0xaaa   :  { %v1543_v36 = vsel %vm1541_vm3, %v1540_v34, %v1533_v35  ;;  %v5666_v34 = vld [vmem:[%s7501_s1 + $0x30] sm:$0xff]  ;;  %v5665_v35 = vld [vmem:[%s7501_s1 + $0x28] sm:$0xff] }
 0xaab   :  { %6066 = vmatmul.mubr.msk.f32.vlgmr.msra.gmra.mxu0 %vm103_vm0, %v1543_v36  ;;  %v5664_v36 = vld [vmem:[%s7501_s1 + $0x20] sm:$0xff] }
 0xaac   :  { %6080 = vmatpush3.msra.mxu0 %v1780_v39 }
 0xaad   :  { %6081 = vmatprep.subr.mxu0 %v1779_v40 }
 0xaae   :  { %6082 = vmatpush3.msra.mxu0 %v1779_v40 }
 0xaaf   :  { %6083 = vmatprep.subr.mxu0 %v1778_v42 }
 0xab0   :  { %6084 = vmatpush3.msra.mxu0 %v1778_v42 }
 0xab1   :  { %6085 = vmatprep.subr.mxu0 %v1777_v44 }
 0xab2   :  { %6086 = vmatpush3.msra.mxu0 %v1777_v44 }
 0xab3   :  { %6087 = vmatprep.subr.mxu0 %v1776_v22 }
 0xab4   :  { %6088 = vmatpush3.msra.mxu0 %v1776_v22 }
 0xab5   :  { %6089 = vmatprep.subr.mxu0 %v1775_v23 }
 0xab6   :  { %6090 = vmatpush3.msra.mxu0 %v1775_v23 }
 0xab7   :  { %6091 = vmatprep.subr.mxu0 %v1774_v24 }
 0xab8   :  { %6092 = vmatpush3.msra.mxu0 %v1774_v24 }
 0xab9   :  { %6093 = vmatprep.subr.mxu0 %v1773_v25 }
 0xaba   :  { %6094 = vmatpush3.msra.mxu0 %v1773_v25 }
 0xabb   :  { %6119 = vmatprep.subr.mxu0 %v6632_v6 }
 0xb6b   :  { %v6067_v45 = vpop.f32.mrf.mxu0 }
 0xb6c   :  { %v1630_v46 = vadd.f32 %v6067_v45, %v6067_v45 }
 0xb6d   :  { %v1620_v47 = vpop.f32.mrf.mxu0 }
 0xb6e   :  { %v1643_v48 = vmul.f32 %v1630_v46, %v1630_v46  ;;  %v1629_v49 = vadd.f32 %v1620_v47, %v1620_v47  ;;  %v1634_v50 = vsel %vm103_vm0, %v1630_v46, 0.0 }
 0xb70   :  { %v1633_v51 = vsel %vm103_vm0, %v1629_v49, 0.0  ;;  %v1642_v52 = vmul.f32 %v1629_v49, %v1629_v49  ;;  %v1645_v54 = vsel %vm103_vm0, %v1643_v48, 0.0 }
 0xb71   :  { %v1635_v53 = vadd.f32 %v1634_v50, %v1633_v51 }
 0xb72   :  { %v1644_v55 = vsel %vm103_vm0, %v1642_v52, 0.0 }
 0xb73   :  { %v1636_v56 = vrot.slane %v1635_v53, 4  ;;  %v1646_v57 = vadd.f32 %v1645_v54, %v1644_v55 }
 0xb75   :  { %v1637_v58 = vadd.f32 %v1636_v56, %v1635_v53  ;;  %v1647_v59 = vrot.slane %v1646_v57, 4 }
 0xb77   :  { %v1638_v60 = vrot.slane %v1637_v58, 2  ;;  %v1648_v61 = vadd.f32 %v1647_v59, %v1646_v57 }
 0xb79   :  { %v1639_v62 = vadd.f32 %v1638_v60, %v1637_v58  ;;  %v1649_v63 = vrot.slane %v1648_v61, 2 }
 0xb7b   :  { %v1640_v0 = vrot.slane %v1639_v62, 1  ;;  %v1650_v1 = vadd.f32 %v1649_v63, %v1648_v61 }
 0xb7d   :  { %v1641_v2 = vadd.f32 %v1640_v0, %v1639_v62  ;;  %v1651_v3 = vrot.slane %v1650_v1, 1 }
 0xb7f   :  { %v1652_v4 = vadd.f32 %v1651_v3, %v1650_v1  ;;  %v1653_v5 = vmul.f32 0.0625, %v1641_v2 }
 0xb81   :  { %v1654_v8 = vmul.f32 0.0625, %v1652_v4  ;;  %v1655_v9 = vmul.f32 %v1653_v5, %v1653_v5  ;;  %v1657_v12 = vsub.f32 %v1629_v49, %v1653_v5  ;;  %v1658_v13 = vsub.f32 %v1630_v46, %v1653_v5 }
 0xb83   :  { %v1656_v10 = vsub.f32 %v1654_v8, %v1655_v9 }
 0xb85   :  { %v1659_v11 = vadd.f32 1e-05, %v1656_v10 }
 0xb87   :  { %6418 = vrsqrt.f32 %v1659_v11 }
 0xb94   :  { %v6419_v14 = vpop.eup %6418 }
 0xb95   :  { %v1661_v16 = vmul.f32 %v6419_v14, %v1657_v12  ;;  %v1662_v17 = vmul.f32 %v6419_v14, %v1658_v13  ;;  %v5662_v12 = vld [vmem:[%s7509_s9] ss:$0 sm:$0xff] }
 0xb97   :  { %v1669_v18 = vmul.f32 %v5654_v15, %v1661_v16  ;;  %v1670_v19 = vmul.f32 %v5654_v15, %v1662_v17  ;;  %v5663_v15 = vld [vmem:[#allocation8] ss:$0 sm:$0xff] }
 0xb99   :  { %v1677_v20 = vadd.f32 %v5655_v7, %v1669_v18  ;;  %v1678_v21 = vadd.f32 %v5655_v7, %v1670_v19 }
 0xb9b   :  { %6076 = vmatprep.mubr.msk.f32.mxu1 %vm103_vm0, %v1677_v20 }
 0xb9c   :  { %6077 = vmatmul.mubr.msk.f32.vlgmr.msra.gmra.mxu1 %vm103_vm0, %v1678_v21 }
 0xb9d   :  { %6099 = vmatpush3.msra.mxu1 %v5667_v33 }
 0xb9e   :  { %6100 = vmatprep.subr.mxu1 %v5666_v34 }
 0xb9f   :  { %6101 = vmatpush3.msra.mxu1 %v5666_v34 }
 0xba0   :  { %6102 = vmatprep.subr.mxu1 %v5665_v35 }
 0xba1   :  { %6103 = vmatpush3.msra.mxu1 %v5665_v35 }
 0xba2   :  { %6104 = vmatprep.subr.mxu1 %v5664_v36 }
 0xba3   :  { %6105 = vmatpush3.msra.mxu1 %v5664_v36 }
 0xba4   :  { %6109 = vmatprep.subr.mxu1 %v6632_v6 }
 0xc5c   :  { %v6078_v27 = vpop.f32.mrf.mxu1 }
 0xc5d   :  { %v1768_v28 = vadd.f32 %v6078_v27, %v5656_v26 }
 0xc5e   :  { %v1762_v29 = vpop.f32.mrf.mxu1 }
 0xc5f   :  { %v1763_v30 = vadd.f32 %v5656_v26, %v1762_v29  ;;  %v1772_v32 = vmax.f32 %v1768_v28, 0.0 }
 0xc61   :  { %v1771_v31 = vmax.f32 %v1763_v30, 0.0 }
 0xc63   :  { %6095 = vmatprep.mubr.msk.f32.mxu0 %vm1788_vm5, %v1771_v31 }
 0xc64   :  { %6096 = vmatmul.mubr.msk.f32.vlgmr.msra.gmra.mxu0 %vm1788_vm5, %v1772_v32 }
 0xc65   :  { %6121 = vmatprep.mubr.msk.f32.mxu0 %vm6633_vm1, %v6632_v6 }
 0xd24   :  { %v6097_v37 = vpop.f32.mrf.mxu0 }
 0xd25   :  { %v1867_v43 = vadd.f32 %v6097_v37, %v5659_v41 }
 0xd26   :  { %v1861_v38 = vpop.f32.mrf.mxu0 }
 0xd27   :  { %v1871_v39 = vadd.f32 %v1867_v43, %v1678_v21  ;;  %v1862_v40 = vadd.f32 %v5659_v41, %v1861_v38 }
 0xd29   :  { %v1873_v42 = vadd.f32 %v1871_v39, %v1871_v39  ;;  %v1870_v44 = vadd.f32 %v1862_v40, %v1677_v20 }
 0xd2b   :  { %v1886_v45 = vmul.f32 %v1873_v42, %v1873_v42  ;;  %v1872_v46 = vadd.f32 %v1870_v44, %v1870_v44  ;;  %v1877_v47 = vsel %vm103_vm0, %v1873_v42, 0.0 }
 0xd2d   :  { %v1876_v48 = vsel %vm103_vm0, %v1872_v46, 0.0  ;;  %v1885_v49 = vmul.f32 %v1872_v46, %v1872_v46  ;;  %v1888_v51 = vsel %vm103_vm0, %v1886_v45, 0.0 }
 0xd2e   :  { %v1878_v50 = vadd.f32 %v1877_v47, %v1876_v48 }
 0xd2f   :  { %v1887_v52 = vsel %vm103_vm0, %v1885_v49, 0.0 }
 0xd30   :  { %v1879_v53 = vrot.slane %v1878_v50, 4  ;;  %v1889_v54 = vadd.f32 %v1888_v51, %v1887_v52 }
 0xd32   :  { %v1880_v55 = vadd.f32 %v1879_v53, %v1878_v50  ;;  %v1890_v56 = vrot.slane %v1889_v54, 4 }
 0xd34   :  { %v1881_v57 = vrot.slane %v1880_v55, 2  ;;  %v1891_v58 = vadd.f32 %v1890_v56, %v1889_v54 }
 0xd36   :  { %v1882_v59 = vadd.f32 %v1881_v57, %v1880_v55  ;;  %v1892_v60 = vrot.slane %v1891_v58, 2 }
 0xd38   :  { %v1883_v61 = vrot.slane %v1882_v59, 1  ;;  %v1893_v62 = vadd.f32 %v1892_v60, %v1891_v58 }
 0xd3a   :  { %v1884_v63 = vadd.f32 %v1883_v61, %v1882_v59  ;;  %v1894_v0 = vrot.slane %v1893_v62, 1 }
 0xd3c   :  { %v1895_v1 = vadd.f32 %v1894_v0, %v1893_v62  ;;  %v1896_v2 = vmul.f32 0.0625, %v1884_v63 }
 0xd3e   :  { %v1897_v3 = vmul.f32 0.0625, %v1895_v1  ;;  %v1898_v4 = vmul.f32 %v1896_v2, %v1896_v2  ;;  %v1900_v9 = vsub.f32 %v1872_v46, %v1896_v2  ;;  %v1901_v10 = vsub.f32 %v1873_v42, %v1896_v2 }
 0xd40   :  { %v1899_v5 = vsub.f32 %v1897_v3, %v1898_v4 }
 0xd42   :  { %v1902_v8 = vadd.f32 1e-05, %v1899_v5 }
 0xd44   :  { %6420 = vrsqrt.f32 %v1902_v8 }
 0xd51   :  { %v6421_v11 = vpop.eup %6420 }
 0xd52   :  { %v1904_v13 = vmul.f32 %v6421_v11, %v1900_v9  ;;  %v1905_v14 = vmul.f32 %v6421_v11, %v1901_v10 }
 0xd54   :  { %v1912_v16 = vmul.f32 %v5662_v12, %v1904_v13  ;;  %v1913_v17 = vmul.f32 %v5662_v12, %v1905_v14 }
 0xd56   :  { %v1920_v7 = vadd.f32 %v5663_v15, %v1912_v16  ;;  %v1921_v18 = vadd.f32 %v5663_v15, %v1913_v17 }
 0xd58   :  { %6106 = vmatprep.mubr.msk.f32.mxu1 %vm103_vm0, %v1920_v7 }
 0xd59   :  { %6107 = vmatmul.mubr.msk.f32.vlgmr.msra.gmra.mxu1 %vm103_vm0, %v1921_v18 }
 0xd5a   :  { %6111 = vmatprep.mubr.msk.f32.mxu1 %vm6633_vm1, %v6632_v6 }
 0xe19   :  { %v7004_v19 = vpop.f32.mrf.mxu1 }
 0xe1a   :  { %2086 = vrot.lane.b32.xlu1 %v7004_v19, %s6634_s18 }
 0xe1b   :  { %v7008_v20 = vpop.f32.mrf.mxu1 }
 0xe1c   :  { %2009 = vrot.lane.b32.xlu0 %v7008_v20, %s6634_s18 }
 0xe8c   :  { %v2087_v22 = vpop.permute.xlu1 %2086 }
 0xe8e   :  { %v2010_v21 = vpop.permute.xlu0 %2009 }
 0xe8f   :  { %6110 = vmatpush3.xpose.msk.msra.mxu1 %vm188_vm2, %v2010_v21 }
 0xe90   :  { %6114 = vmatprep.subr.mxu1 %v6632_v6 }
 0xe92   :  { %6112 = vmatmul.mubr.msk.f32.vlgmr.msra.gmra.mxu1 %vm188_vm2, %v7008_v20 }
 0xe93   :  { %6115 = vmatpush3.xpose.msk.msra.mxu1 %vm188_vm2, %v2087_v22  ;;  %6116 = vmatprep.mubr.msk.f32.mxu1 %vm6633_vm1, %v6632_v6 }
 0xe94   :  { %6124 = vmatprep.subr.mxu1 %v6632_v6 }
 0xe96   :  { %6117 = vmatmul.mubr.msk.f32.vlgmr.msra.gmra.mxu1 %vm188_vm2, %v7004_v19 }
 0xe97   :  { %6126 = vmatprep.mubr.msk.f32.mxu1 %vm6633_vm1, %v6632_v6 }
 0xf52   :  { %v2081_v23 = vpop.f32.mrf.mxu1 }
 0xf53   :  { %v2162_v24 = vmul.f32 0.35355338, %v2081_v23 }
 0xf54   :  { %v6113_v25 = vpop.f32.mrf.mxu1 }
 0xf55   :  { %v2164_v26 = vsel %vm188_vm2, %v2162_v24, -inf }
 0xf56   :  { %2165 = vmax.xlane.f32.xlu0 %v2164_v26  ;;  %v2158_v27 = vpop.f32.mrf.mxu1 }
 0xf57   :  { %v2163_v28 = vmul.f32 0.35355338, %v2158_v27 }
 0xf58   :  { %v6118_v29 = vpop.f32.mrf.mxu1 }
 0xf59   :  { %v2167_v30 = vsel %vm188_vm2, %v2163_v28, -inf }
 0xf5a   :  { %2168 = vmax.xlane.f32.xlu1 %v2167_v30 }
 0xf6b   :  { %2186 = vrot.lane.b32.xlu1 %v7008_v20, %s6635_s19 }
 0xf6c   :  { %2262 = vrot.lane.b32.xlu0 %v7004_v19, %s6635_s19 }
 0xf6f   :  { %2340 = vrot.lane.b32.xlu1 %v7008_v20, %s6636_s20 }
 0xf73   :  { %2418 = vrot.lane.b32.xlu1 %v7004_v19, %s6636_s20 }
 0xf77   :  { %2416 = vrot.lane.b32.xlu1 %v7004_v19, %s6637_s21 }
 0xfdf   :  { %v2166_v31 = vpop.xlane.xlu0 %2165 }
 0xfe0   :  { %v2170_v32 = vsub.f32 %v2162_v24, %v2166_v31 }
 0xfe2   :  { %v2172_v33 = vmul.f32 1.442695, %v2170_v32 }
 0xfe3   :  { %v2263_v34 = vpop.permute.xlu0 %2262  ;;  %v2169_v35 = vpop.xlane.xlu1 %2168 }
 0xfe4   :  { %6422 = vpow2.f32 %v2172_v33  ;;  %v2171_v36 = vsub.f32 %v2163_v28, %v2169_v35  ;;  %6125 = vmatpush3.msra.mxu1 %v2263_v34 }
 0xfe5   :  { %6134 = vmatprep.subr.mxu1 %v6632_v6 }
 0xfe6   :  { %v2174_v41 = vmul.f32 1.442695, %v2171_v36 }
 0xfe7   :  { %v2187_v37 = vpop.permute.xlu1 %2186 }
 0xfe8   :  { %6424 = vpow2.f32 %v2174_v41  ;;  %6120 = vmatpush3.msra.mxu0 %v2187_v37 }
 0xfe9   :  { %6129 = vmatprep.subr.mxu0 %v6632_v6 }
 0xfeb   :  { %v2341_v45 = vpop.permute.xlu1 %2340 }
 0xfef   :  { %v2419_v49 = vpop.permute.xlu1 %2418 }
 0xff1   :  { %v6423_v43 = vpop.eup %6422 }
 0xff2   :  { %v2176_v38 = vsel %vm188_vm2, %v6423_v43, 0.0 }
 0xff3   :  { %2177 = vadd.xlane.f32.xlu0 %v2176_v38  ;;  %v2417_v52 = vpop.permute.xlu1 %2416 }
 0xff5   :  { %v6425_v39 = vpop.eup %6424 }
 0xff6   :  { %v2179_v40 = vsel %vm188_vm2, %v6425_v39, 0.0 }
 0xff7   :  { %2180 = vadd.xlane.f32.xlu0 %v2179_v40 }
0x100d   :  { %2338 = vrot.lane.b32.xlu0 %v7008_v20, %s6637_s21 }
0x107c   :  { %v2178_v42 = vpop.xlane.xlu0 %2177 }
0x107d   :  { %6426 = vrcp.f32 %v2178_v42 }
0x1080   :  { %v2181_v44 = vpop.xlane.xlu0 %2180 }
0x1081   :  { %6428 = vrcp.f32 %v2181_v44 }
0x1084   :  { %v2339_v51 = vpop.permute.xlu0 %2338 }
0x108a   :  { %v6427_v46 = vpop.eup %6426 }
0x108b   :  { %v2183_v47 = vmul.f32 %v6427_v46, %v6423_v43 }
0x108d   :  { %6122 = vmatmul.mubr.msk.f32.vlgmr.msra.gmra.mxu0 %vm188_vm2, %v2183_v47 }
0x108e   :  { %v6429_v48 = vpop.eup %6428  ;;  %6130 = vmatpush3.xpose.msk.msra.mxu0 %vm188_vm2, %v2341_v45  ;;  %6131 = vmatprep.mubr.msk.f32.mxu0 %vm6633_vm1, %v6632_v6 }
0x108f   :  { %v2185_v50 = vmul.f32 %v6429_v48, %v6425_v39  ;;  %6139 = vmatprep.subr.mxu0 %v6632_v6 }
0x1091   :  { %6127 = vmatmul.mubr.msk.f32.vlgmr.msra.gmra.mxu1 %vm188_vm2, %v2185_v50  ;;  %6132 = vmatmul.mubr.msk.f32.vlgmr.msra.gmra.mxu0 %vm188_vm2, %v2339_v51 }
0x1092   :  { %6135 = vmatpush3.xpose.msk.msra.mxu1 %vm188_vm2, %v2419_v49  ;;  %6136 = vmatprep.mubr.msk.f32.mxu1 %vm6633_vm1, %v6632_v6 }
0x1093   :  { %6144 = vmatprep.subr.mxu1 %v6632_v6  ;;  %6141 = vmatprep.mubr.msk.f32.mxu0 %vm6633_vm1, %v6632_v6 }
0x1095   :  { %6137 = vmatmul.mubr.msk.f32.vlgmr.msra.gmra.mxu1 %vm188_vm2, %v2417_v52 }
0x1096   :  { %6146 = vmatprep.mubr.msk.f32.mxu1 %vm6633_vm1, %v6632_v6 }
0x114d   :  { %v7058_v53 = vpop.f32.mrf.mxu0 }
0x114f   :  { %v6123_v54 = vpop.f32.mrf.mxu0 }
0x1151   :  { %v7060_v55 = vpop.f32.mrf.mxu1  ;;  %v2412_v56 = vpop.f32.mrf.mxu0 }
0x1152   :  { %v2494_v57 = vmul.f32 0.35355338, %v2412_v56 }
0x1153   :  { %v6128_v58 = vpop.f32.mrf.mxu1  ;;  %v6133_v59 = vpop.f32.mrf.mxu0 }
0x1154   :  { %v2496_v60 = vsel %vm188_vm2, %v2494_v57, -inf }
0x1155   :  { %2497 = vmax.xlane.f32.xlu0 %v2496_v60  ;;  %v2490_v61 = vpop.f32.mrf.mxu1 }
0x1156   :  { %v2495_v62 = vmul.f32 0.35355338, %v2490_v61 }
0x1157   :  { %v6138_v63 = vpop.f32.mrf.mxu1 }
0x1158   :  { %v2499_v0 = vsel %vm188_vm2, %v2495_v62, -inf }
0x1159   :  { %2500 = vmax.xlane.f32.xlu1 %v2499_v0 }
0x116a   :  { %2518 = vrot.lane.b32.xlu1 %v7008_v20, %s6638_s22 }
0x116b   :  { %2594 = vrot.lane.b32.xlu0 %v7004_v19, %s6638_s22 }
0x116e   :  { %2672 = vrot.lane.b32.xlu1 %v7008_v20, %s6639_s23 }
0x1172   :  { %2750 = vrot.lane.b32.xlu1 %v7004_v19, %s6639_s23 }
0x1176   :  { %2748 = vrot.lane.b32.xlu1 %v7004_v19, %s6640_s24 }
0x11de   :  { %v2498_v1 = vpop.xlane.xlu0 %2497 }
0x11df   :  { %v2502_v2 = vsub.f32 %v2494_v57, %v2498_v1 }
0x11e1   :  { %v2504_v3 = vmul.f32 1.442695, %v2502_v2 }
0x11e2   :  { %v2595_v4 = vpop.permute.xlu0 %2594  ;;  %v2501_v5 = vpop.xlane.xlu1 %2500 }
0x11e3   :  { %6430 = vpow2.f32 %v2504_v3  ;;  %v2503_v8 = vsub.f32 %v2495_v62, %v2501_v5  ;;  %6145 = vmatpush3.msra.mxu1 %v2595_v4 }
0x11e4   :  { %6154 = vmatprep.subr.mxu1 %v6632_v6 }
0x11e5   :  { %v2506_v9 = vmul.f32 1.442695, %v2503_v8 }
0x11e6   :  { %v2519_v10 = vpop.permute.xlu1 %2518 }
0x11e7   :  { %6432 = vpow2.f32 %v2506_v9  ;;  %6140 = vmatpush3.msra.mxu0 %v2519_v10 }
0x11e8   :  { %6149 = vmatprep.subr.mxu0 %v6632_v6 }
0x11ea   :  { %v2673_v17 = vpop.permute.xlu1 %2672 }
0x11ee   :  { %v2751_v22 = vpop.permute.xlu1 %2750 }
0x11f0   :  { %v6431_v11 = vpop.eup %6430 }
0x11f1   :  { %v2508_v12 = vsel %vm188_vm2, %v6431_v11, 0.0 }
0x11f2   :  { %2509 = vadd.xlane.f32.xlu0 %v2508_v12  ;;  %v2749_v25 = vpop.permute.xlu1 %2748 }
0x11f4   :  { %v6433_v13 = vpop.eup %6432 }
0x11f5   :  { %v2511_v14 = vsel %vm188_vm2, %v6433_v13, 0.0 }
0x11f6   :  { %2512 = vadd.xlane.f32.xlu0 %v2511_v14 }
0x120c   :  { %2670 = vrot.lane.b32.xlu0 %v7008_v20, %s6640_s24 }
0x127b   :  { %v2510_v15 = vpop.xlane.xlu0 %2509 }
0x127c   :  { %6434 = vrcp.f32 %v2510_v15 }
0x127f   :  { %v2513_v16 = vpop.xlane.xlu0 %2512 }
0x1280   :  { %6436 = vrcp.f32 %v2513_v16 }
0x1283   :  { %v2671_v24 = vpop.permute.xlu0 %2670 }
0x1289   :  { %v6435_v7 = vpop.eup %6434 }
0x128a   :  { %v2515_v18 = vmul.f32 %v6435_v7, %v6431_v11 }
0x128c   :  { %6142 = vmatmul.mubr.msk.f32.vlgmr.msra.gmra.mxu0 %vm188_vm2, %v2515_v18 }
0x128d   :  { %v6437_v21 = vpop.eup %6436  ;;  %6150 = vmatpush3.xpose.msk.msra.mxu0 %vm188_vm2, %v2673_v17  ;;  %6151 = vmatprep.mubr.msk.f32.mxu0 %vm6633_vm1, %v6632_v6 }
0x128e   :  { %v2517_v23 = vmul.f32 %v6437_v21, %v6433_v13  ;;  %6159 = vmatprep.subr.mxu0 %v6632_v6 }
0x1290   :  { %6147 = vmatmul.mubr.msk.f32.vlgmr.msra.gmra.mxu1 %vm188_vm2, %v2517_v23  ;;  %6152 = vmatmul.mubr.msk.f32.vlgmr.msra.gmra.mxu0 %vm188_vm2, %v2671_v24 }
0x1291   :  { %6155 = vmatpush3.xpose.msk.msra.mxu1 %vm188_vm2, %v2751_v22  ;;  %6156 = vmatprep.mubr.msk.f32.mxu1 %vm6633_vm1, %v6632_v6 }
0x1292   :  { %6164 = vmatprep.subr.mxu1 %v6632_v6  ;;  %6161 = vmatprep.mubr.msk.f32.mxu0 %vm6633_vm1, %v6632_v6 }
0x1294   :  { %6157 = vmatmul.mubr.msk.f32.vlgmr.msra.gmra.mxu1 %vm188_vm2, %v2749_v25 }
0x1295   :  { %6166 = vmatprep.mubr.msk.f32.mxu1 %vm6633_vm1, %v6632_v6 }
0x134c   :  { %v7096_v26 = vpop.f32.mrf.mxu0 }
0x134e   :  { %v6143_v27 = vpop.f32.mrf.mxu0 }
0x1350   :  { %v7098_v28 = vpop.f32.mrf.mxu1  ;;  %v2744_v29 = vpop.f32.mrf.mxu0 }
0x1351   :  { %v2826_v30 = vmul.f32 0.35355338, %v2744_v29 }
0x1352   :  { %v6148_v31 = vpop.f32.mrf.mxu1  ;;  %v6153_v32 = vpop.f32.mrf.mxu0 }
0x1353   :  { %v2828_v33 = vsel %vm188_vm2, %v2826_v30, -inf  ;;  %v5695_v31 = vld [vmem:[%s7502_s2 + $0x28] sm:$0xff]  ;;  %v5694_v32 = vld [vmem:[%s7502_s2 + $0x20] sm:$0xff] }
0x1354   :  { %2829 = vmax.xlane.f32.xlu0 %v2828_v33  ;;  %v2822_v34 = vpop.f32.mrf.mxu1 }
0x1355   :  { %v2827_v35 = vmul.f32 0.35355338, %v2822_v34 }
0x1356   :  { %v6158_v36 = vpop.f32.mrf.mxu1 }
0x1357   :  { %v2831_v41 = vsel %vm188_vm2, %v2827_v35, -inf }
0x1358   :  { %2832 = vmax.xlane.f32.xlu1 %v2831_v41 }
0x1369   :  { %2850 = vrot.lane.b32.xlu1 %v7008_v20, %s6641_s0 }
0x136a   :  { %2926 = vrot.lane.b32.xlu0 %v7004_v19, %s6641_s0 }
0x136d   :  { %3004 = vrot.lane.b32.xlu1 %v7008_v20, %s6642_s27 }
0x1371   :  { %3082 = vrot.lane.b32.xlu1 %v7004_v19, %s6642_s27 }
0x1375   :  { %3080 = vrot.lane.b32.xlu1 %v7004_v19, %s6643_s28 }
0x13dd   :  { %v2830_v37 = vpop.xlane.xlu0 %2829 }
0x13de   :  { %v2834_v43 = vsub.f32 %v2826_v30, %v2830_v37  ;;  %v5696_v30 = vld [vmem:[%s7502_s2 + $0x30] sm:$0xff] }
0x13e0   :  { %v2836_v38 = vmul.f32 1.442695, %v2834_v43 }
0x13e1   :  { %v2927_v39 = vpop.permute.xlu0 %2926  ;;  %v2833_v40 = vpop.xlane.xlu1 %2832 }
0x13e2   :  { %6438 = vpow2.f32 %v2836_v38  ;;  %v2835_v42 = vsub.f32 %v2827_v35, %v2833_v40  ;;  %6165 = vmatpush3.msra.mxu1 %v2927_v39 }
0x13e3   :  { %6174 = vmatprep.subr.mxu1 %v6632_v6 }
0x13e4   :  { %v2838_v44 = vmul.f32 1.442695, %v2835_v42 }
0x13e5   :  { %v2851_v45 = vpop.permute.xlu1 %2850 }
0x13e6   :  { %6440 = vpow2.f32 %v2838_v44  ;;  %6160 = vmatpush3.msra.mxu0 %v2851_v45 }
0x13e7   :  { %6169 = vmatprep.subr.mxu0 %v6632_v6 }
0x13e9   :  { %v3005_v52 = vpop.permute.xlu1 %3004 }
0x13ed   :  { %v3083_v58 = vpop.permute.xlu1 %3082 }
0x13ef   :  { %v6439_v46 = vpop.eup %6438 }
0x13f0   :  { %v2840_v47 = vsel %vm188_vm2, %v6439_v46, 0.0 }
0x13f1   :  { %2841 = vadd.xlane.f32.xlu0 %v2840_v47  ;;  %v3081_v61 = vpop.permute.xlu1 %3080 }
0x13f3   :  { %v6441_v48 = vpop.eup %6440 }
0x13f4   :  { %v2843_v49 = vsel %vm188_vm2, %v6441_v48, 0.0 }
0x13f5   :  { %2844 = vadd.xlane.f32.xlu0 %v2843_v49  ;;  %v5706_v49 = vld [vmem:[%s7505_s5 + $0x30] sm:$0xff] }
0x140b   :  { %3002 = vrot.lane.b32.xlu0 %v7008_v20, %s6643_s28 }
0x147a   :  { %v2842_v50 = vpop.xlane.xlu0 %2841 }
0x147b   :  { %6442 = vrcp.f32 %v2842_v50  ;;  %v5704_v50 = vld [vmem:[%s7505_s5 + $0x20] sm:$0xff] }
0x147e   :  { %v2845_v51 = vpop.xlane.xlu0 %2844 }
0x147f   :  { %6444 = vrcp.f32 %v2845_v51  ;;  %v5718_v51 = vld [vmem:[%s7507_s7 + $0x78] sm:$0xff] }
0x1482   :  { %v3003_v60 = vpop.permute.xlu0 %3002 }
0x1488   :  { %v6443_v54 = vpop.eup %6442 }
0x1489   :  { %v2847_v56 = vmul.f32 %v6443_v54, %v6439_v46  ;;  %v5716_v54 = vld [vmem:[%s7507_s7 + $0x68] sm:$0xff] }
0x148b   :  { %6162 = vmatmul.mubr.msk.f32.vlgmr.msra.gmra.mxu0 %vm188_vm2, %v2847_v56  ;;  %v5715_v56 = vld [vmem:[%s7507_s7 + $0x60] sm:$0xff] }
0x148c   :  { %v6445_v57 = vpop.eup %6444  ;;  %6170 = vmatpush3.xpose.msk.msra.mxu0 %vm188_vm2, %v3005_v52  ;;  %6171 = vmatprep.mubr.msk.f32.mxu0 %vm6633_vm1, %v6632_v6  ;;  %v5717_v52 = vld [vmem:[%s7507_s7 + $0x70] sm:$0xff] }
0x148d   :  { %v2849_v59 = vmul.f32 %v6445_v57, %v6441_v48  ;;  %6179 = vmatprep.subr.mxu0 %v6632_v6 }
0x148f   :  { %6167 = vmatmul.mubr.msk.f32.vlgmr.msra.gmra.mxu1 %vm188_vm2, %v2849_v59  ;;  %6172 = vmatmul.mubr.msk.f32.vlgmr.msra.gmra.mxu0 %vm188_vm2, %v3003_v60 }
0x1490   :  { %6175 = vmatpush3.xpose.msk.msra.mxu1 %vm188_vm2, %v3083_v58  ;;  %6176 = vmatprep.mubr.msk.f32.mxu1 %vm6633_vm1, %v6632_v6 }
0x1491   :  { %6184 = vmatprep.subr.mxu1 %v6632_v6  ;;  %6181 = vmatprep.mubr.msk.f32.mxu0 %vm6633_vm1, %v6632_v6 }
0x1493   :  { %6177 = vmatmul.mubr.msk.f32.vlgmr.msra.gmra.mxu1 %vm188_vm2, %v3081_v61 }
0x1494   :  { %6186 = vmatprep.mubr.msk.f32.mxu1 %vm6633_vm1, %v6632_v6 }
0x154b   :  { %v2922_v62 = vpop.f32.mrf.mxu0 }
0x154d   :  { %v6163_v63 = vpop.f32.mrf.mxu0 }
0x154f   :  { %v2998_v0 = vpop.f32.mrf.mxu1  ;;  %v3076_v1 = vpop.f32.mrf.mxu0 }
0x1550   :  { %v3158_v2 = vmul.f32 0.35355338, %v3076_v1 }
0x1551   :  { %v6168_v3 = vpop.f32.mrf.mxu1  ;;  %v6173_v4 = vpop.f32.mrf.mxu0 }
0x1552   :  { %v3160_v5 = vsel %vm188_vm2, %v3158_v2, -inf }
0x1553   :  { %3161 = vmax.xlane.f32.xlu0 %v3160_v5  ;;  %v3154_v8 = vpop.f32.mrf.mxu1 }
0x1554   :  { %v3159_v9 = vmul.f32 0.35355338, %v3154_v8 }
0x1555   :  { %v6178_v10 = vpop.f32.mrf.mxu1 }
0x1556   :  { %v3163_v11 = vsel %vm188_vm2, %v3159_v9, -inf }
0x1557   :  { %3164 = vmax.xlane.f32.xlu1 %v3163_v11 }
0x1568   :  { %3182 = vrot.lane.b32.xlu1 %v7008_v20, %s6644_s29 }
0x156c   :  { %3336 = vrot.lane.b32.xlu1 %v7096_v26, %s6629_s15 }
0x1570   :  { %3338 = vrot.lane.b32.xlu1 %v7098_v28, %s6629_s15 }
0x1574   :  { %3346 = vrot.lane.b32.xlu1 %v2998_v0, %s6625_s25 }
0x15dc   :  { %v3162_v12 = vpop.xlane.xlu0 %3161 }
0x15dd   :  { %v3166_v13 = vsub.f32 %v3158_v2, %v3162_v12 }
0x15df   :  { %v3168_v14 = vmul.f32 1.442695, %v3166_v13 }
0x15e0   :  { %v3165_v15 = vpop.xlane.xlu1 %3164 }
0x15e1   :  { %6446 = vpow2.f32 %v3168_v14  ;;  %v3167_v16 = vsub.f32 %v3159_v9, %v3165_v15 }
0x15e3   :  { %v3170_v17 = vmul.f32 1.442695, %v3167_v16 }
0x15e4   :  { %v3183_v7 = vpop.permute.xlu1 %3182 }
0x15e5   :  { %6448 = vpow2.f32 %v3170_v17  ;;  %6180 = vmatpush3.msra.mxu0 %v3183_v7 }
0x15e8   :  { %v3337_v41 = vpop.permute.xlu1 %3336 }
0x15e9   :  { %v3358_v38 = vsel %vm188_vm2, %v7058_v53, %v3337_v41  ;;  %v5707_v53 = vld [vmem:[%s7505_s5 + $0x38] sm:$0xff]  ;;  %v5711_v41 = vld [vmem:[%s7507_s7 + $0x40] sm:$0xff] }
0x15ec   :  { %v3339_v37 = vpop.permute.xlu1 %3338 }
0x15ed   :  { %v3359_v45 = vsel %vm188_vm2, %v7060_v55, %v3339_v37  ;;  %v5705_v55 = vld [vmem:[%s7505_s5 + $0x28] sm:$0xff]  ;;  %v5708_v37 = vld [vmem:[#allocation5 + $0x1] ss:$0 sm:$0xff] }
0x15ee   :  { %v6447_v18 = vpop.eup %6446 }
0x15ef   :  { %v3172_v20 = vsel %vm188_vm2, %v6447_v18, 0.0 }
0x15f0   :  { %3173 = vadd.xlane.f32.xlu0 %v3172_v20  ;;  %v3347_v39 = vpop.permute.xlu1 %3346 }
0x15f1   :  { %v3361_v46 = vsel %vm1538_vm4, %v3359_v45, %v3347_v39  ;;  %v5728_v45 = vld [vmem:[%s7501_s1 + $0x58] sm:$0xff] }
0x15f2   :  { %v6449_v21 = vpop.eup %6448 }
0x15f3   :  { %v3175_v22 = vsel %vm188_vm2, %v6449_v21, 0.0 }
0x15f4   :  { %3176 = vadd.xlane.f32.xlu0 %v3175_v22 }
0x160a   :  { %3258 = vrot.lane.b32.xlu0 %v7004_v19, %s6644_s29  ;;  %v5697_v19 = vld [vmem:[%s7502_s2 + $0x38] sm:$0xff] }
0x160b   :  { %6189 = vmatprep.subr.mxu0 %v5697_v19 }
0x160e   :  { %3344 = vrot.lane.b32.xlu0 %v2922_v62, %s6625_s25 }
0x1679   :  { %v3174_v23 = vpop.xlane.xlu0 %3173 }
0x167a   :  { %6450 = vrcp.f32 %v3174_v23 }
0x167d   :  { %v3177_v24 = vpop.xlane.xlu0 %3176 }
0x167e   :  { %6452 = vrcp.f32 %v3177_v24 }
0x1681   :  { %v3259_v25 = vpop.permute.xlu0 %3258 }
0x1682   :  { %6185 = vmatpush3.msra.mxu1 %v3259_v25 }
0x1683   :  { %6200 = vmatprep.subr.mxu1 %v5707_v53 }
0x1685   :  { %v3345_v43 = vpop.permute.xlu0 %3344 }
0x1686   :  { %v3360_v40 = vsel %vm1538_vm4, %v3358_v38, %v3345_v43 }
0x1687   :  { %v6451_v26 = vpop.eup %6450 }
0x1688   :  { %v3179_v27 = vmul.f32 %v6451_v26, %v6447_v18 }
0x168a   :  { %6182 = vmatmul.mubr.msk.f32.vlgmr.msra.gmra.mxu0 %vm188_vm2, %v3179_v27  ;;  %v5702_v27 = vld [vmem:[%s7503_s3 + $0x1] ss:$0 sm:$0xff] }
0x168b   :  { %v6453_v28 = vpop.eup %6452  ;;  %6190 = vmatpush3.msra.mxu0 %v5697_v19  ;;  %v5703_v19 = vld [vmem:[%s7504_s4 + $0x1] ss:$0 sm:$0xff] }
0x168c   :  { %v3181_v29 = vmul.f32 %v6453_v28, %v6449_v21  ;;  %6191 = vmatprep.subr.mxu0 %v5696_v30 }
0x168d   :  { %6192 = vmatpush3.msra.mxu0 %v5696_v30 }
0x168e   :  { %6187 = vmatmul.mubr.msk.f32.vlgmr.msra.gmra.mxu1 %vm188_vm2, %v3181_v29  ;;  %6193 = vmatprep.subr.mxu0 %v5695_v31 }
0x168f   :  { %6194 = vmatpush3.msra.mxu0 %v5695_v31  ;;  %6201 = vmatpush3.msra.mxu1 %v5707_v53  ;;  %v5719_v53 = vld [vmem:[#allocation7 + $0x1] ss:$0 sm:$0xff] }
0x1690   :  { %6195 = vmatprep.subr.mxu0 %v5694_v32  ;;  %6202 = vmatprep.subr.mxu1 %v5706_v49 }
0x1691   :  { %6196 = vmatpush3.msra.mxu0 %v5694_v32  ;;  %6203 = vmatpush3.msra.mxu1 %v5706_v49 }
0x1692   :  { %6204 = vmatprep.subr.mxu1 %v5705_v55  ;;  %6211 = vmatprep.subr.mxu0 %v5718_v51 }
0x1693   :  { %6205 = vmatpush3.msra.mxu1 %v5705_v55 }
0x1694   :  { %6206 = vmatprep.subr.mxu1 %v5704_v50 }
0x1695   :  { %6207 = vmatpush3.msra.mxu1 %v5704_v50 }
0x1696   :  { %6230 = vmatprep.subr.mxu1 %v5728_v45 }
0x174a   :  { %v3254_v33 = vpop.f32.mrf.mxu0 }
0x174b   :  { %3352 = vrot.lane.b32.xlu0 %v3254_v33, %s6645_s8 }
0x174c   :  { %v6183_v34 = vpop.f32.mrf.mxu0 }
0x174d   :  { %v5714_v34 = vld [vmem:[%s7507_s7 + $0x58] sm:$0xff] }
0x174e   :  { %v3330_v35 = vpop.f32.mrf.mxu1 }
0x174f   :  { %3354 = vrot.lane.b32.xlu1 %v3330_v35, %s6645_s8  ;;  %v5713_v35 = vld [vmem:[%s7507_s7 + $0x50] sm:$0xff] }
0x1750   :  { %v6188_v36 = vpop.f32.mrf.mxu1 }
0x1751   :  { %v5712_v36 = vld [vmem:[%s7507_s7 + $0x48] sm:$0xff] }
0x17bd   :  { %v3353_v42 = vpop.permute.xlu0 %3352 }
0x17be   :  { %v3362_v44 = vsel %vm1541_vm3, %v3360_v40, %v3353_v42 }
0x17bf   :  { %6197 = vmatprep.mubr.msk.f32.mxu0 %vm103_vm0, %v3362_v44 }
0x17c1   :  { %v3355_v47 = vpop.permute.xlu1 %3354 }
0x17c2   :  { %v3363_v48 = vsel %vm1541_vm3, %v3361_v46, %v3355_v47  ;;  %v5727_v46 = vld [vmem:[%s7501_s1 + $0x50] sm:$0xff]  ;;  %v5726_v47 = vld [vmem:[%s7501_s1 + $0x48] sm:$0xff] }
0x17c3   :  { %6198 = vmatmul.mubr.msk.f32.vlgmr.msra.gmra.mxu0 %vm103_vm0, %v3363_v48  ;;  %v5725_v48 = vld [vmem:[%s7501_s1 + $0x40] sm:$0xff] }
0x17c4   :  { %6212 = vmatpush3.msra.mxu0 %v5718_v51 }
0x17c5   :  { %6213 = vmatprep.subr.mxu0 %v5717_v52 }
0x17c6   :  { %6214 = vmatpush3.msra.mxu0 %v5717_v52 }
0x17c7   :  { %6215 = vmatprep.subr.mxu0 %v5716_v54 }
0x17c8   :  { %6216 = vmatpush3.msra.mxu0 %v5716_v54 }
0x17c9   :  { %6217 = vmatprep.subr.mxu0 %v5715_v56 }
0x17ca   :  { %6218 = vmatpush3.msra.mxu0 %v5715_v56 }
0x17cb   :  { %6219 = vmatprep.subr.mxu0 %v5714_v34 }
0x17cc   :  { %6220 = vmatpush3.msra.mxu0 %v5714_v34 }
0x17cd   :  { %6221 = vmatprep.subr.mxu0 %v5713_v35 }
0x17ce   :  { %6222 = vmatpush3.msra.mxu0 %v5713_v35 }
0x17cf   :  { %6223 = vmatprep.subr.mxu0 %v5712_v36 }
0x17d0   :  { %6224 = vmatpush3.msra.mxu0 %v5712_v36 }
0x17d1   :  { %6225 = vmatprep.subr.mxu0 %v5711_v41 }
0x17d2   :  { %6226 = vmatpush3.msra.mxu0 %v5711_v41 }
0x17d3   :  { %6251 = vmatprep.subr.mxu0 %v6632_v6 }
0x1883   :  { %v6199_v57 = vpop.f32.mrf.mxu0 }
0x1884   :  { %v3451_v58 = vadd.f32 %v6199_v57, %v6199_v57 }
0x1885   :  { %v3441_v59 = vpop.f32.mrf.mxu0 }
0x1886   :  { %v3466_v60 = vmul.f32 %v3451_v58, %v3451_v58  ;;  %v3450_v61 = vadd.f32 %v3441_v59, %v3441_v59  ;;  %v3457_v62 = vsel %vm103_vm0, %v3451_v58, 0.0 }
0x1888   :  { %v3456_v63 = vsel %vm103_vm0, %v3450_v61, 0.0  ;;  %v3465_v0 = vmul.f32 %v3450_v61, %v3450_v61  ;;  %v3468_v2 = vsel %vm103_vm0, %v3466_v60, 0.0 }
0x1889   :  { %v3458_v1 = vadd.f32 %v3457_v62, %v3456_v63 }
0x188a   :  { %v3467_v3 = vsel %vm103_vm0, %v3465_v0, 0.0 }
0x188b   :  { %v3459_v4 = vrot.slane %v3458_v1, 4  ;;  %v3469_v5 = vadd.f32 %v3468_v2, %v3467_v3 }
0x188d   :  { %v3460_v8 = vadd.f32 %v3459_v4, %v3458_v1  ;;  %v3470_v9 = vrot.slane %v3469_v5, 4 }
0x188f   :  { %v3461_v10 = vrot.slane %v3460_v8, 2  ;;  %v3471_v11 = vadd.f32 %v3470_v9, %v3469_v5 }
0x1891   :  { %v3462_v12 = vadd.f32 %v3461_v10, %v3460_v8  ;;  %v3472_v13 = vrot.slane %v3471_v11, 2 }
0x1893   :  { %v3463_v14 = vrot.slane %v3462_v12, 1  ;;  %v3473_v15 = vadd.f32 %v3472_v13, %v3471_v11 }
0x1895   :  { %v3464_v16 = vadd.f32 %v3463_v14, %v3462_v12  ;;  %v3474_v17 = vrot.slane %v3473_v15, 1 }
0x1897   :  { %v3475_v7 = vadd.f32 %v3474_v17, %v3473_v15  ;;  %v3476_v18 = vmul.f32 0.0625, %v3464_v16 }
0x1899   :  { %v3477_v20 = vmul.f32 0.0625, %v3475_v7  ;;  %v3478_v21 = vmul.f32 %v3476_v18, %v3476_v18  ;;  %v3480_v24 = vsub.f32 %v3450_v61, %v3476_v18  ;;  %v3481_v25 = vsub.f32 %v3451_v58, %v3476_v18 }
0x189b   :  { %v3479_v22 = vsub.f32 %v3477_v20, %v3478_v21 }
0x189d   :  { %v3482_v23 = vadd.f32 1e-05, %v3479_v22 }
0x189f   :  { %6454 = vrsqrt.f32 %v3482_v23 }
0x18ac   :  { %v6455_v26 = vpop.eup %6454 }
0x18ad   :  { %v3484_v28 = vmul.f32 %v6455_v26, %v3480_v24  ;;  %v3485_v29 = vmul.f32 %v6455_v26, %v3481_v25  ;;  %v5723_v24 = vld [vmem:[%s7509_s9 + $0x1] ss:$0 sm:$0xff] }
0x18af   :  { %v3492_v30 = vmul.f32 %v5702_v27, %v3484_v28  ;;  %v3493_v31 = vmul.f32 %v5702_v27, %v3485_v29  ;;  %v5724_v27 = vld [vmem:[#allocation8 + $0x1] ss:$0 sm:$0xff] }
0x18b1   :  { %v3500_v32 = vadd.f32 %v5703_v19, %v3492_v30  ;;  %v3501_v33 = vadd.f32 %v5703_v19, %v3493_v31 }
0x18b3   :  { %6208 = vmatprep.mubr.msk.f32.mxu1 %vm103_vm0, %v3500_v32 }
0x18b4   :  { %6209 = vmatmul.mubr.msk.f32.vlgmr.msra.gmra.mxu1 %vm103_vm0, %v3501_v33 }
0x18b5   :  { %6231 = vmatpush3.msra.mxu1 %v5728_v45 }
0x18b6   :  { %6232 = vmatprep.subr.mxu1 %v5727_v46 }
0x18b7   :  { %6233 = vmatpush3.msra.mxu1 %v5727_v46 }
0x18b8   :  { %6234 = vmatprep.subr.mxu1 %v5726_v47 }
0x18b9   :  { %6235 = vmatpush3.msra.mxu1 %v5726_v47 }
0x18ba   :  { %6236 = vmatprep.subr.mxu1 %v5725_v48 }
0x18bb   :  { %6237 = vmatpush3.msra.mxu1 %v5725_v48 }
0x18bc   :  { %6241 = vmatprep.subr.mxu1 %v6632_v6 }
0x1974   :  { %v6210_v43 = vpop.f32.mrf.mxu1 }
0x1975   :  { %v3593_v38 = vadd.f32 %v6210_v43, %v5708_v37 }
0x1976   :  { %v3587_v39 = vpop.f32.mrf.mxu1 }
0x1977   :  { %v3588_v40 = vadd.f32 %v5708_v37, %v3587_v39  ;;  %v3597_v44 = vmax.f32 %v3593_v38, 0.0 }
0x1979   :  { %v3596_v42 = vmax.f32 %v3588_v40, 0.0 }
0x197b   :  { %6227 = vmatprep.mubr.msk.f32.mxu0 %vm1788_vm5, %v3596_v42 }
0x197c   :  { %6228 = vmatmul.mubr.msk.f32.vlgmr.msra.gmra.mxu0 %vm1788_vm5, %v3597_v44 }
0x197d   :  { %6253 = vmatprep.mubr.msk.f32.mxu0 %vm6633_vm1, %v6632_v6 }
0x1a3c   :  { %v6229_v49 = vpop.f32.mrf.mxu0 }
0x1a3d   :  { %v3693_v55 = vadd.f32 %v6229_v49, %v5719_v53 }
0x1a3e   :  { %v3687_v50 = vpop.f32.mrf.mxu0 }
0x1a3f   :  { %v3697_v51 = vadd.f32 %v3693_v55, %v3501_v33  ;;  %v3688_v52 = vadd.f32 %v5719_v53, %v3687_v50 }
0x1a41   :  { %v3699_v54 = vadd.f32 %v3697_v51, %v3697_v51  ;;  %v3696_v56 = vadd.f32 %v3688_v52, %v3500_v32 }
0x1a43   :  { %v3714_v57 = vmul.f32 %v3699_v54, %v3699_v54  ;;  %v3698_v58 = vadd.f32 %v3696_v56, %v3696_v56  ;;  %v3705_v59 = vsel %vm103_vm0, %v3699_v54, 0.0 }
0x1a45   :  { %v3704_v60 = vsel %vm103_vm0, %v3698_v58, 0.0  ;;  %v3713_v61 = vmul.f32 %v3698_v58, %v3698_v58  ;;  %v3716_v63 = vsel %vm103_vm0, %v3714_v57, 0.0 }
0x1a46   :  { %v3706_v62 = vadd.f32 %v3705_v59, %v3704_v60 }
0x1a47   :  { %v3715_v0 = vsel %vm103_vm0, %v3713_v61, 0.0 }
0x1a48   :  { %v3707_v1 = vrot.slane %v3706_v62, 4  ;;  %v3717_v2 = vadd.f32 %v3716_v63, %v3715_v0 }
0x1a4a   :  { %v3708_v3 = vadd.f32 %v3707_v1, %v3706_v62  ;;  %v3718_v4 = vrot.slane %v3717_v2, 4 }
0x1a4c   :  { %v3709_v5 = vrot.slane %v3708_v3, 2  ;;  %v3719_v8 = vadd.f32 %v3718_v4, %v3717_v2 }
0x1a4e   :  { %v3710_v9 = vadd.f32 %v3709_v5, %v3708_v3  ;;  %v3720_v10 = vrot.slane %v3719_v8, 2 }
0x1a50   :  { %v3711_v11 = vrot.slane %v3710_v9, 1  ;;  %v3721_v12 = vadd.f32 %v3720_v10, %v3719_v8 }
0x1a52   :  { %v3712_v13 = vadd.f32 %v3711_v11, %v3710_v9  ;;  %v3722_v14 = vrot.slane %v3721_v12, 1 }
0x1a54   :  { %v3723_v15 = vadd.f32 %v3722_v14, %v3721_v12  ;;  %v3724_v16 = vmul.f32 0.0625, %v3712_v13 }
0x1a56   :  { %v3725_v17 = vmul.f32 0.0625, %v3723_v15  ;;  %v3726_v7 = vmul.f32 %v3724_v16, %v3724_v16  ;;  %v3728_v21 = vsub.f32 %v3698_v58, %v3724_v16  ;;  %v3729_v22 = vsub.f32 %v3699_v54, %v3724_v16 }
0x1a58   :  { %v3727_v18 = vsub.f32 %v3725_v17, %v3726_v7 }
0x1a5a   :  { %v3730_v20 = vadd.f32 1e-05, %v3727_v18 }
0x1a5c   :  { %6456 = vrsqrt.f32 %v3730_v20 }
0x1a69   :  { %v6457_v23 = vpop.eup %6456 }
0x1a6a   :  { %v3732_v25 = vmul.f32 %v6457_v23, %v3728_v21  ;;  %v3733_v26 = vmul.f32 %v6457_v23, %v3729_v22 }
0x1a6c   :  { %v3740_v28 = vmul.f32 %v5723_v24, %v3732_v25  ;;  %v3741_v29 = vmul.f32 %v5723_v24, %v3733_v26 }
0x1a6e   :  { %v3748_v19 = vadd.f32 %v5724_v27, %v3740_v28  ;;  %v3749_v30 = vadd.f32 %v5724_v27, %v3741_v29 }
0x1a70   :  { %6238 = vmatprep.mubr.msk.f32.mxu1 %vm103_vm0, %v3748_v19 }
0x1a71   :  { %6239 = vmatmul.mubr.msk.f32.vlgmr.msra.gmra.mxu1 %vm103_vm0, %v3749_v30 }
0x1a72   :  { %6243 = vmatprep.mubr.msk.f32.mxu1 %vm6633_vm1, %v6632_v6 }
0x1b31   :  { %v7251_v31 = vpop.f32.mrf.mxu1 }
0x1b32   :  { %3914 = vrot.lane.b32.xlu1 %v7251_v31, %s6634_s18 }
0x1b33   :  { %v7255_v32 = vpop.f32.mrf.mxu1 }
0x1b34   :  { %3837 = vrot.lane.b32.xlu0 %v7255_v32, %s6634_s18 }
0x1ba4   :  { %v3915_v34 = vpop.permute.xlu1 %3914 }
0x1ba6   :  { %v3838_v33 = vpop.permute.xlu0 %3837 }
0x1ba7   :  { %6242 = vmatpush3.xpose.msk.msra.mxu1 %vm188_vm2, %v3838_v33 }
0x1ba8   :  { %6246 = vmatprep.subr.mxu1 %v6632_v6 }
0x1baa   :  { %6244 = vmatmul.mubr.msk.f32.vlgmr.msra.gmra.mxu1 %vm188_vm2, %v7255_v32 }
0x1bab   :  { %6247 = vmatpush3.xpose.msk.msra.mxu1 %vm188_vm2, %v3915_v34  ;;  %6248 = vmatprep.mubr.msk.f32.mxu1 %vm6633_vm1, %v6632_v6 }
0x1bac   :  { %6256 = vmatprep.subr.mxu1 %v6632_v6 }
0x1bae   :  { %6249 = vmatmul.mubr.msk.f32.vlgmr.msra.gmra.mxu1 %vm188_vm2, %v7251_v31 }
0x1baf   :  { %6258 = vmatprep.mubr.msk.f32.mxu1 %vm6633_vm1, %v6632_v6 }
0x1c6a   :  { %v3909_v35 = vpop.f32.mrf.mxu1 }
0x1c6b   :  { %v3990_v36 = vmul.f32 0.35355338, %v3909_v35 }
0x1c6c   :  { %v6245_v41 = vpop.f32.mrf.mxu1 }
0x1c6d   :  { %v3992_v37 = vsel %vm188_vm2, %v3990_v36, -inf }
0x1c6e   :  { %3993 = vmax.xlane.f32.xlu0 %v3992_v37  ;;  %v3986_v43 = vpop.f32.mrf.mxu1 }
0x1c6f   :  { %v3991_v38 = vmul.f32 0.35355338, %v3986_v43 }
0x1c70   :  { %v6250_v39 = vpop.f32.mrf.mxu1 }
0x1c71   :  { %v3995_v40 = vsel %vm188_vm2, %v3991_v38, -inf }
0x1c72   :  { %3996 = vmax.xlane.f32.xlu1 %v3995_v40 }
0x1c83   :  { %4016 = vrot.lane.b32.xlu1 %v7255_v32, %s6635_s19 }
0x1c84   :  { %4092 = vrot.lane.b32.xlu0 %v7251_v31, %s6635_s19 }
0x1c87   :  { %4170 = vrot.lane.b32.xlu1 %v7255_v32, %s6636_s20 }
0x1c8b   :  { %4248 = vrot.lane.b32.xlu1 %v7251_v31, %s6636_s20 }
0x1c8f   :  { %4246 = vrot.lane.b32.xlu1 %v7251_v31, %s6637_s21 }
0x1cf7   :  { %v3994_v42 = vpop.xlane.xlu0 %3993 }
0x1cf8   :  { %v3998_v44 = vsub.f32 %v3990_v36, %v3994_v42 }
0x1cfa   :  { %v4000_v45 = vmul.f32 1.442695, %v3998_v44 }
0x1cfb   :  { %v4093_v46 = vpop.permute.xlu0 %4092  ;;  %v3997_v47 = vpop.xlane.xlu1 %3996 }
0x1cfc   :  { %6458 = vpow2.f32 %v4000_v45  ;;  %v3999_v48 = vsub.f32 %v3991_v38, %v3997_v47  ;;  %6257 = vmatpush3.msra.mxu1 %v4093_v46 }
0x1cfd   :  { %6266 = vmatprep.subr.mxu1 %v6632_v6 }
0x1cfe   :  { %v4002_v53 = vmul.f32 1.442695, %v3999_v48 }
0x1cff   :  { %v4017_v49 = vpop.permute.xlu1 %4016 }
0x1d00   :  { %6460 = vpow2.f32 %v4002_v53  ;;  %6252 = vmatpush3.msra.mxu0 %v4017_v49 }
0x1d01   :  { %6261 = vmatprep.subr.mxu0 %v6632_v6 }
0x1d03   :  { %v4171_v57 = vpop.permute.xlu1 %4170 }
0x1d07   :  { %v4249_v61 = vpop.permute.xlu1 %4248 }
0x1d09   :  { %v6459_v55 = vpop.eup %6458 }
0x1d0a   :  { %v4004_v50 = vsel %vm188_vm2, %v6459_v55, 0.0 }
0x1d0b   :  { %4005 = vadd.xlane.f32.xlu0 %v4004_v50  ;;  %v4247_v0 = vpop.permute.xlu1 %4246 }
0x1d0d   :  { %v6461_v51 = vpop.eup %6460 }
0x1d0e   :  { %v4007_v52 = vsel %vm188_vm2, %v6461_v51, 0.0 }
0x1d0f   :  { %4008 = vadd.xlane.f32.xlu0 %v4007_v52 }
0x1d25   :  { %4168 = vrot.lane.b32.xlu0 %v7255_v32, %s6637_s21 }
0x1d94   :  { %v4006_v54 = vpop.xlane.xlu0 %4005 }
0x1d95   :  { %6462 = vrcp.f32 %v4006_v54 }
0x1d98   :  { %v4009_v56 = vpop.xlane.xlu0 %4008 }
0x1d99   :  { %6464 = vrcp.f32 %v4009_v56 }
0x1d9c   :  { %v4169_v63 = vpop.permute.xlu0 %4168 }
0x1da2   :  { %v6463_v58 = vpop.eup %6462 }
0x1da3   :  { %v4011_v59 = vmul.f32 %v6463_v58, %v6459_v55 }
0x1da5   :  { %4014 = vst.msk [vmem:[#allocation11] sm:$0xff] %vm188_vm2, %v4011_v59  ;;  %6254 = vmatmul.mubr.msk.f32.vlgmr.msra.gmra.mxu0 %vm188_vm2, %v4011_v59 }
0x1da6   :  { %v6465_v60 = vpop.eup %6464  ;;  %6262 = vmatpush3.xpose.msk.msra.mxu0 %vm188_vm2, %v4171_v57  ;;  %6263 = vmatprep.mubr.msk.f32.mxu0 %vm6633_vm1, %v6632_v6 }
0x1da7   :  { %v4013_v62 = vmul.f32 %v6465_v60, %v6461_v51  ;;  %6271 = vmatprep.subr.mxu0 %v6632_v6 }
0x1da9   :  { %4015 = vst.msk [vmem:[#allocation11 + $0x8] sm:$0xff] %vm188_vm2, %v4013_v62  ;;  %6259 = vmatmul.mubr.msk.f32.vlgmr.msra.gmra.mxu1 %vm188_vm2, %v4013_v62  ;;  %6264 = vmatmul.mubr.msk.f32.vlgmr.msra.gmra.mxu0 %vm188_vm2, %v4169_v63 }
0x1daa   :  { %6267 = vmatpush3.xpose.msk.msra.mxu1 %vm188_vm2, %v4249_v61  ;;  %6268 = vmatprep.mubr.msk.f32.mxu1 %vm6633_vm1, %v6632_v6 }
0x1dab   :  { %6276 = vmatprep.subr.mxu1 %v6632_v6  ;;  %6273 = vmatprep.mubr.msk.f32.mxu0 %vm6633_vm1, %v6632_v6 }
0x1dad   :  { %6269 = vmatmul.mubr.msk.f32.vlgmr.msra.gmra.mxu1 %vm188_vm2, %v4247_v0 }
0x1dae   :  { %6278 = vmatprep.mubr.msk.f32.mxu1 %vm6633_vm1, %v6632_v6 }
0x1e65   :  { %v7307_v1 = vpop.f32.mrf.mxu0 }
0x1e67   :  { %v6255_v2 = vpop.f32.mrf.mxu0 }
0x1e69   :  { %v7309_v3 = vpop.f32.mrf.mxu1  ;;  %v4242_v4 = vpop.f32.mrf.mxu0 }
0x1e6a   :  { %v4324_v5 = vmul.f32 0.35355338, %v4242_v4 }
0x1e6b   :  { %v6260_v8 = vpop.f32.mrf.mxu1  ;;  %v6265_v9 = vpop.f32.mrf.mxu0 }
0x1e6c   :  { %v4326_v10 = vsel %vm188_vm2, %v4324_v5, -inf }
0x1e6d   :  { %4327 = vmax.xlane.f32.xlu0 %v4326_v10  ;;  %v4320_v11 = vpop.f32.mrf.mxu1 }
0x1e6e   :  { %v4325_v12 = vmul.f32 0.35355338, %v4320_v11 }
0x1e6f   :  { %v6270_v13 = vpop.f32.mrf.mxu1 }
0x1e70   :  { %v4329_v14 = vsel %vm188_vm2, %v4325_v12, -inf }
0x1e71   :  { %4330 = vmax.xlane.f32.xlu1 %v4329_v14 }
0x1e82   :  { %4351 = vrot.lane.b32.xlu1 %v7255_v32, %s6638_s22 }
0x1e83   :  { %4427 = vrot.lane.b32.xlu0 %v7251_v31, %s6638_s22 }
0x1e86   :  { %4505 = vrot.lane.b32.xlu1 %v7255_v32, %s6639_s23 }
0x1e8a   :  { %4583 = vrot.lane.b32.xlu1 %v7251_v31, %s6639_s23 }
0x1e8e   :  { %4581 = vrot.lane.b32.xlu1 %v7251_v31, %s6640_s24 }
0x1ef6   :  { %v4328_v15 = vpop.xlane.xlu0 %4327 }
0x1ef7   :  { %v4332_v16 = vsub.f32 %v4324_v5, %v4328_v15 }
0x1ef9   :  { %v4334_v17 = vmul.f32 1.442695, %v4332_v16 }
0x1efa   :  { %v4428_v7 = vpop.permute.xlu0 %4427  ;;  %v4331_v18 = vpop.xlane.xlu1 %4330 }
0x1efb   :  { %6466 = vpow2.f32 %v4334_v17  ;;  %v4333_v20 = vsub.f32 %v4325_v12, %v4331_v18  ;;  %6277 = vmatpush3.msra.mxu1 %v4428_v7 }
0x1efc   :  { %6286 = vmatprep.subr.mxu1 %v6632_v6 }
0x1efd   :  { %v4336_v21 = vmul.f32 1.442695, %v4333_v20 }
0x1efe   :  { %v4352_v22 = vpop.permute.xlu1 %4351 }
0x1eff   :  { %6468 = vpow2.f32 %v4336_v21  ;;  %6272 = vmatpush3.msra.mxu0 %v4352_v22 }
0x1f00   :  { %6281 = vmatprep.subr.mxu0 %v6632_v6 }
0x1f02   :  { %v4506_v29 = vpop.permute.xlu1 %4505 }
0x1f06   :  { %v4584_v34 = vpop.permute.xlu1 %4583 }
0x1f08   :  { %v6467_v23 = vpop.eup %6466 }
0x1f09   :  { %v4338_v24 = vsel %vm188_vm2, %v6467_v23, 0.0 }
0x1f0a   :  { %4339 = vadd.xlane.f32.xlu0 %v4338_v24  ;;  %v4582_v41 = vpop.permute.xlu1 %4581 }
0x1f0c   :  { %v6469_v25 = vpop.eup %6468 }
0x1f0d   :  { %v4341_v26 = vsel %vm188_vm2, %v6469_v25, 0.0 }
0x1f0e   :  { %4342 = vadd.xlane.f32.xlu0 %v4341_v26 }
0x1f24   :  { %4503 = vrot.lane.b32.xlu0 %v7255_v32, %s6640_s24 }
0x1f93   :  { %v4340_v27 = vpop.xlane.xlu0 %4339 }
0x1f94   :  { %6470 = vrcp.f32 %v4340_v27 }
0x1f97   :  { %v4343_v28 = vpop.xlane.xlu0 %4342 }
0x1f98   :  { %6472 = vrcp.f32 %v4343_v28 }
0x1f9b   :  { %v4504_v36 = vpop.permute.xlu0 %4503 }
0x1fa1   :  { %v6471_v19 = vpop.eup %6470 }
0x1fa2   :  { %v4345_v30 = vmul.f32 %v6471_v19, %v6467_v23 }
0x1fa4   :  { %4349 = vst.msk [vmem:[#allocation11 + $0x10] sm:$0xff] %vm188_vm2, %v4345_v30  ;;  %6274 = vmatmul.mubr.msk.f32.vlgmr.msra.gmra.mxu0 %vm188_vm2, %v4345_v30 }
0x1fa5   :  { %v6473_v33 = vpop.eup %6472  ;;  %6282 = vmatpush3.xpose.msk.msra.mxu0 %vm188_vm2, %v4506_v29  ;;  %6283 = vmatprep.mubr.msk.f32.mxu0 %vm6633_vm1, %v6632_v6 }
0x1fa6   :  { %v4347_v35 = vmul.f32 %v6473_v33, %v6469_v25  ;;  %6291 = vmatprep.subr.mxu0 %v6632_v6 }
0x1fa8   :  { %4350 = vst.msk [vmem:[#allocation11 + $0x18] sm:$0xff] %vm188_vm2, %v4347_v35  ;;  %6279 = vmatmul.mubr.msk.f32.vlgmr.msra.gmra.mxu1 %vm188_vm2, %v4347_v35  ;;  %6284 = vmatmul.mubr.msk.f32.vlgmr.msra.gmra.mxu0 %vm188_vm2, %v4504_v36 }
0x1fa9   :  { %6287 = vmatpush3.xpose.msk.msra.mxu1 %vm188_vm2, %v4584_v34  ;;  %6288 = vmatprep.mubr.msk.f32.mxu1 %vm6633_vm1, %v6632_v6 }
0x1faa   :  { %6296 = vmatprep.subr.mxu1 %v6632_v6  ;;  %6293 = vmatprep.mubr.msk.f32.mxu0 %vm6633_vm1, %v6632_v6 }
0x1fac   :  { %6289 = vmatmul.mubr.msk.f32.vlgmr.msra.gmra.mxu1 %vm188_vm2, %v4582_v41 }
0x1fad   :  { %6298 = vmatprep.mubr.msk.f32.mxu1 %vm6633_vm1, %v6632_v6 }
0x2064   :  { %v7347_v37 = vpop.f32.mrf.mxu0 }
0x2066   :  { %v6275_v43 = vpop.f32.mrf.mxu0 }
0x2068   :  { %v7349_v38 = vpop.f32.mrf.mxu1  ;;  %v4577_v39 = vpop.f32.mrf.mxu0 }
0x2069   :  { %v4659_v40 = vmul.f32 0.35355338, %v4577_v39  ;;  %v5757_v39 = vld [vmem:[%s7502_s2 + $0x50] sm:$0xff] }
0x206a   :  { %v6280_v42 = vpop.f32.mrf.mxu1  ;;  %v6285_v44 = vpop.f32.mrf.mxu0 }
0x206b   :  { %v4661_v45 = vsel %vm188_vm2, %v4659_v40, -inf  ;;  %v5755_v42 = vld [vmem:[%s7502_s2 + $0x40] sm:$0xff] }
0x206c   :  { %4662 = vmax.xlane.f32.xlu0 %v4661_v45  ;;  %v4655_v46 = vpop.f32.mrf.mxu1 }
0x206d   :  { %v4660_v47 = vmul.f32 0.35355338, %v4655_v46 }
0x206e   :  { %v6290_v48 = vpop.f32.mrf.mxu1 }
0x206f   :  { %v4664_v53 = vsel %vm188_vm2, %v4660_v47, -inf }
0x2070   :  { %4665 = vmax.xlane.f32.xlu1 %v4664_v53 }
0x2081   :  { %4686 = vrot.lane.b32.xlu1 %v7255_v32, %s6641_s0 }
0x2082   :  { %4762 = vrot.lane.b32.xlu0 %v7251_v31, %s6641_s0 }
0x2085   :  { %4840 = vrot.lane.b32.xlu1 %v7255_v32, %s6642_s27 }
0x2089   :  { %4918 = vrot.lane.b32.xlu1 %v7251_v31, %s6642_s27  ;;  %s6646_s27 = smov [#allocation11]  }
0x208d   :  { %4916 = vrot.lane.b32.xlu1 %v7251_v31, %s6643_s28 }
0x20f5   :  { %v4663_v49 = vpop.xlane.xlu0 %4662 }
0x20f6   :  { %v4667_v55 = vsub.f32 %v4659_v40, %v4663_v49  ;;  %v5756_v40 = vld [vmem:[%s7502_s2 + $0x48] sm:$0xff] }
0x20f8   :  { %v4669_v50 = vmul.f32 1.442695, %v4667_v55 }
0x20f9   :  { %v4763_v51 = vpop.permute.xlu0 %4762  ;;  %v4666_v52 = vpop.xlane.xlu1 %4665 }
0x20fa   :  { %6474 = vpow2.f32 %v4669_v50  ;;  %v4668_v54 = vsub.f32 %v4660_v47, %v4666_v52  ;;  %6297 = vmatpush3.msra.mxu1 %v4763_v51 }
0x20fb   :  { %6306 = vmatprep.subr.mxu1 %v6632_v6 }
0x20fc   :  { %v4671_v56 = vmul.f32 1.442695, %v4668_v54 }
0x20fd   :  { %v4687_v57 = vpop.permute.xlu1 %4686 }
0x20fe   :  { %6476 = vpow2.f32 %v4671_v56  ;;  %6292 = vmatpush3.msra.mxu0 %v4687_v57 }
0x20ff   :  { %6301 = vmatprep.subr.mxu0 %v6632_v6 }
0x2101   :  { %v4841_v0 = vpop.permute.xlu1 %4840 }
0x2105   :  { %v4919_v8 = vpop.permute.xlu1 %4918 }
0x2107   :  { %v6475_v58 = vpop.eup %6474 }
0x2108   :  { %v4673_v59 = vsel %vm188_vm2, %v6475_v58, 0.0 }
0x2109   :  { %4674 = vadd.xlane.f32.xlu0 %v4673_v59  ;;  %v4917_v11 = vpop.permute.xlu1 %4916 }
0x210b   :  { %v6477_v60 = vpop.eup %6476 }
0x210c   :  { %v4676_v61 = vsel %vm188_vm2, %v6477_v60, 0.0 }
0x210d   :  { %4677 = vadd.xlane.f32.xlu0 %v4676_v61  ;;  %v5765_v61 = vld [vmem:[%s7505_s5 + $0x40] sm:$0xff] }
0x2123   :  { %4838 = vrot.lane.b32.xlu0 %v7255_v32, %s6643_s28  ;;  %s5608_s28 = sshll.u32 %s6646_s27, 4  ;;  %s5609_s28 = int_to_ptr.vmem [resolvable:$true] %s5608_s28 }
0x2124   :  { %p6579_p7 = scmp.lt.s32.totalorder %s5609_s28, %s5609_s28 }
0x2192   :  { %v4675_v62 = vpop.xlane.xlu0 %4674 }
0x2193   :  { %6478 = vrcp.f32 %v4675_v62  ;;  %v5779_v62 = vld [vmem:[%s7507_s7 + $0xb8] sm:$0xff] }
0x2196   :  { %v4678_v63 = vpop.xlane.xlu0 %4677 }
0x2197   :  { %6480 = vrcp.f32 %v4678_v63  ;;  %v5778_v63 = vld [vmem:[%s7507_s7 + $0xb0] sm:$0xff] }
0x219a   :  { %v4839_v10 = vpop.permute.xlu0 %4838 }
0x21a0   :  { %v6479_v2 = vpop.eup %6478 }
0x21a1   :  { %v4680_v4 = vmul.f32 %v6479_v2, %v6475_v58  ;;  %v5776_v2 = vld [vmem:[%s7507_s7 + $0xa0] sm:$0xff] }
0x21a3   :  { %4684 = vst.msk [vmem:[#allocation11 + $0x20] sm:$0xff] %vm188_vm2, %v4680_v4  ;;  %6294 = vmatmul.mubr.msk.f32.vlgmr.msra.gmra.mxu0 %vm188_vm2, %v4680_v4 }
0x21a4   :  { %v6481_v5 = vpop.eup %6480  ;;  %6302 = vmatpush3.xpose.msk.msra.mxu0 %vm188_vm2, %v4841_v0  ;;  %6303 = vmatprep.mubr.msk.f32.mxu0 %vm6633_vm1, %v6632_v6  ;;  %v5777_v0 = vld [vmem:[%s7507_s7 + $0xa8] sm:$0xff] }
0x21a5   :  { %v4682_v9 = vmul.f32 %v6481_v5, %v6477_v60  ;;  %6311 = vmatprep.subr.mxu0 %v6632_v6  ;;  %v5767_v60 = vld [vmem:[%s7505_s5 + $0x50] sm:$0xff] }
0x21a7   :  { %4685 = vst.msk [vmem:[#allocation11 + $0x28] sm:$0xff] %vm188_vm2, %v4682_v9  ;;  %6299 = vmatmul.mubr.msk.f32.vlgmr.msra.gmra.mxu1 %vm188_vm2, %v4682_v9  ;;  %6304 = vmatmul.mubr.msk.f32.vlgmr.msra.gmra.mxu0 %vm188_vm2, %v4839_v10 }
0x21a8   :  { %6307 = vmatpush3.xpose.msk.msra.mxu1 %vm188_vm2, %v4919_v8  ;;  %6308 = vmatprep.mubr.msk.f32.mxu1 %vm6633_vm1, %v6632_v6 }
0x21a9   :  { %6316 = vmatprep.subr.mxu1 %v6632_v6  ;;  %6313 = vmatprep.mubr.msk.f32.mxu0 %vm6633_vm1, %v6632_v6 }
0x21ab   :  { %6309 = vmatmul.mubr.msk.f32.vlgmr.msra.gmra.mxu1 %vm188_vm2, %v4917_v11 }
0x21ac   :  { %6318 = vmatprep.mubr.msk.f32.mxu1 %vm6633_vm1, %v6632_v6 }
0x2263   :  { %v4758_v12 = vpop.f32.mrf.mxu0 }
0x2265   :  { %v6295_v13 = vpop.f32.mrf.mxu0 }
0x2267   :  { %v4834_v14 = vpop.f32.mrf.mxu1  ;;  %v4912_v15 = vpop.f32.mrf.mxu0 }
0x2268   :  { %v4994_v16 = vmul.f32 0.35355338, %v4912_v15 }
0x2269   :  { %v6300_v17 = vpop.f32.mrf.mxu1  ;;  %v6305_v7 = vpop.f32.mrf.mxu0 }
0x226a   :  { %v4996_v18 = vsel %vm188_vm2, %v4994_v16, -inf }
0x226b   :  { %4997 = vmax.xlane.f32.xlu0 %v4996_v18  ;;  %v4990_v20 = vpop.f32.mrf.mxu1 }
0x226c   :  { %v4995_v21 = vmul.f32 0.35355338, %v4990_v20 }
0x226d   :  { %v6310_v22 = vpop.f32.mrf.mxu1 }
0x226e   :  { %v4999_v23 = vsel %vm188_vm2, %v4995_v21, -inf }
0x226f   :  { %5000 = vmax.xlane.f32.xlu1 %v4999_v23 }
0x2280   :  { %5021 = vrot.lane.b32.xlu1 %v7255_v32, %s6644_s29 }
0x2284   :  { %5175 = vrot.lane.b32.xlu1 %v7347_v37, %s6629_s15 }
0x2288   :  { %5177 = vrot.lane.b32.xlu1 %v7349_v38, %s6629_s15 }
0x228c   :  { %5185 = vrot.lane.b32.xlu1 %v4834_v14, %s6625_s25 }
0x22f4   :  { %v4998_v6 = vpop.xlane.xlu0 %4997 }
0x22f5   :  { %v5002_v24 = vsub.f32 %v4994_v16, %v4998_v6 }
0x22f7   :  { %v5004_v25 = vmul.f32 1.442695, %v5002_v24 }
0x22f8   :  { %v5001_v26 = vpop.xlane.xlu1 %5000 }
0x22f9   :  { %6482 = vpow2.f32 %v5004_v25  ;;  %v5003_v27 = vsub.f32 %v4995_v21, %v5001_v26 }
0x22fb   :  { %v5006_v28 = vmul.f32 1.442695, %v5003_v27 }
0x22fc   :  { %v5022_v29 = vpop.permute.xlu1 %5021 }
0x22fd   :  { %6484 = vpow2.f32 %v5006_v28  ;;  %6312 = vmatpush3.msra.mxu0 %v5022_v29 }
0x2300   :  { %v5176_v48 = vpop.permute.xlu1 %5175 }
0x2301   :  { %v5197_v55 = vsel %vm188_vm2, %v7307_v1, %v5176_v48  ;;  %v5768_v1 = vld [vmem:[%s7505_s5 + $0x58] sm:$0xff]  ;;  %v5769_v48 = vld [vmem:[#allocation5 + $0x2] ss:$0 sm:$0xff] }
0x2304   :  { %v5178_v53 = vpop.permute.xlu1 %5177 }
0x2305   :  { %v5198_v56 = vsel %vm188_vm2, %v7309_v3, %v5178_v53  ;;  %v5766_v3 = vld [vmem:[%s7505_s5 + $0x48] sm:$0xff] }
0x2306   :  { %v6483_v19 = vpop.eup %6482 }
0x2307   :  { %v5008_v32 = vsel %vm188_vm2, %v6483_v19, 0.0 }
0x2308   :  { %5009 = vadd.xlane.f32.xlu0 %v5008_v32  ;;  %v5186_v50 = vpop.permute.xlu1 %5185 }
0x2309   :  { %v5200_v57 = vsel %vm1538_vm4, %v5198_v56, %v5186_v50 }
0x230a   :  { %v6485_v30 = vpop.eup %6484 }
0x230b   :  { %v5011_v33 = vsel %vm188_vm2, %v6485_v30, 0.0 }
0x230c   :  { %5012 = vadd.xlane.f32.xlu0 %v5011_v33 }
0x2322   :  { %5097 = vrot.lane.b32.xlu0 %v7251_v31, %s6644_s29  ;;  %v5758_v31 = vld [vmem:[%s7502_s2 + $0x58] sm:$0xff]  ;;  %s6574_s29 = scalar_lea.vmem %s5609_s28, 1024 }
0x2323   :  { %6321 = vmatprep.subr.mxu0 %v5758_v31  ;;  %p6575_p6 = scmp.ne.s32.totalorder %s5609_s28, %s6574_s29  ;;  %p6580_p8 = scmp.lt.s32.totalorder %s6574_s29, %s6574_s29 }
0x2325   :  { %p6581_p9 = por %p6580_p8, %p6579_p7 }
0x2326   :  { %5183 = vrot.lane.b32.xlu0 %v4758_v12, %s6625_s25 }
0x2327   :  { %p6582_p10 = pnand %p6581_p9, %p6575_p6 }
0x2391   :  { %v5010_v34 = vpop.xlane.xlu0 %5009 }
0x2392   :  { %6486 = vrcp.f32 %v5010_v34 }
0x2395   :  { %v5013_v35 = vpop.xlane.xlu0 %5012 }
0x2396   :  { %6488 = vrcp.f32 %v5013_v35 }
0x2399   :  { %v5098_v36 = vpop.permute.xlu0 %5097 }
0x239a   :  { %6317 = vmatpush3.msra.mxu1 %v5098_v36 }
0x239b   :  { %6332 = vmatprep.subr.mxu1 %v5768_v1 }
0x239d   :  { %v5184_v49 = vpop.permute.xlu0 %5183 }
0x239e   :  { %v5199_v51 = vsel %vm1538_vm4, %v5197_v55, %v5184_v49 }
0x239f   :  { %v6487_v41 = vpop.eup %6486 }
0x23a0   :  { %v5015_v37 = vmul.f32 %v6487_v41, %v6483_v19  ;;  %v5763_v41 = vld [vmem:[%s7503_s3 + $0x2] ss:$0 sm:$0xff] }
0x23a2   :  { %5019 = vst.msk [vmem:[#allocation11 + $0x30] sm:$0xff] %vm188_vm2, %v5015_v37  ;;  %6314 = vmatmul.mubr.msk.f32.vlgmr.msra.gmra.mxu0 %vm188_vm2, %v5015_v37 }
0x23a3   :  { %v6489_v43 = vpop.eup %6488  ;;  %6322 = vmatpush3.msra.mxu0 %v5758_v31 }
0x23a4   :  { %v5017_v38 = vmul.f32 %v6489_v43, %v6485_v30  ;;  %6323 = vmatprep.subr.mxu0 %v5757_v39 }
0x23a5   :  { %6324 = vmatpush3.msra.mxu0 %v5757_v39 }
0x23a6   :  { %5020 = vst.msk [vmem:[#allocation11 + $0x38] sm:$0xff] %vm188_vm2, %v5017_v38  ;;  %6319 = vmatmul.mubr.msk.f32.vlgmr.msra.gmra.mxu1 %vm188_vm2, %v5017_v38  ;;  %6325 = vmatprep.subr.mxu0 %v5756_v40  ;;  %v5764_v38 = vld [vmem:[%s7504_s4 + $0x2] ss:$0 sm:$0xff] }
0x23a7   :  { %6326 = vmatpush3.msra.mxu0 %v5756_v40  ;;  %6333 = vmatpush3.msra.mxu1 %v5768_v1 }
0x23a8   :  { %6327 = vmatprep.subr.mxu0 %v5755_v42  ;;  %6334 = vmatprep.subr.mxu1 %v5767_v60 }
0x23a9   :  { %6328 = vmatpush3.msra.mxu0 %v5755_v42  ;;  %6335 = vmatpush3.msra.mxu1 %v5767_v60 }
0x23aa   :  { %6336 = vmatprep.subr.mxu1 %v5766_v3  ;;  %6343 = vmatprep.subr.mxu0 %v5779_v62 }
0x23ab   :  { %6337 = vmatpush3.msra.mxu1 %v5766_v3 }
0x23ac   :  { %6338 = vmatprep.subr.mxu1 %v5765_v61 }
0x23ad   :  { %6339 = vmatpush3.msra.mxu1 %v5765_v61 }
0x2462   :  { %v5093_v44 = vpop.f32.mrf.mxu0 }
0x2463   :  { %5191 = vrot.lane.b32.xlu0 %v5093_v44, %s6645_s8  ;;  %v5775_v44 = vld [vmem:[%s7507_s7 + $0x98] sm:$0xff] }
0x2464   :  { %v6315_v45 = vpop.f32.mrf.mxu0 }
0x2465   :  { %v5774_v45 = vld [vmem:[%s7507_s7 + $0x90] sm:$0xff] }
0x2466   :  { %v5169_v46 = vpop.f32.mrf.mxu1 }
0x2467   :  { %5193 = vrot.lane.b32.xlu1 %v5169_v46, %s6645_s8  ;;  %v5773_v46 = vld [vmem:[%s7507_s7 + $0x88] sm:$0xff] }
0x2468   :  { %v6320_v47 = vpop.f32.mrf.mxu1 }
0x2469   :  { %v5772_v47 = vld [vmem:[%s7507_s7 + $0x80] sm:$0xff] }
0x24d5   :  { %v5192_v52 = vpop.permute.xlu0 %5191 }
0x24d6   :  { %v5201_v54 = vsel %vm1541_vm3, %v5199_v51, %v5192_v52 }
0x24d7   :  { %6329 = vmatprep.mubr.msk.f32.mxu0 %vm103_vm0, %v5201_v54 }
0x24d9   :  { %v5194_v58 = vpop.permute.xlu1 %5193 }
0x24da   :  { %v5202_v59 = vsel %vm1541_vm3, %v5200_v57, %v5194_v58 }
0x24db   :  { %6330 = vmatmul.mubr.msk.f32.vlgmr.msra.gmra.mxu0 %vm103_vm0, %v5202_v59 }
0x24dc   :  { %6344 = vmatpush3.msra.mxu0 %v5779_v62 }
0x24dd   :  { %6345 = vmatprep.subr.mxu0 %v5778_v63 }
0x24de   :  { %6346 = vmatpush3.msra.mxu0 %v5778_v63 }
0x24df   :  { %6347 = vmatprep.subr.mxu0 %v5777_v0 }
0x24e0   :  { %6348 = vmatpush3.msra.mxu0 %v5777_v0 }
0x24e1   :  { %6349 = vmatprep.subr.mxu0 %v5776_v2 }
0x24e2   :  { %6350 = vmatpush3.msra.mxu0 %v5776_v2 }
0x24e3   :  { %6351 = vmatprep.subr.mxu0 %v5775_v44 }
0x24e4   :  { %6352 = vmatpush3.msra.mxu0 %v5775_v44 }
0x24e5   :  { %6353 = vmatprep.subr.mxu0 %v5774_v45 }
0x24e6   :  { %6354 = vmatpush3.msra.mxu0 %v5774_v45 }
0x24e7   :  { %6355 = vmatprep.subr.mxu0 %v5773_v46 }
0x24e8   :  { %6356 = vmatpush3.msra.mxu0 %v5773_v46 }
0x24e9   :  { %6357 = vmatprep.subr.mxu0 %v5772_v47 }
0x24ea   :  { %6358 = vmatpush3.msra.mxu0 %v5772_v47 }
0x259b   :  { %v6331_v4 = vpop.f32.mrf.mxu0 }
0x259c   :  { %v5290_v5 = vadd.f32 %v6331_v4, %v6331_v4 }
0x259d   :  { %v5280_v8 = vpop.f32.mrf.mxu0 }
0x259e   :  { %v5305_v9 = vmul.f32 %v5290_v5, %v5290_v5  ;;  %v5289_v10 = vadd.f32 %v5280_v8, %v5280_v8  ;;  %v5296_v11 = vsel %vm103_vm0, %v5290_v5, 0.0 }
0x25a0   :  { %v5295_v12 = vsel %vm103_vm0, %v5289_v10, 0.0  ;;  %v5304_v13 = vmul.f32 %v5289_v10, %v5289_v10  ;;  %v5307_v15 = vsel %vm103_vm0, %v5305_v9, 0.0 }
0x25a1   :  { %v5297_v14 = vadd.f32 %v5296_v11, %v5295_v12 }
0x25a2   :  { %v5306_v16 = vsel %vm103_vm0, %v5304_v13, 0.0 }
0x25a3   :  { %v5298_v17 = vrot.slane %v5297_v14, 4  ;;  %v5308_v7 = vadd.f32 %v5307_v15, %v5306_v16 }
0x25a5   :  { %v5299_v18 = vadd.f32 %v5298_v17, %v5297_v14  ;;  %v5309_v20 = vrot.slane %v5308_v7, 4 }
0x25a7   :  { %v5300_v21 = vrot.slane %v5299_v18, 2  ;;  %v5310_v22 = vadd.f32 %v5309_v20, %v5308_v7 }
0x25a9   :  { %v5301_v23 = vadd.f32 %v5300_v21, %v5299_v18  ;;  %v5311_v6 = vrot.slane %v5310_v22, 2 }
0x25ab   :  { %v5302_v24 = vrot.slane %v5301_v23, 1  ;;  %v5312_v25 = vadd.f32 %v5311_v6, %v5310_v22 }
0x25ad   :  { %v5303_v26 = vadd.f32 %v5302_v24, %v5301_v23  ;;  %v5313_v27 = vrot.slane %v5312_v25, 1 }
0x25af   :  { %v5314_v28 = vadd.f32 %v5313_v27, %v5312_v25  ;;  %v5315_v29 = vmul.f32 0.0625, %v5303_v26 }
0x25b1   :  { %v5316_v19 = vmul.f32 0.0625, %v5314_v28  ;;  %v5317_v32 = vmul.f32 %v5315_v29, %v5315_v29  ;;  %v5319_v34 = vsub.f32 %v5289_v10, %v5315_v29  ;;  %v5320_v35 = vsub.f32 %v5290_v5, %v5315_v29 }
0x25b3   :  { %v5318_v30 = vsub.f32 %v5316_v19, %v5317_v32 }
0x25b5   :  { %v5321_v33 = vadd.f32 1e-05, %v5318_v30 }
0x25b7   :  { %6490 = vrsqrt.f32 %v5321_v33 }
0x25c4   :  { %v6491_v36 = vpop.eup %6490 }
0x25c5   :  { %v5323_v37 = vmul.f32 %v6491_v36, %v5319_v34  ;;  %v5324_v43 = vmul.f32 %v6491_v36, %v5320_v35 }
0x25c7   :  { %v5331_v31 = vmul.f32 %v5763_v41, %v5323_v37  ;;  %v5332_v39 = vmul.f32 %v5763_v41, %v5324_v43 }
0x25c9   :  { %v5339_v40 = vadd.f32 %v5764_v38, %v5331_v31  ;;  %v5340_v42 = vadd.f32 %v5764_v38, %v5332_v39 }
0x25cb   :  { %6340 = vmatprep.mubr.msk.f32.mxu1 %vm103_vm0, %v5339_v40 }
0x25cc   :  { %6341 = vmatmul.mubr.msk.f32.vlgmr.msra.gmra.mxu1 %vm103_vm0, %v5340_v42 }
0x268c   :  { %v6342_v53 = vpop.f32.mrf.mxu1 }
0x268d   :  { %v5432_v49 = vadd.f32 %v6342_v53, %v5769_v48 }
0x268e   :  { %v5426_v55 = vpop.f32.mrf.mxu1 }
0x268f   :  { %v5427_v50 = vadd.f32 %v5769_v48, %v5426_v55  ;;  %v5436_v52 = vmax.f32 %v5432_v49, 0.0 }
0x2691   :  { %v5435_v51 = vmax.f32 %v5427_v50, 0.0 }
0x2693   :  { %6359 = vmatprep.mubr.msk.f32.mxu0 %vm1788_vm5, %v5435_v51 }
0x2694   :  { %6360 = vmatmul.mubr.msk.f32.vlgmr.msra.gmra.mxu0 %vm1788_vm5, %v5436_v52 }
0x2695   :  { %6585 = shalt.err (!%p6582_p10)
}
0x2696   :  { %s7515_s7 = smov 128   ;;  %v5780_v54 = vld [vmem:[#allocation7 + $0x2] ss:$0 sm:$0xff]  ;;  %v5784_v29 = vld [vmem:[%s7509_s9 + $0x2] ss:$0 sm:$0xff]  ;;  %s6647_s26 = smov [#allocation10]  }
0x2697   :  { %5614 = dma.vmem_to_hbm [thread:$0]  %s5609_s28, 1024, %s7512_s12, [#allocation12], %s7515_s7, %s7515_s7, %s6629_s15   ;;  %v5785_v30 = vld [vmem:[#allocation8 + $0x2] ss:$0 sm:$0xff] }
0x2698   :  { %s5596_s14 = sshll.u32 %s6647_s26, 4  ;;  %s5597_s14 = int_to_ptr.vmem [resolvable:$true] %s5596_s14 }
0x2699   :  { %s6594_s6 = scalar_lea.vmem %s5597_s14, 256  ;;  %p6599_p12 = scmp.lt.s32.totalorder %s5597_s14, %s5597_s14 }
0x269a   :  { %p6595_p11 = scmp.ne.s32.totalorder %s5597_s14, %s6594_s6  ;;  %p6600_p13 = scmp.lt.s32.totalorder %s6594_s6, %s6594_s6 }
0x269c   :  { %p6601_p0 = por %p6600_p13, %p6599_p12 }
0x269e   :  { %p6602_p1 = pnand %p6601_p0, %p6595_p11 }
0x2754   :  { %v6361_v56 = vpop.f32.mrf.mxu0 }
0x2755   :  { %v5532_v57 = vadd.f32 %v6361_v56, %v5780_v54 }
0x2756   :  { %v5526_v58 = vpop.f32.mrf.mxu0 }
0x2757   :  { %v5536_v59 = vadd.f32 %v5532_v57, %v5340_v42  ;;  %v5527_v1 = vadd.f32 %v5780_v54, %v5526_v58 }
0x2759   :  { %v5538_v60 = vadd.f32 %v5536_v59, %v5536_v59  ;;  %v5535_v3 = vadd.f32 %v5527_v1, %v5339_v40 }
0x275b   :  { %v5553_v61 = vmul.f32 %v5538_v60, %v5538_v60  ;;  %v5537_v62 = vadd.f32 %v5535_v3, %v5535_v3  ;;  %v5544_v63 = vsel %vm103_vm0, %v5538_v60, 0.0 }
0x275d   :  { %v5543_v0 = vsel %vm103_vm0, %v5537_v62, 0.0  ;;  %v5552_v2 = vmul.f32 %v5537_v62, %v5537_v62  ;;  %v5555_v5 = vsel %vm103_vm0, %v5553_v61, 0.0 }
0x275e   :  { %v5545_v4 = vadd.f32 %v5544_v63, %v5543_v0 }
0x275f   :  { %v5554_v8 = vsel %vm103_vm0, %v5552_v2, 0.0 }
0x2760   :  { %v5546_v9 = vrot.slane %v5545_v4, 4  ;;  %v5556_v10 = vadd.f32 %v5555_v5, %v5554_v8 }
0x2762   :  { %v5547_v11 = vadd.f32 %v5546_v9, %v5545_v4  ;;  %v5557_v12 = vrot.slane %v5556_v10, 4 }
0x2764   :  { %v5548_v13 = vrot.slane %v5547_v11, 2  ;;  %v5558_v14 = vadd.f32 %v5557_v12, %v5556_v10 }
0x2766   :  { %v5549_v15 = vadd.f32 %v5548_v13, %v5547_v11  ;;  %v5559_v16 = vrot.slane %v5558_v14, 2 }
0x2768   :  { %v5550_v17 = vrot.slane %v5549_v15, 1  ;;  %v5560_v7 = vadd.f32 %v5559_v16, %v5558_v14 }
0x276a   :  { %v5551_v18 = vadd.f32 %v5550_v17, %v5549_v15  ;;  %v5561_v20 = vrot.slane %v5560_v7, 1 }
0x276c   :  { %v5562_v21 = vadd.f32 %v5561_v20, %v5560_v7  ;;  %v5563_v22 = vmul.f32 0.0625, %v5551_v18 }
0x276e   :  { %v5564_v23 = vmul.f32 0.0625, %v5562_v21  ;;  %v5565_v6 = vmul.f32 %v5563_v22, %v5563_v22  ;;  %v5567_v26 = vsub.f32 %v5537_v62, %v5563_v22  ;;  %v5568_v27 = vsub.f32 %v5538_v60, %v5563_v22 }
0x2770   :  { %v5566_v24 = vsub.f32 %v5564_v23, %v5565_v6 }
0x2772   :  { %v5569_v25 = vadd.f32 1e-05, %v5566_v24 }
0x2774   :  { %6492 = vrsqrt.f32 %v5569_v25 }
0x2781   :  { %v6493_v28 = vpop.eup %6492 }
0x2782   :  { %v5571_v19 = vmul.f32 %v6493_v28, %v5567_v26  ;;  %v5572_v32 = vmul.f32 %v6493_v28, %v5568_v27 }
0x2784   :  { %v5579_v33 = vmul.f32 %v5784_v29, %v5571_v19  ;;  %v5580_v34 = vmul.f32 %v5784_v29, %v5572_v32 }
0x2786   :  { %v5587_v35 = vadd.f32 %v5785_v30, %v5579_v33  ;;  %v5588_v36 = vadd.f32 %v5785_v30, %v5580_v34 }
0x2788   :  { %5589 = vst.msk [vmem:[#allocation10] sm:$0xff] %vm103_vm0, %v5587_v35  ;;  %5590 = vst.msk [vmem:[#allocation10 + $0x8] sm:$0xff] %vm103_vm0, %v5588_v36 }
0x2789   :  { %6605 = shalt.err (!%p6602_p1)
}
0x278a   :  { %5602 = dma.vmem_to_hbm [thread:$0]  %s5597_s14, 256, %s7511_s11, [#allocation4], %s7515_s7, %s7515_s7, %s6629_s15  }
0x278b   :  { %6620 = dma.done.wait [#allocation4], 256  }
0x278c   :  { %6621 = vsyncadd [#allocation4], 4294967040 }
0x278d   :  { %6622 = dma.done.wait [#allocation12], 1024  }
0x278e   :  { %6623 = vsyncadd [#allocation12], 4294966272 }
0x278f   :  { %5621 = vsyncpa [#allocation3], 1 }
0x2790   :  { %5622 = vsyncpa [#allocation6], 1 }
0x2791   :  { %5623 = vsyncpa [#allocation9], 1 }
0x2792   :  { %5624 = vsyncpa [#allocation4], 1 }
0x2793   :  { %5625 = vsyncpa [#allocation12], 1 }

</bundles_post_ra>
